<compile_context>
chip_gen: v7x
topology: tpu7x:2x2x1
jax: 0.10.0
libtpu: 0.0.40
codegen_flags: <defaults>
</compile_context>

<pallas_src>
import jax
import jax.numpy as jnp
from jax import lax
from jax.experimental import pallas as pl
from jax.experimental.pallas import tpu as pltpu


# ------------------------------ fused kernel ------------------------------ #

def _make_fused_kernel(num_layers, b_tile, L, K, pad, c_in0, filters, L_pad):
    """Fused forward for one fixed architecture.

    Activation layout in VMEM: (L_pad, c_max, b_tile) -- sequence positions as
    leading planes (with `pad` zero halo planes on each side), channels on
    sublanes, batch on lanes.
    """

    def kernel(*refs):
        x_ref = refs[0]
        conv_refs = refs[1:1 + 2 * num_layers]
        fcw_ref = refs[1 + 2 * num_layers]      # (L, n_pad, filters) bf16
        fcb_ref = refs[2 + 2 * num_layers]      # (n_pad, 1) f32
        o_ref = refs[3 + 2 * num_layers]        # (n_pad, b_tile) f32
        act = refs[4 + 2 * num_layers]          # VMEM (L_pad, c_max, b_tile) f32

        c_max = act.shape[1]

        # Zero only the halo planes (the "same" padding).  Interior planes are
        # fully overwritten below; stale interior channels beyond the channels
        # actually read by a layer are never consumed (see note in review).
        if pad > 0:
            act[0:pad, :, :] = jnp.zeros((pad, c_max, b_tile), jnp.float32)
            act[pad + L:L_pad, :, :] = jnp.zeros(
                (L_pad - L - pad, c_max, b_tile), jnp.float32)

        # Input block arrives already in (L, C_in, b_tile) layout.
        act[pad:pad + L, :c_in0, :] = x_ref[...]

        c_in = c_in0
        y = None
        for i in range(num_layers):
            w_ref = conv_refs[2 * i]            # (K, L, filters, c_in) bf16
            b_ref = conv_refs[2 * i + 1]        # (1, filters, 1) f32
            # One cast of the padded activation per layer; per-tap reads are
            # leading-plane slices of this value (no relayout, no concat).
            xa = act[:, :c_in, :].astype(jnp.bfloat16)   # (L_pad, c_in, b_tile)
            acc = jnp.zeros((L, filters, b_tile), jnp.float32)
            for k in range(K):
                acc = acc + jnp.einsum(
                    'lfc,lcb->lfb', w_ref[k], xa[k:k + L],
                    preferred_element_type=jnp.float32)
            y = jnp.maximum(acc + b_ref[...], 0.0)        # f32 bias + ReLU
            if i + 1 < num_layers:                        # stay VMEM-resident
                act[pad:pad + L, :filters, :] = y
            c_in = filters

        # fc: one batched contraction over f, then reduce over l.  fc weight is
        # pre-permuted to (L, n_pad, filters) so torch's f*L + l flatten order
        # is already absorbed; classes are zero-padded to a lane-dense 128.
        t = jnp.einsum('lnf,lfb->lnb', fcw_ref[...], y.astype(jnp.bfloat16),
                       preferred_element_type=jnp.float32)
        o_ref[...] = t.sum(axis=0) + fcb_ref[...]

    return kernel


# -------------------------------- wrapper ---------------------------------- #

def multilayer_cnn_forward(prepped, x_ncw, b_tile=128):
    """Forward matching MultiLayerCNN.  x_ncw: (B, C_in, L) (PyTorch NCW)."""
    B, Ci, L = x_ncw.shape
    conv_ws, conv_bs = prepped["conv_ws"], prepped["conv_bs"]
    num_layers = len(conv_ws)
    K, L_w, filters, Ci_w = conv_ws[0].shape
    assert L_w == L and Ci_w == Ci
    assert K % 2 == 1, "padding=(K-1)//2 gives 'same' length only for odd K"
    pad = (K - 1) // 2
    L_pad = L + 2 * pad
    n_pad = prepped["fc_w"].shape[1]
    num_classes = prepped["num_classes"]
    c_max = max(Ci, filters)

    b_tile = min(b_tile, max(B, 1))
    B_pad = ((B + b_tile - 1) // b_tile) * b_tile

    # One small layout transform of the raw input: (B, C, L) -> (L, C, B) so the
    # lane axis carries batch (lane-dense inside the kernel).
    x_lcb = jnp.transpose(x_ncw, (2, 1, 0))
    if B_pad != B:
        x_lcb = jnp.pad(x_lcb, ((0, 0), (0, 0), (0, B_pad - B)))

    kernel = _make_fused_kernel(num_layers, b_tile, L, K, pad, Ci, filters, L_pad)

    in_specs = [pl.BlockSpec((L, Ci, b_tile), lambda b: (0, 0, b))]
    args = [x_lcb]
    for w, bb in zip(conv_ws, conv_bs):
        in_specs.append(pl.BlockSpec(w.shape, lambda b, nd=w.ndim: (0,) * nd))
        in_specs.append(pl.BlockSpec(bb.shape, lambda b, nd=bb.ndim: (0,) * nd))
        args += [w, bb]
    in_specs.append(pl.BlockSpec(prepped["fc_w"].shape, lambda b: (0, 0, 0)))
    in_specs.append(pl.BlockSpec(prepped["fc_b"].shape, lambda b: (0, 0)))
    args += [prepped["fc_w"], prepped["fc_b"]]

    out = pl.pallas_call(
        kernel,
        out_shape=jax.ShapeDtypeStruct((n_pad, B_pad), jnp.float32),
        grid=(B_pad // b_tile,),
        in_specs=in_specs,
        out_specs=pl.BlockSpec((n_pad, b_tile), lambda b: (0, b)),
        scratch_shapes=[pltpu.VMEM((L_pad, c_max, b_tile), jnp.float32)],
        compiler_params=pltpu.CompilerParams(
            dimension_semantics=("parallel",)),
    )(*args)

    # Kernel emits lane-dense (n_pad, B_pad); slice + transpose outside.
    return out[:num_classes, :B].T


# ----------------------- parameters (torch-like init) ---------------------- #

def init_params(key, input_channels, seq_len, num_conv_layers,
                conv_filters, kernel_size, num_classes):
    keys = jax.random.split(key, 2 * num_conv_layers + 2)
    conv_ws, conv_bs = [], []
    c_in, ki = input_channels, 0
    for _ in range(num_conv_layers):
        bound = 1.0 / float(jnp.sqrt(c_in * kernel_size))
        conv_ws.append(jax.random.uniform(
            keys[ki], (conv_filters, c_in, kernel_size), jnp.float32, -bound, bound))
        ki += 1
        conv_bs.append(jax.random.uniform(
            keys[ki], (conv_filters,), jnp.float32, -bound, bound))
        ki += 1
        c_in = conv_filters
    fan_in = conv_filters * seq_len
    bound = 1.0 / float(jnp.sqrt(fan_in))
    fc_w = jax.random.uniform(keys[ki], (num_classes, fan_in), jnp.float32, -bound, bound)
    ki += 1
    fc_b = jax.random.uniform(keys[ki], (num_classes,), jnp.float32, -bound, bound)
    return {"conv_ws": conv_ws, "conv_bs": conv_bs, "fc_w": fc_w, "fc_b": fc_b}


def prepare_params(params, seq_len):
    """One-time weight prep (permutes, bf16 casts, class padding) -- hot path clean."""
    conv_ws, conv_bs = [], []
    for w, b in zip(params["conv_ws"], params["conv_bs"]):
        filters, c_in, K = w.shape
        wk = jnp.transpose(w, (2, 0, 1))                       # (K, F, C_in)
        wk = jnp.broadcast_to(wk[:, None], (K, seq_len, filters, c_in))
        conv_ws.append(wk.astype(jnp.bfloat16))                # (K, L, F, C_in)
        conv_bs.append(b.reshape(1, filters, 1).astype(jnp.float32))

    filters = params["conv_ws"][-1].shape[0]
    num_classes = params["fc_w"].shape[0]
    n_pad = max(128, ((num_classes + 127) // 128) * 128)
    # torch flattens (B, F, L) as feature f*L + l -> reorganize to (L, n, F) and
    # zero-pad classes to a lane-dense multiple of 128.
    fc_w = params["fc_w"].reshape(num_classes, filters, seq_len)
    fc_w = jnp.transpose(fc_w, (2, 0, 1))                      # (L, n, F)
    fc_w = jnp.pad(fc_w, ((0, 0), (0, n_pad - num_classes), (0, 0)))
    fc_b = jnp.pad(params["fc_b"], (0, n_pad - num_classes)).reshape(n_pad, 1)
    return {"conv_ws": conv_ws, "conv_bs": conv_bs,
            "fc_w": fc_w.astype(jnp.bfloat16),
            "fc_b": fc_b.astype(jnp.float32),
            "num_classes": num_classes}


# ------------------------------ JAX reference ------------------------------ #

def reference_forward(params, x_ncw):
    """Pure-JAX reference mirroring the PyTorch forward (NCW conv, f32)."""
    K = params["conv_ws"][0].shape[2]
    pad = (K - 1) // 2
    x = x_ncw
    for w, b in zip(params["conv_ws"], params["conv_bs"]):
        x = lax.conv_general_dilated(
            x, w, window_strides=(1,), padding=[(pad, pad)],
            dimension_numbers=("NCH", "OIH", "NCH"))
        x = jnp.maximum(x + b[None, :, None], 0.0)
    x = x.reshape(x.shape[0], -1)
    return x @ jnp.transpose(params["fc_w"]) + params["fc_b"][None, :]


# --------------------------------- main ------------------------------------ #

if __name__ == "__main__":
    # batch=256 / b_tile=128 so (a) the lane axis (batch) is a full 128-wide
    # tile on all of v5e/v6e/v7x and (b) the grid has 2 "parallel" steps, so
    # v7x's two TensorCores both get work (per performance review).
    batch, input_channels, seq_len = 256, 4, 16
    num_conv_layers, conv_filters, kernel_size, num_classes = 2, 8, 3, 5

    key = jax.random.PRNGKey(0)
    k_params, k_x = jax.random.split(key)
    params = init_params(k_params, input_channels, seq_len, num_conv_layers,
                         conv_filters, kernel_size, num_classes)
    prepped = prepare_params(params, seq_len)
    x = jax.random.normal(k_x, (batch, input_channels, seq_len), jnp.float32)

    logits = multilayer_cnn_forward(prepped, x, b_tile=128)
    logits = jax.block_until_ready(logits)

    assert logits.shape == (batch, num_classes)
    ref = reference_forward(params, x)
    # bf16 MXU operands (f32 accumulation) vs XLA's f32 conv reference: agreement
    # tighter than ~1e-2 is not guaranteed; layout/permutation bugs would give
    # O(1) errors, so this still validates the translation.
    if not jnp.allclose(logits, ref, atol=2e-2, rtol=2e-2):
        raise AssertionError("Pallas kernel output mismatch vs JAX reference")

    print("KERNEL_OK")
</pallas_src>

<mosaic_0001>
module attributes {stable_mosaic.version = 11 : i64} {
  func.func @kernel(%arg0: i32, %arg1: memref<16x4x128xf32, #tpu.memory_space<vmem>>, %arg2: memref<3x16x8x4xbf16, #tpu.memory_space<vmem>>, %arg3: memref<1x8x1xf32, #tpu.memory_space<vmem>>, %arg4: memref<3x16x8x8xbf16, #tpu.memory_space<vmem>>, %arg5: memref<1x8x1xf32, #tpu.memory_space<vmem>>, %arg6: memref<16x128x8xbf16, #tpu.memory_space<vmem>>, %arg7: memref<128x1xf32, #tpu.memory_space<vmem>>, %arg8: memref<128x128xf32, #tpu.memory_space<vmem>>, %arg9: memref<18x8x128xf32, #tpu.memory_space<vmem>>) attributes {dimension_semantics = [#tpu.dimension_semantics<parallel>], iteration_bounds = array<i64: 2>, scalar_prefetch = 0 : i64, scratch_operands = 1 : i64, tpu.core_type = #tpu.core_type<tc>, window_params = [{transform_indices = @transform_0, window_bounds = array<i64: 16, 4, 128>}, {pipeline_mode = #tpu.pipeline_mode<synchronous>, transform_indices = @transform_1, window_bounds = array<i64: 3, 16, 8, 4>}, {pipeline_mode = #tpu.pipeline_mode<synchronous>, transform_indices = @transform_2, window_bounds = array<i64: 1, 8, 1>}, {pipeline_mode = #tpu.pipeline_mode<synchronous>, transform_indices = @transform_3, window_bounds = array<i64: 3, 16, 8, 8>}, {pipeline_mode = #tpu.pipeline_mode<synchronous>, transform_indices = @transform_4, window_bounds = array<i64: 1, 8, 1>}, {pipeline_mode = #tpu.pipeline_mode<synchronous>, transform_indices = @transform_5, window_bounds = array<i64: 16, 128, 8>}, {pipeline_mode = #tpu.pipeline_mode<synchronous>, transform_indices = @transform_6, window_bounds = array<i64: 128, 1>}, {transform_indices = @transform_7, window_bounds = array<i64: 128, 128>}]} {
    %cst = arith.constant 0.000000e+00 : f32
    %0 = vector.broadcast %cst : f32 to vector<1x8x128xf32>
    %c0 = arith.constant 0 : index
    %c0_0 = arith.constant 0 : index
    %c0_1 = arith.constant 0 : index
    %1 = vector.load %arg9[%c0, %c0_0, %c0_1] : memref<18x8x128xf32, #tpu.memory_space<vmem>>, vector<1x8x128xf32>
    tpu.vector_store %arg9[%c0, %c0_0, %c0_1], %0 {strides = array<i32>} : memref<18x8x128xf32, #tpu.memory_space<vmem>>, vector<1x8x128xf32>,
    %cst_2 = arith.constant 0.000000e+00 : f32
    %2 = vector.broadcast %cst_2 : f32 to vector<1x8x128xf32>
    %c17 = arith.constant 17 : index
    %c0_3 = arith.constant 0 : index
    %c0_4 = arith.constant 0 : index
    %3 = vector.load %arg9[%c17, %c0_3, %c0_4] : memref<18x8x128xf32, #tpu.memory_space<vmem>>, vector<1x8x128xf32>
    tpu.vector_store %arg9[%c17, %c0_3, %c0_4], %2 {strides = array<i32>} : memref<18x8x128xf32, #tpu.memory_space<vmem>>, vector<1x8x128xf32>,
    %c0_5 = arith.constant 0 : index
    %c0_6 = arith.constant 0 : index
    %c0_7 = arith.constant 0 : index
    %4 = vector.load %arg1[%c0_5, %c0_6, %c0_7] : memref<16x4x128xf32, #tpu.memory_space<vmem>>, vector<16x4x128xf32>
    %c1 = arith.constant 1 : index
    %c0_8 = arith.constant 0 : index
    %c0_9 = arith.constant 0 : index
    %5 = vector.load %arg9[%c1, %c0_8, %c0_9] : memref<18x8x128xf32, #tpu.memory_space<vmem>>, vector<16x4x128xf32>
    tpu.vector_store %arg9[%c1, %c0_8, %c0_9], %4 {strides = array<i32>} : memref<18x8x128xf32, #tpu.memory_space<vmem>>, vector<16x4x128xf32>,
    %c0_10 = arith.constant 0 : index
    %c0_11 = arith.constant 0 : index
    %c0_12 = arith.constant 0 : index
    %6 = vector.load %arg9[%c0_10, %c0_11, %c0_12] : memref<18x8x128xf32, #tpu.memory_space<vmem>>, vector<18x4x128xf32>
    %7 = arith.truncf %6 : vector<18x4x128xf32> to vector<18x4x128xbf16>
    %cst_13 = arith.constant 0.000000e+00 : f32
    %8 = vector.broadcast %cst_13 : f32 to vector<16x8x128xf32>
    %c0_14 = arith.constant 0 : index
    %c0_15 = arith.constant 0 : index
    %c0_16 = arith.constant 0 : index
    %c0_17 = arith.constant 0 : index
    %9 = vector.load %arg2[%c0_14, %c0_15, %c0_16, %c0_17] : memref<3x16x8x4xbf16, #tpu.memory_space<vmem>>, vector<1x16x8x4xbf16>
    %10 = vector.shape_cast %9 : vector<1x16x8x4xbf16> to vector<16x8x4xbf16>
    %11 = vector.extract_strided_slice %7 {offsets = [0, 0, 0], sizes = [16, 4, 128], strides = [1, 1, 1]} : vector<18x4x128xbf16> to vector<16x4x128xbf16>
    "tpu.trace_start"() <{level = 10 : i32, message = "lfc,lcb->lfb"}> : () -> ()
    %cst_18 = arith.constant dense<0.000000e+00> : vector<16x8x128xf32>
    %12 = tpu.matmul %10, %11, %cst_18 {dimension_numbers = #tpu.dot_dimension_numbers<[2], [1], [1], [2], [0, 0, 0, 1, 1, 2], [0], [0]>} : vector<16x8x4xbf16>, vector<16x4x128xbf16>, vector<16x8x128xf32> -> vector<16x8x128xf32>
    "tpu.trace_stop"() : () -> ()
    %13 = arith.addf %8, %12 : vector<16x8x128xf32>
    %c1_19 = arith.constant 1 : index
    %c0_20 = arith.constant 0 : index
    %c0_21 = arith.constant 0 : index
    %c0_22 = arith.constant 0 : index
    %14 = vector.load %arg2[%c1_19, %c0_20, %c0_21, %c0_22] : memref<3x16x8x4xbf16, #tpu.memory_space<vmem>>, vector<1x16x8x4xbf16>
    %15 = vector.shape_cast %14 : vector<1x16x8x4xbf16> to vector<16x8x4xbf16>
    %16 = vector.extract_strided_slice %7 {offsets = [1, 0, 0], sizes = [16, 4, 128], strides = [1, 1, 1]} : vector<18x4x128xbf16> to vector<16x4x128xbf16>
    "tpu.trace_start"() <{level = 10 : i32, message = "lfc,lcb->lfb"}> : () -> ()
    %cst_23 = arith.constant dense<0.000000e+00> : vector<16x8x128xf32>
    %17 = tpu.matmul %15, %16, %cst_23 {dimension_numbers = #tpu.dot_dimension_numbers<[2], [1], [1], [2], [0, 0, 0, 1, 1, 2], [0], [0]>} : vector<16x8x4xbf16>, vector<16x4x128xbf16>, vector<16x8x128xf32> -> vector<16x8x128xf32>
    "tpu.trace_stop"() : () -> ()
    %18 = arith.addf %13, %17 : vector<16x8x128xf32>
    %c2 = arith.constant 2 : index
    %c0_24 = arith.constant 0 : index
    %c0_25 = arith.constant 0 : index
    %c0_26 = arith.constant 0 : index
    %19 = vector.load %arg2[%c2, %c0_24, %c0_25, %c0_26] : memref<3x16x8x4xbf16, #tpu.memory_space<vmem>>, vector<1x16x8x4xbf16>
    %20 = vector.shape_cast %19 : vector<1x16x8x4xbf16> to vector<16x8x4xbf16>
    %21 = vector.extract_strided_slice %7 {offsets = [2, 0, 0], sizes = [16, 4, 128], strides = [1, 1, 1]} : vector<18x4x128xbf16> to vector<16x4x128xbf16>
    "tpu.trace_start"() <{level = 10 : i32, message = "lfc,lcb->lfb"}> : () -> ()
    %cst_27 = arith.constant dense<0.000000e+00> : vector<16x8x128xf32>
    %22 = tpu.matmul %20, %21, %cst_27 {dimension_numbers = #tpu.dot_dimension_numbers<[2], [1], [1], [2], [0, 0, 0, 1, 1, 2], [0], [0]>} : vector<16x8x4xbf16>, vector<16x4x128xbf16>, vector<16x8x128xf32> -> vector<16x8x128xf32>
    "tpu.trace_stop"() : () -> ()
    %23 = arith.addf %18, %22 : vector<16x8x128xf32>
    %c0_28 = arith.constant 0 : index
    %c0_29 = arith.constant 0 : index
    %c0_30 = arith.constant 0 : index
    %24 = vector.load %arg3[%c0_28, %c0_29, %c0_30] : memref<1x8x1xf32, #tpu.memory_space<vmem>>, vector<1x8x1xf32>
    %25 = vector.broadcast %24 : vector<1x8x1xf32> to vector<16x8x128xf32>
    %26 = arith.addf %23, %25 : vector<16x8x128xf32>
    %cst_31 = arith.constant 0.000000e+00 : f32
    %27 = vector.broadcast %cst_31 : f32 to vector<16x8x128xf32>
    %28 = arith.maximumf %26, %27 : vector<16x8x128xf32>
    %c1_32 = arith.constant 1 : index
    %c0_33 = arith.constant 0 : index
    %c0_34 = arith.constant 0 : index
    %29 = vector.load %arg9[%c1_32, %c0_33, %c0_34] : memref<18x8x128xf32, #tpu.memory_space<vmem>>, vector<16x8x128xf32>
    tpu.vector_store %arg9[%c1_32, %c0_33, %c0_34], %28 {strides = array<i32>} : memref<18x8x128xf32, #tpu.memory_space<vmem>>, vector<16x8x128xf32>,
    %c0_35 = arith.constant 0 : index
    %c0_36 = arith.constant 0 : index
    %c0_37 = arith.constant 0 : index
    %30 = vector.load %arg9[%c0_35, %c0_36, %c0_37] : memref<18x8x128xf32, #tpu.memory_space<vmem>>, vector<18x8x128xf32>
    %31 = arith.truncf %30 : vector<18x8x128xf32> to vector<18x8x128xbf16>
    %cst_38 = arith.constant 0.000000e+00 : f32
    %32 = vector.broadcast %cst_38 : f32 to vector<16x8x128xf32>
    %c0_39 = arith.constant 0 : index
    %c0_40 = arith.constant 0 : index
    %c0_41 = arith.constant 0 : index
    %c0_42 = arith.constant 0 : index
    %33 = vector.load %arg4[%c0_39, %c0_40, %c0_41, %c0_42] : memref<3x16x8x8xbf16, #tpu.memory_space<vmem>>, vector<1x16x8x8xbf16>
    %34 = vector.shape_cast %33 : vector<1x16x8x8xbf16> to vector<16x8x8xbf16>
    %35 = vector.extract_strided_slice %31 {offsets = [0, 0, 0], sizes = [16, 8, 128], strides = [1, 1, 1]} : vector<18x8x128xbf16> to vector<16x8x128xbf16>
    "tpu.trace_start"() <{level = 10 : i32, message = "lfc,lcb->lfb"}> : () -> ()
    %cst_43 = arith.constant dense<0.000000e+00> : vector<16x8x128xf32>
    %36 = tpu.matmul %34, %35, %cst_43 {dimension_numbers = #tpu.dot_dimension_numbers<[2], [1], [1], [2], [0, 0, 0, 1, 1, 2], [0], [0]>} : vector<16x8x8xbf16>, vector<16x8x128xbf16>, vector<16x8x128xf32> -> vector<16x8x128xf32>
    "tpu.trace_stop"() : () -> ()
    %37 = arith.addf %32, %36 : vector<16x8x128xf32>
    %c1_44 = arith.constant 1 : index
    %c0_45 = arith.constant 0 : index
    %c0_46 = arith.constant 0 : index
    %c0_47 = arith.constant 0 : index
    %38 = vector.load %arg4[%c1_44, %c0_45, %c0_46, %c0_47] : memref<3x16x8x8xbf16, #tpu.memory_space<vmem>>, vector<1x16x8x8xbf16>
    %39 = vector.shape_cast %38 : vector<1x16x8x8xbf16> to vector<16x8x8xbf16>
    %40 = vector.extract_strided_slice %31 {offsets = [1, 0, 0], sizes = [16, 8, 128], strides = [1, 1, 1]} : vector<18x8x128xbf16> to vector<16x8x128xbf16>
    "tpu.trace_start"() <{level = 10 : i32, message = "lfc,lcb->lfb"}> : () -> ()
    %cst_48 = arith.constant dense<0.000000e+00> : vector<16x8x128xf32>
    %41 = tpu.matmul %39, %40, %cst_48 {dimension_numbers = #tpu.dot_dimension_numbers<[2], [1], [1], [2], [0, 0, 0, 1, 1, 2], [0], [0]>} : vector<16x8x8xbf16>, vector<16x8x128xbf16>, vector<16x8x128xf32> -> vector<16x8x128xf32>
    "tpu.trace_stop"() : () -> ()
    %42 = arith.addf %37, %41 : vector<16x8x128xf32>
    %c2_49 = arith.constant 2 : index
    %c0_50 = arith.constant 0 : index
    %c0_51 = arith.constant 0 : index
    %c0_52 = arith.constant 0 : index
    %43 = vector.load %arg4[%c2_49, %c0_50, %c0_51, %c0_52] : memref<3x16x8x8xbf16, #tpu.memory_space<vmem>>, vector<1x16x8x8xbf16>
    %44 = vector.shape_cast %43 : vector<1x16x8x8xbf16> to vector<16x8x8xbf16>
    %45 = vector.extract_strided_slice %31 {offsets = [2, 0, 0], sizes = [16, 8, 128], strides = [1, 1, 1]} : vector<18x8x128xbf16> to vector<16x8x128xbf16>
    "tpu.trace_start"() <{level = 10 : i32, message = "lfc,lcb->lfb"}> : () -> ()
    %cst_53 = arith.constant dense<0.000000e+00> : vector<16x8x128xf32>
    %46 = tpu.matmul %44, %45, %cst_53 {dimension_numbers = #tpu.dot_dimension_numbers<[2], [1], [1], [2], [0, 0, 0, 1, 1, 2], [0], [0]>} : vector<16x8x8xbf16>, vector<16x8x128xbf16>, vector<16x8x128xf32> -> vector<16x8x128xf32>
    "tpu.trace_stop"() : () -> ()
    %47 = arith.addf %42, %46 : vector<16x8x128xf32>
    %c0_54 = arith.constant 0 : index
    %c0_55 = arith.constant 0 : index
    %c0_56 = arith.constant 0 : index
    %48 = vector.load %arg5[%c0_54, %c0_55, %c0_56] : memref<1x8x1xf32, #tpu.memory_space<vmem>>, vector<1x8x1xf32>
    %49 = vector.broadcast %48 : vector<1x8x1xf32> to vector<16x8x128xf32>
    %50 = arith.addf %47, %49 : vector<16x8x128xf32>
    %cst_57 = arith.constant 0.000000e+00 : f32
    %51 = vector.broadcast %cst_57 : f32 to vector<16x8x128xf32>
    %52 = arith.maximumf %50, %51 : vector<16x8x128xf32>
    %c0_58 = arith.constant 0 : index
    %c0_59 = arith.constant 0 : index
    %c0_60 = arith.constant 0 : index
    %53 = vector.load %arg6[%c0_58, %c0_59, %c0_60] : memref<16x128x8xbf16, #tpu.memory_space<vmem>>, vector<16x128x8xbf16>
    %54 = arith.truncf %52 : vector<16x8x128xf32> to vector<16x8x128xbf16>
    "tpu.trace_start"() <{level = 10 : i32, message = "lnf,lfb->lnb"}> : () -> ()
    %cst_61 = arith.constant dense<0.000000e+00> : vector<16x128x128xf32>
    %55 = tpu.matmul %53, %54, %cst_61 {dimension_numbers = #tpu.dot_dimension_numbers<[2], [1], [1], [2], [0, 0, 0, 1, 1, 2], [0], [0]>} : vector<16x128x8xbf16>, vector<16x8x128xbf16>, vector<16x128x128xf32> -> vector<16x128x128xf32>
    "tpu.trace_stop"() : () -> ()
    %cst_62 = arith.constant dense<0.000000e+00> : vector<128x128xf32>
    %56 = vector.multi_reduction <add>, %55, %cst_62 [0] : vector<16x128x128xf32> to vector<128x128xf32>
    %c0_63 = arith.constant 0 : index
    %c0_64 = arith.constant 0 : index
    %57 = vector.load %arg7[%c0_63, %c0_64] : memref<128x1xf32, #tpu.memory_space<vmem>>, vector<128x1xf32>
    %58 = vector.broadcast %57 : vector<128x1xf32> to vector<128x128xf32>
    %59 = arith.addf %56, %58 : vector<128x128xf32>
    %c0_65 = arith.constant 0 : index
    %c0_66 = arith.constant 0 : index
    %60 = vector.load %arg8[%c0_65, %c0_66] : memref<128x128xf32, #tpu.memory_space<vmem>>, vector<128x128xf32>
    tpu.vector_store %arg8[%c0_65, %c0_66], %59 {strides = array<i32>} : memref<128x128xf32, #tpu.memory_space<vmem>>, vector<128x128xf32>,
    return
  }
  func.func @transform_0(%arg0: i32) -> (i32, i32, i32) {
    %c0_i32 = arith.constant 0 : i32
    %c0_i32_0 = arith.constant 0 : i32
    %c0_i32_1 = arith.constant 0 : i32
    return %c0_i32, %c0_i32_0, %arg0 : i32, i32, i32
  }
  func.func @transform_1(%arg0: i32) -> (i32, i32, i32, i32) {
    %c0_i32 = arith.constant 0 : i32
    %c0_i32_0 = arith.constant 0 : i32
    %c0_i32_1 = arith.constant 0 : i32
    %c0_i32_2 = arith.constant 0 : i32
    %c0_i32_3 = arith.constant 0 : i32
    return %c0_i32, %c0_i32_0, %c0_i32_1, %c0_i32_2 : i32, i32, i32, i32
  }
  func.func @transform_2(%arg0: i32) -> (i32, i32, i32) {
    %c0_i32 = arith.constant 0 : i32
    %c0_i32_0 = arith.constant 0 : i32
    %c0_i32_1 = arith.constant 0 : i32
    %c0_i32_2 = arith.constant 0 : i32
    return %c0_i32, %c0_i32_0, %c0_i32_1 : i32, i32, i32
  }
  func.func @transform_3(%arg0: i32) -> (i32, i32, i32, i32) {
    %c0_i32 = arith.constant 0 : i32
    %c0_i32_0 = arith.constant 0 : i32
    %c0_i32_1 = arith.constant 0 : i32
    %c0_i32_2 = arith.constant 0 : i32
    %c0_i32_3 = arith.constant 0 : i32
    return %c0_i32, %c0_i32_0, %c0_i32_1, %c0_i32_2 : i32, i32, i32, i32
  }
  func.func @transform_4(%arg0: i32) -> (i32, i32, i32) {
    %c0_i32 = arith.constant 0 : i32
    %c0_i32_0 = arith.constant 0 : i32
    %c0_i32_1 = arith.constant 0 : i32
    %c0_i32_2 = arith.constant 0 : i32
    return %c0_i32, %c0_i32_0, %c0_i32_1 : i32, i32, i32
  }
  func.func @transform_5(%arg0: i32) -> (i32, i32, i32) {
    %c0_i32 = arith.constant 0 : i32
    %c0_i32_0 = arith.constant 0 : i32
    %c0_i32_1 = arith.constant 0 : i32
    %c0_i32_2 = arith.constant 0 : i32
    return %c0_i32, %c0_i32_0, %c0_i32_1 : i32, i32, i32
  }
  func.func @transform_6(%arg0: i32) -> (i32, i32) {
    %c0_i32 = arith.constant 0 : i32
    %c0_i32_0 = arith.constant 0 : i32
    %c0_i32_1 = arith.constant 0 : i32
    return %c0_i32, %c0_i32_0 : i32, i32
  }
  func.func @transform_7(%arg0: i32) -> (i32, i32) {
    %c0_i32 = arith.constant 0 : i32
    %c0_i32_0 = arith.constant 0 : i32
    return %c0_i32, %arg0 : i32, i32
  }
}

</mosaic_0001>

<bundles_post_ra>
// kernel: tpu_custom_call.1
= control target key start
LH: loop header
LB: loop body
LE: loop exit
PB: predicated region body
PF: predicated region fallthrough
CT: control target
= control target key end

     0   :  { %12 = vsyncpa [#allocation5], 0  ;;  %s12386_s0 = inlined_call_operand.vmem [shape: f32[16,4,256], index: 0, kind: input, shape index: {}]   ;;  %s12387_s1 = inlined_call_operand.vmem [shape: bf16[3,16,8,4], index: 1, kind: input, shape index: {}]   ;;  %s12388_s2 = inlined_call_operand.vmem [shape: f32[1,8,1], index: 2, kind: input, shape index: {}]   ;;  %s12389_s3 = inlined_call_operand.vmem [shape: bf16[3,16,8,8], index: 3, kind: input, shape index: {}]   ;;  %s12390_s4 = inlined_call_operand.vmem [shape: f32[1,8,1], index: 4, kind: input, shape index: {}]   ;;  %s12391_s5 = inlined_call_operand.vmem [shape: bf16[16,128,8], index: 5, kind: input, shape index: {}]   ;;  %s12392_s6 = inlined_call_operand.vmem [shape: f32[128,1], index: 6, kind: input, shape index: {}]   ;;  %s12393_s7 = inlined_call_operand.hbm [shape: f32[128,256], index: 7, kind: output, shape index: {}]  }
   0x1   :  { %14 = vsyncpa [#allocation5 + $0x1], 0  ;;  %s10468_s24 = smov 0   ;;  %s10470_s25 = smov 0  }
   0x2   :  { %s10472_s26 = smov 0   ;;  %s10474_s27 = smov 0  }
   0x3 LB: > { %s8295_s28 = sadd.s32 4294967295, %s10419_s27   ;;  %s8296_s29 = sadd.s32 4294967294, %s10419_s27   ;;  %s10419_s27 = sphi %s10474_s27, %s12399_s27   ;;  %s10415_s26 = sphi %s10472_s26, %s12398_s26   ;;  %s10411_s25 = sphi %s10470_s25, %s12397_s25   ;;  %s10407_s24 = sphi %s10468_s24, %s12396_s24  }
   0x4   : > { %s10491_s30 = sadd.s32 1, %s10419_s27   ;;  %s27_s8 = sadd.s32 1, %s10415_s26 }
   0x5   : > { %s24_s9 = ssub.s32 %s10419_s27, %s10491_s30  ;;  %p34_p0 = scmp.ne.s32.totalorder %s10415_s26, %s10411_s25 }
   0x6   : > { %p25_p1 = scmp.eq.s32.totalorder %s24_s9, 0  ;;  %p35_p2 = scmp.eq.s32.totalorder %s10419_s27, 0 }
   0x7   : > { %p190_p3 = scmp.eq.s32.totalorder %s8295_s28, 1  ;;  %p195_p4 = scmp.ne.s32.totalorder %s10411_s25, %s10407_s24 }
   0x8   : > { %s10504_s10 = scalar_select %p25_p1, %s10415_s26, %s27_s8  }
   0x9   : > { %p36_p5 = por %p35_p2, %p34_p0  ;;  %p10506_p6 = por %p190_p3, %p34_p0 }
   0xa   : > { %p196_p7 = scmp.eq.s32.totalorder %s8296_s29, 1  ;;  %p8298_p9 = scmp.ge.s32.totalorder %s10419_s27, 2 }
   0xc   : > { %p10510_p8 = por %p196_p7, %p195_p4  ;;  %230 = sbr.rel (%p8298_p9) target bundleno = 33 (0x21), region = 40 }
  0x13   : > { %233 = sbr.rel (!%p36_p5) target bundleno = 33 (0x21), region = 44  ;;  %s235_s13 = sand.u32 (%p36_p5), 1, %s10415_s26  }
  0x14   : > { %s8300_s14 = sshll.u32 (%p36_p5), %s10419_s27, 2  ;;  %s8299_s15 = sshll.u32 (%p36_p5), %s235_s13, 6 }
  0x15   : > { %s10522_s18 = scalar_lea.vmem (%p36_p5), %s12386_s0, %s8300_s14  ;;  %s237_s19 = scalar_lea.vmem (%p36_p5), [#allocation3], %s8299_s15 }
  0x16   : > { %v255_v0 = vld [vmem:[%s10522_s18] sm:$0xf] (%p36_p5)  ;;  %v257_v1 = vld [vmem:[%s10522_s18 + $0x8] sm:$0xf] (%p36_p5)  ;;  %v259_v2 = vld [vmem:[%s10522_s18 + $0x10] sm:$0xf] (%p36_p5) }
  0x17   : > { %256 = vst [vmem:[%s237_s19] sm:$0xf] (%p36_p5), %v255_v0  ;;  %258 = vst [vmem:[%s237_s19 + $0x4] sm:$0xf] (%p36_p5), %v257_v1  ;;  %v261_v3 = vld [vmem:[%s10522_s18 + $0x18] sm:$0xf] (%p36_p5) }
  0x18   : > { %v263_v4 = vld [vmem:[%s10522_s18 + $0x20] sm:$0xf] (%p36_p5)  ;;  %260 = vst [vmem:[%s237_s19 + $0x8] sm:$0xf] (%p36_p5), %v259_v2  ;;  %262 = vst [vmem:[%s237_s19 + $0xc] sm:$0xf] (%p36_p5), %v261_v3 }
  0x19   : > { %264 = vst [vmem:[%s237_s19 + $0x10] sm:$0xf] (%p36_p5), %v263_v4  ;;  %v265_v5 = vld [vmem:[%s10522_s18 + $0x28] sm:$0xf] (%p36_p5)  ;;  %v267_v6 = vld [vmem:[%s10522_s18 + $0x30] sm:$0xf] (%p36_p5) }
  0x1a   : > { %v269_v7 = vld [vmem:[%s10522_s18 + $0x38] sm:$0xf]  ;;  %266 = vst [vmem:[%s237_s19 + $0x14] sm:$0xf] %v265_v5  ;;  %268 = vst [vmem:[%s237_s19 + $0x18] sm:$0xf] %v267_v6 }
  0x1b   : > { %270 = vst [vmem:[%s237_s19 + $0x1c] sm:$0xf] %v269_v7  ;;  %v271_v8 = vld [vmem:[%s10522_s18 + $0x40] sm:$0xf]  ;;  %v273_v9 = vld [vmem:[%s10522_s18 + $0x48] sm:$0xf] }
  0x1c   : > { %v275_v10 = vld [vmem:[%s10522_s18 + $0x50] sm:$0xf]  ;;  %272 = vst [vmem:[%s237_s19 + $0x20] sm:$0xf] %v271_v8  ;;  %274 = vst [vmem:[%s237_s19 + $0x24] sm:$0xf] %v273_v9 }
  0x1d   : > { %276 = vst [vmem:[%s237_s19 + $0x28] sm:$0xf] %v275_v10  ;;  %v277_v11 = vld [vmem:[%s10522_s18 + $0x58] sm:$0xf]  ;;  %v279_v12 = vld [vmem:[%s10522_s18 + $0x60] sm:$0xf] }
  0x1e   : > { %v281_v13 = vld [vmem:[%s10522_s18 + $0x68] sm:$0xf]  ;;  %278 = vst [vmem:[%s237_s19 + $0x2c] sm:$0xf] %v277_v11  ;;  %280 = vst [vmem:[%s237_s19 + $0x30] sm:$0xf] %v279_v12 }
  0x1f   : > { %282 = vst [vmem:[%s237_s19 + $0x34] sm:$0xf] %v281_v13  ;;  %v283_v14 = vld [vmem:[%s10522_s18 + $0x70] sm:$0xf]  ;;  %v285_v15 = vld [vmem:[%s10522_s18 + $0x78] sm:$0xf] }
  0x20   : > { %284 = vst [vmem:[%s237_s19 + $0x38] sm:$0xf] %v283_v14  ;;  %286 = vst [vmem:[%s237_s19 + $0x3c] sm:$0xf] %v285_v15 }
  0x21 PF: > { %p8301_p10 = scmp.ge.s32.totalorder %s10419_s27, 1  ;;  %p340_p11 = scmp.lt.s32.totalorder %s10419_s27, 3 }
  0x23   : > { %p341_p12 = pnand %p8301_p10, %p340_p11 }
  0x24   : > { %s10543_s20 = sand.u32 (!%p341_p12), 1, %s10411_s25   ;;  %v10421_v16 = vmov (!%p341_p12), 0.0   ;;  %vm10422_vm0 = vmmov (!%p341_p12), 0   ;;  %vm488_vm1 = vcmask (!%p341_p12), 1041408   ;;  %v8304_v43 = vld [vmem:[%s12387_s1 + $0x40] sm:$0xf] (!%p341_p12) }
  0x25   : > { %344 = sbr.rel (%p341_p12) target bundleno = 1274 (0x4fa), region = 85  ;;  %9060 = vmatprep.subr.bf16.mxu0 (!%p341_p12), %v10421_v16  ;;  %379 = vst [vmem:[#allocation2] sm:$0xff] (!%p341_p12), %v10421_v16  ;;  %381 = vst [vmem:[#allocation2 + $0x88] sm:$0xff] (!%p341_p12), %v10421_v16  ;;  %9066 = vmatprep.subr.bf16.mxu1 (!%p341_p12), %v10421_v16  ;;  %s8302_s21 = sshll.u32 (!%p341_p12), %s10543_s20, 6  ;;  %vm484_vm2 = vcmask (!%p341_p12), 31744   ;;  %vm2764_vm3 = vcmask (!%p341_p12), 1043456  }
  0x26   : > { %9062 = vmatprep.mubr.msk.bf16.mxu0 (!%p341_p12), %vm10422_vm0, %v10421_v16  ;;  %9068 = vmatprep.mubr.msk.bf16.mxu1 (!%p341_p12), %vm10422_vm0, %v10421_v16  ;;  %s10554_s22 = scalar_lea.vmem (!%p341_p12), [#allocation3], %s8302_s21  ;;  %v8305_v44 = vld [vmem:[%s12387_s1 + $0x44] sm:$0xf] (!%p341_p12)  ;;  %v8306_v53 = vld [vmem:[%s12387_s1 + $0x48] sm:$0xf] (!%p341_p12)  ;;  %vm2760_vm4 = vcmask (!%p341_p12), 64512  }
  0x27   : > { %v382_v17 = vld [vmem:[%s10554_s22] sm:$0xf] (!%p341_p12)  ;;  %v383_v18 = vld [vmem:[%s10554_s22 + $0x4] sm:$0xf] (!%p341_p12)  ;;  %v384_v19 = vld [vmem:[%s10554_s22 + $0x8] sm:$0xf] (!%p341_p12) }
  0x28   : > { %399 = vst [vmem:[#allocation2 + $0x8] sm:$0xf] (!%p341_p12), %v382_v17  ;;  %400 = vst [vmem:[#allocation2 + $0x10] sm:$0xf] (!%p341_p12), %v383_v18  ;;  %v385_v20 = vld [vmem:[%s10554_s22 + $0xc] sm:$0xf] (!%p341_p12) }
  0x29   : > { %401 = vst [vmem:[#allocation2 + $0x18] sm:$0xf] (!%p341_p12), %v384_v19  ;;  %v386_v21 = vld [vmem:[%s10554_s22 + $0x10] sm:$0xf] (!%p341_p12)  ;;  %v387_v22 = vld [vmem:[%s10554_s22 + $0x14] sm:$0xf] (!%p341_p12) }
  0x2a   : > { %402 = vst [vmem:[#allocation2 + $0x20] sm:$0xf] (!%p341_p12), %v385_v20  ;;  %403 = vst [vmem:[#allocation2 + $0x28] sm:$0xf] (!%p341_p12), %v386_v21  ;;  %v388_v23 = vld [vmem:[%s10554_s22 + $0x18] sm:$0xf] (!%p341_p12) }
  0x2b   : > { %404 = vst [vmem:[#allocation2 + $0x30] sm:$0xf] (!%p341_p12), %v387_v22  ;;  %405 = vst [vmem:[#allocation2 + $0x38] sm:$0xf] (!%p341_p12), %v388_v23  ;;  %v389_v24 = vld [vmem:[%s10554_s22 + $0x1c] sm:$0xf] (!%p341_p12) }
  0x2c   : > { %406 = vst [vmem:[#allocation2 + $0x40] sm:$0xf] %v389_v24  ;;  %v390_v25 = vld [vmem:[%s10554_s22 + $0x20] sm:$0xf]  ;;  %v391_v26 = vld [vmem:[%s10554_s22 + $0x24] sm:$0xf] }
  0x2d   : > { %407 = vst [vmem:[#allocation2 + $0x48] sm:$0xf] %v390_v25  ;;  %408 = vst [vmem:[#allocation2 + $0x50] sm:$0xf] %v391_v26  ;;  %v392_v27 = vld [vmem:[%s10554_s22 + $0x28] sm:$0xf] }
  0x2e   : > { %v393_v28 = vld [vmem:[%s10554_s22 + $0x2c] sm:$0xf]  ;;  %409 = vst [vmem:[#allocation2 + $0x58] sm:$0xf] %v392_v27  ;;  %v394_v29 = vld [vmem:[%s10554_s22 + $0x30] sm:$0xf] }
  0x2f   : > { %410 = vst [vmem:[#allocation2 + $0x60] sm:$0xf] %v393_v28  ;;  %411 = vst [vmem:[#allocation2 + $0x68] sm:$0xf] %v394_v29  ;;  %v395_v30 = vld [vmem:[%s10554_s22 + $0x34] sm:$0xf] }
  0x30   : > { %v416_v31 = vld [vmem:[#allocation2 + $0x8] sm:$0xf]  ;;  %v417_v32 = vld [vmem:[#allocation2 + $0x10] sm:$0xf]  ;;  %v418_v33 = vld [vmem:[#allocation2 + $0x18] sm:$0xf] }
  0x31   : > { %412 = vst [vmem:[#allocation2 + $0x70] sm:$0xf] %v395_v30  ;;  %v434_v34 = vpack.c.bf16 %v416_v31, %v416_v31  ;;  %v435_v35 = vpack.c.bf16 %v417_v32, %v417_v32  ;;  %v436_v36 = vpack.c.bf16 %v418_v33, %v418_v33  ;;  %v419_v37 = vld [vmem:[#allocation2 + $0x20] sm:$0xf]  ;;  %v396_v39 = vld [vmem:[%s10554_s22 + $0x38] sm:$0xf] }
  0x32   : > { %v437_v38 = vpack.c.bf16 %v419_v37, %v419_v37  ;;  %v397_v40 = vld [vmem:[%s10554_s22 + $0x3c] sm:$0xf]  ;;  %413 = vst [vmem:[#allocation2 + $0x78] sm:$0xf] %v396_v39  ;;  %v420_v47 = vld [vmem:[#allocation2 + $0x28] sm:$0xf] }
  0x33   : > { %v10573_v41 = vsel %vm488_vm1, %v434_v34, 0  ;;  %v10576_v42 = vsel %vm488_vm1, %v435_v35, 0  ;;  %414 = vst [vmem:[#allocation2 + $0x80] sm:$0xf] %v397_v40  ;;  %v10589_v45 = vsel %vm488_vm1, %v436_v36, 0  ;;  %v438_v49 = vpack.c.bf16 %v420_v47, %v420_v47  ;;  %v2637_v34 = vld [vmem:[%s12388_s2] sm:$0xff] }
  0x34   : > { %9061 = vmatpush3.bf16.msra.mxu0 %v10573_v41  ;;  %9067 = vmatpush3.bf16.msra.mxu1 %v10576_v42  ;;  %v10592_v46 = vsel %vm488_vm1, %v437_v38, 0  ;;  %v421_v48 = vld [vmem:[#allocation2 + $0x30] sm:$0xf]  ;;  %v422_v51 = vld [vmem:[#allocation2 + $0x38] sm:$0xf]  ;;  %v10423_v38 = vmov 0  }
  0x35   : > { %9072 = vmatprep.subr.bf16.mxu0 %v10421_v16  ;;  %9078 = vmatprep.subr.bf16.mxu1 %v10421_v16  ;;  %v439_v50 = vpack.c.bf16 %v421_v48, %v421_v48  ;;  %v423_v52 = vld [vmem:[#allocation2 + $0x40] sm:$0xf]  ;;  %v8307_v54 = vld [vmem:[%s12387_s1 + $0x4c] sm:$0xf]  ;;  %v10611_v55 = vsel %vm488_vm1, %v438_v49, 0  ;;  %v440_v57 = vpack.c.bf16 %v422_v51, %v422_v51  ;;  %v8093_v51 = vld [vmem:[%s12392_s6 + $0x30] sm:$0xff] }
  0x36   : > { %v441_v58 = vpack.c.bf16 %v423_v52, %v423_v52  ;;  %v424_v61 = vld [vmem:[#allocation2 + $0x48] sm:$0xf]  ;;  %v425_v62 = vld [vmem:[#allocation2 + $0x50] sm:$0xf]  ;;  %v8309_v0 = vld [vmem:[%s12387_s1 + $0x54] sm:$0xf]  ;;  %10225 = vset.pattern.permute.xlu0 %v10423_v38  ;;  %10226 = vset.pattern.permute.xlu1 %v10423_v38 }
  0x37   : > { %9063 = vmatmul.mubr.msk.bf16.vlgmr.msra.gmra.mrb[0].mxu0 %vm484_vm2, %v8304_v43  ;;  %9069 = vmatmul.mubr.msk.bf16.vlgmr.msra.gmra.mrb[0].mxu1 %vm484_vm2, %v8305_v44  ;;  %v10614_v56 = vsel %vm488_vm1, %v439_v50, 0  ;;  %v10625_v59 = vsel %vm488_vm1, %v440_v57, 0  ;;  %v8308_v63 = vld [vmem:[%s12387_s1 + $0x50] sm:$0xf]  ;;  %v442_v1 = vpack.c.bf16 %v424_v61, %v424_v61  ;;  %v443_v2 = vpack.c.bf16 %v425_v62, %v425_v62  ;;  %v426_v3 = vld [vmem:[#allocation2 + $0x58] sm:$0xf] }
  0x38   : > { %9073 = vmatpush3.bf16.msra.mxu0 %v10589_v45  ;;  %9079 = vmatpush3.bf16.msra.mxu1 %v10592_v46  ;;  %v10628_v60 = vsel %vm488_vm1, %v441_v58, 0  ;;  %v427_v4 = vld [vmem:[#allocation2 + $0x60] sm:$0xf]  ;;  %v8310_v7 = vld [vmem:[%s12387_s1 + $0x58] sm:$0xf]  ;;  %v444_v9 = vpack.c.bf16 %v426_v3, %v426_v3  ;;  %v8097_v61 = vld [vmem:[%s12392_s6 + $0x50] sm:$0xff] }
  0x39   : > { %9074 = vmatprep.mubr.msk.bf16.mxu0 %vm10422_vm0, %v10421_v16  ;;  %9080 = vmatprep.mubr.msk.bf16.mxu1 %vm10422_vm0, %v10421_v16  ;;  %v10647_v5 = vsel %vm488_vm1, %v442_v1, 0  ;;  %v10650_v6 = vsel %vm488_vm1, %v443_v2, 0  ;;  %v8311_v8 = vld [vmem:[%s12387_s1 + $0x5c] sm:$0xf]  ;;  %v445_v10 = vpack.c.bf16 %v427_v4, %v427_v4  ;;  %v428_v11 = vld [vmem:[#allocation2 + $0x68] sm:$0xf] }
  0x3a   : > { %9084 = vmatprep.subr.bf16.mxu0 %v10421_v16  ;;  %9090 = vmatprep.subr.bf16.mxu1 %v10421_v16  ;;  %v429_v12 = vld [vmem:[#allocation2 + $0x70] sm:$0xf]  ;;  %v10669_v13 = vsel %vm488_vm1, %v444_v9, 0  ;;  %v8312_v15 = vld [vmem:[%s12387_s1 + $0x60] sm:$0xf]  ;;  %v446_v18 = vpack.c.bf16 %v428_v11, %v428_v11  ;;  %s8303_s9 = sshll.u32 %s10543_s20, 7 }
  0x3b   : > { %v10672_v14 = vsel %vm488_vm1, %v445_v10, 0  ;;  %v8313_v17 = vld [vmem:[%s12387_s1 + $0x64] sm:$0xf]  ;;  %v447_v19 = vpack.c.bf16 %v429_v12, %v429_v12  ;;  %v430_v22 = vld [vmem:[#allocation2 + $0x78] sm:$0xf]  ;;  %2640 = vperm.xlu0 %10225, %v2637_v34   ;;  %s12312_s13 = scalar_lea.vmem [#allocation4], %s8303_s9 }
  0x3c   : > { %v10683_v20 = vsel %vm488_vm1, %v446_v18, 0  ;;  %v431_v23 = vld [vmem:[#allocation2 + $0x80] sm:$0xf]  ;;  %v8314_v24 = vld [vmem:[%s12387_s1 + $0x68] sm:$0xf]  ;;  %v448_v26 = vpack.c.bf16 %v430_v22, %v430_v22  ;;  %s8721_s14 = sshll.u32 %s8295_s28, 7 }
  0x3d   : > { %v10686_v21 = vsel %vm488_vm1, %v447_v19, 0  ;;  %v8315_v25 = vld [vmem:[%s12387_s1 + $0x6c] sm:$0xf]  ;;  %v449_v27 = vpack.c.bf16 %v431_v23, %v431_v23  ;;  %v8316_v30 = vld [vmem:[%s12387_s1 + $0x70] sm:$0xf]  ;;  %v4913_v39 = vld [vmem:[%s12390_s4] sm:$0xff]  ;;  %s12336_s28 = scalar_lea.hbm %s12393_s7, %s8721_s14 }
  0x3e   : > { %v10713_v28 = vsel %vm488_vm1, %v448_v26, 0  ;;  %v8317_v31 = vld [vmem:[%s12387_s1 + $0x74] sm:$0xf]  ;;  %v415_v32 = vld [vmem:[#allocation2] sm:$0xf]  ;;  %s8228_s15 = sshll.u32 %s12312_s13, 4  ;;  %s12339_s15 = int_to_ptr.vmem [resolvable:$true] %s8228_s15 }
  0x3f   : > { %9075 = vmatmul.mubr.msk.bf16.vlgmr.msra.gmra.mrb[4].mxu0 %vm484_vm2, %v8306_v53  ;;  %9081 = vmatmul.mubr.msk.bf16.vlgmr.msra.gmra.mrb[4].mxu1 %vm484_vm2, %v8307_v54  ;;  %v10716_v29 = vsel %vm488_vm1, %v449_v27, 0  ;;  %v433_v33 = vpack.c.bf16 %v415_v32, %v415_v32  ;;  %v8318_v35 = vld [vmem:[%s12387_s1 + $0x78] sm:$0xf]  ;;  %v8319_v36 = vld [vmem:[%s12387_s1 + $0x7c] sm:$0xf]  ;;  %v8091_v48 = vld [vmem:[%s12392_s6 + $0x20] sm:$0xff] }
  0x40   : > { %9085 = vmatpush3.bf16.msra.mxu0 %v10611_v55  ;;  %9091 = vmatpush3.bf16.msra.mxu1 %v10614_v56  ;;  %v451_v40 = vld [vmem:[%s12387_s1] sm:$0xf]  ;;  %v452_v43 = vld [vmem:[%s12387_s1 + $0x4] sm:$0xf]  ;;  %v453_v44 = vld [vmem:[%s12387_s1 + $0x8] sm:$0xf] }
  0x41   : > { %9086 = vmatprep.mubr.msk.bf16.mxu0 %vm10422_vm0, %v10421_v16  ;;  %9092 = vmatprep.mubr.msk.bf16.mxu1 %vm10422_vm0, %v10421_v16  ;;  %v1226_v37 = vsel %vm488_vm1, %v433_v33, 0  ;;  %v454_v47 = vld [vmem:[%s12387_s1 + $0xc] sm:$0xf]  ;;  %v455_v49 = vld [vmem:[%s12387_s1 + $0x10] sm:$0xf]  ;;  %v8095_v54 = vld [vmem:[%s12392_s6 + $0x40] sm:$0xff] }
  0x42   : > { %9096 = vmatprep.subr.bf16.mxu0 %v10421_v16  ;;  %9102 = vmatprep.subr.bf16.mxu1 %v10421_v16  ;;  %v456_v50 = vld [vmem:[%s12387_s1 + $0x14] sm:$0xf]  ;;  %v457_v52 = vld [vmem:[%s12387_s1 + $0x18] sm:$0xf]  ;;  %v458_v53 = vld [vmem:[%s12387_s1 + $0x1c] sm:$0xf] }
  0x43   : > { %4916 = vperm.xlu0 %10225, %v4913_v39   ;;  %v459_v57 = vld [vmem:[%s12387_s1 + $0x20] sm:$0xf]  ;;  %v460_v58 = vld [vmem:[%s12387_s1 + $0x24] sm:$0xf]  ;;  %v461_v62 = vld [vmem:[%s12387_s1 + $0x28] sm:$0xf] }
  0x44   : > { %v463_v1 = vld [vmem:[%s12387_s1 + $0x30] sm:$0xf]  ;;  %v464_v2 = vld [vmem:[%s12387_s1 + $0x34] sm:$0xf]  ;;  %v10885_v3 = vld [vmem:[#allocation2] sm:$0xff]  ;;  %s8216_s18 = scalar_lea.sflag [#allocation5], %s10543_s20 }
  0x45   : > { %v465_v4 = vld [vmem:[%s12387_s1 + $0x38] sm:$0xf]  ;;  %v8362_v9 = vld [vmem:[%s12387_s1 + $0xa8] sm:$0xf]  ;;  %v8363_v10 = vld [vmem:[%s12387_s1 + $0xac] sm:$0xf] }
  0x46   : > { %v432_v11 = vld [vmem:[#allocation2 + $0x88] sm:$0xf]  ;;  %v8367_v18 = vld [vmem:[%s12387_s1 + $0xbc] sm:$0xf]  ;;  %s10357_s19 = scalar_lea.vmem %s12339_s15, 2048  ;;  %s10424_s21 = smov [#allocation4]  }
  0x47   : > { %9087 = vmatmul.mubr.msk.bf16.vlgmr.msra.gmra.mrb[8].mxu0 %vm484_vm2, %v8308_v63  ;;  %9093 = vmatmul.mubr.msk.bf16.vlgmr.msra.gmra.mrb[8].mxu1 %vm484_vm2, %v8309_v0  ;;  %v462_v63 = vld [vmem:[%s12387_s1 + $0x2c] sm:$0xf]  ;;  %v8099_v0 = vld [vmem:[%s12392_s6 + $0x60] sm:$0xff]  ;;  %v450_v12 = vpack.c.bf16 %v432_v11, %v432_v11  ;;  %p10358_p13 = scmp.ne.s32.totalorder %s12339_s15, %s10357_s19  ;;  %s10361_s22 = sshll.u32 %s10424_s21, 4  ;;  %s10362_s22 = int_to_ptr.vmem [resolvable:$false] %s10361_s22 }
  0x48   : > { %9097 = vmatpush3.bf16.msra.mxu0 %v10625_v59  ;;  %9103 = vmatpush3.bf16.msra.mxu1 %v10628_v60  ;;  %s10363_s23 = scalar_lea.vmem %s10362_s22, 4096  ;;  %p10364_p2 = scmp.lt.s32.totalorder %s12339_s15, %s10362_s22 }
  0x49   : > { %9098 = vmatprep.mubr.msk.bf16.mxu0 %vm10422_vm0, %v10421_v16  ;;  %9104 = vmatprep.mubr.msk.bf16.mxu1 %vm10422_vm0, %v10421_v16  ;;  %p10359_p0 = pnand %p10358_p13, %p10506_p6  ;;  %p10365_p3 = scmp.lt.s32.totalorder %s10363_s23, %s10357_s19 }
  0x4a   : > { %9108 = vmatprep.subr.bf16.mxu0 %v10421_v16  ;;  %9114 = vmatprep.subr.bf16.mxu1 %v10421_v16 }
  0x4b   : > { %p10360_p1 = pneg %p10359_p0  ;;  %p10366_p4 = por %p10365_p3, %p10364_p2 }
  0x4d   : > { %p10367_p5 = pnand %p10366_p4, %p10360_p1 }
  0x4f   : > { %9099 = vmatmul.mubr.msk.bf16.vlgmr.msra.gmra.mrb[12].mxu0 %vm484_vm2, %v8310_v7  ;;  %9105 = vmatmul.mubr.msk.bf16.vlgmr.msra.gmra.mrb[12].mxu1 %vm484_vm2, %v8311_v8  ;;  %v466_v7 = vld [vmem:[%s12387_s1 + $0x3c] sm:$0xf]  ;;  %v8352_v8 = vld [vmem:[%s12387_s1 + $0x80] sm:$0xf] }
  0x50   : > { %9109 = vmatpush3.bf16.msra.mxu0 %v10647_v5  ;;  %9115 = vmatpush3.bf16.msra.mxu1 %v10650_v6 }
  0x51   : > { %9110 = vmatprep.mubr.msk.bf16.mxu0 %vm10422_vm0, %v10421_v16  ;;  %9116 = vmatprep.mubr.msk.bf16.mxu1 %vm10422_vm0, %v10421_v16 }
  0x52   : > { %9120 = vmatprep.subr.bf16.mxu0 %v10421_v16  ;;  %9126 = vmatprep.subr.bf16.mxu1 %v10421_v16 }
  0x57   : > { %9111 = vmatmul.mubr.msk.bf16.vlgmr.msra.gmra.mrb[16].mxu0 %vm484_vm2, %v8312_v15  ;;  %9117 = vmatmul.mubr.msk.bf16.vlgmr.msra.gmra.mrb[16].mxu1 %vm484_vm2, %v8313_v17  ;;  %v2579_v15 = vsel %vm488_vm1, %v450_v12, 0  ;;  %v8366_v17 = vld [vmem:[%s12387_s1 + $0xb8] sm:$0xf] }
  0x58   : > { %9121 = vmatpush3.bf16.msra.mxu0 %v10669_v13  ;;  %9127 = vmatpush3.bf16.msra.mxu1 %v10672_v14 }
  0x59   : > { %9122 = vmatprep.mubr.msk.bf16.mxu0 %vm10422_vm0, %v10421_v16  ;;  %9128 = vmatprep.mubr.msk.bf16.mxu1 %vm10422_vm0, %v10421_v16 }
  0x5a   : > { %9132 = vmatprep.subr.bf16.mxu0 %v10421_v16  ;;  %9138 = vmatprep.subr.bf16.mxu1 %v10421_v16 }
  0x5f   : > { %9123 = vmatmul.mubr.msk.bf16.vlgmr.msra.gmra.mrb[20].mxu0 %vm484_vm2, %v8314_v24  ;;  %9129 = vmatmul.mubr.msk.bf16.vlgmr.msra.gmra.mrb[20].mxu1 %vm484_vm2, %v8315_v25 }
  0x60   : > { %9133 = vmatpush3.bf16.msra.mxu0 %v10683_v20  ;;  %9139 = vmatpush3.bf16.msra.mxu1 %v10686_v21 }
  0x61   : > { %9134 = vmatprep.mubr.msk.bf16.mxu0 %vm10422_vm0, %v10421_v16  ;;  %9140 = vmatprep.mubr.msk.bf16.mxu1 %vm10422_vm0, %v10421_v16 }
  0x62   : > { %9144 = vmatprep.subr.bf16.mxu0 %v10421_v16  ;;  %9150 = vmatprep.subr.bf16.mxu1 %v10421_v16 }
  0x67   : > { %9135 = vmatmul.mubr.msk.bf16.vlgmr.msra.gmra.mrb[24].mxu0 %vm484_vm2, %v8316_v30  ;;  %9141 = vmatmul.mubr.msk.bf16.vlgmr.msra.gmra.mrb[24].mxu1 %vm484_vm2, %v8317_v31 }
  0x68   : > { %9145 = vmatpush3.bf16.msra.mxu0 %v10713_v28  ;;  %9151 = vmatpush3.bf16.msra.mxu1 %v10716_v29 }
  0x69   : > { %9146 = vmatprep.mubr.msk.bf16.mxu0 %vm10422_vm0, %v10421_v16  ;;  %9152 = vmatprep.mubr.msk.bf16.mxu1 %vm10422_vm0, %v10421_v16 }
  0x6a   : > { %9156 = vmatprep.subr.bf16.mxu0 %v10421_v16  ;;  %9162 = vmatprep.subr.bf16.mxu1 %v10421_v16 }
  0x6f   : > { %9147 = vmatmul.mubr.msk.bf16.vlgmr.msra.gmra.mrb[28].mxu0 %vm484_vm2, %v8318_v35  ;;  %9153 = vmatmul.mubr.msk.bf16.vlgmr.msra.gmra.mrb[28].mxu1 %vm484_vm2, %v8319_v36 }
  0x70   : > { %9157 = vmatpush3.bf16.msra.mxu0 %v1226_v37  ;;  %9163 = vmatpush3.bf16.msra.mxu1 %v10573_v41  ;;  %v8089_v41 = vld [vmem:[%s12392_s6 + $0x10] sm:$0xff] }
  0x71   : > { %9158 = vmatprep.mubr.msk.bf16.mxu0 %vm10422_vm0, %v10421_v16  ;;  %9164 = vmatprep.mubr.msk.bf16.mxu1 %vm10422_vm0, %v10421_v16 }
  0x72   : > { %9168 = vmatprep.subr.bf16.mxu0 %v10421_v16  ;;  %9174 = vmatprep.subr.bf16.mxu1 %v10421_v16 }
  0x73   : > { %8115 = vperm.xlu0 %10225, %v8089_v41  }
  0x77   : > { %9159 = vmatmul.mubr.msk.bf16.vlgmr.msra.gmra.mrb[32].mxu0 %vm484_vm2, %v451_v40  ;;  %9165 = vmatmul.mubr.msk.bf16.vlgmr.msra.gmra.mrb[32].mxu1 %vm484_vm2, %v452_v43 }
  0x78   : > { %9169 = vmatpush3.bf16.msra.mxu0 %v10576_v42  ;;  %9175 = vmatpush3.bf16.msra.mxu1 %v10589_v45 }
  0x79   : > { %9170 = vmatprep.mubr.msk.bf16.mxu0 %vm10422_vm0, %v10421_v16  ;;  %9176 = vmatprep.mubr.msk.bf16.mxu1 %vm10422_vm0, %v10421_v16 }
  0x7a   : > { %9180 = vmatprep.subr.bf16.mxu0 %v10421_v16  ;;  %9186 = vmatprep.subr.bf16.mxu1 %v10421_v16 }
  0x7b   : > { %8125 = vperm.xlu0 %10225, %v8091_v48  }
  0x7f   : > { %9171 = vmatmul.mubr.msk.bf16.vlgmr.msra.gmra.mrb[36].mxu0 %vm484_vm2, %v453_v44  ;;  %9177 = vmatmul.mubr.msk.bf16.vlgmr.msra.gmra.mrb[36].mxu1 %vm484_vm2, %v454_v47 }
  0x80   : > { %9181 = vmatpush3.bf16.msra.mxu0 %v10592_v46  ;;  %9187 = vmatpush3.bf16.msra.mxu1 %v10611_v55 }
  0x81   : > { %9182 = vmatprep.mubr.msk.bf16.mxu0 %vm10422_vm0, %v10421_v16  ;;  %9188 = vmatprep.mubr.msk.bf16.mxu1 %vm10422_vm0, %v10421_v16 }
  0x82   : > { %9192 = vmatprep.subr.bf16.mxu0 %v10421_v16  ;;  %9198 = vmatprep.subr.bf16.mxu1 %v10421_v16 }
  0x83   : > { %8135 = vperm.xlu0 %10225, %v8093_v51  }
  0x87   : > { %9183 = vmatmul.mubr.msk.bf16.vlgmr.msra.gmra.mrb[40].mxu0 %vm484_vm2, %v455_v49  ;;  %9189 = vmatmul.mubr.msk.bf16.vlgmr.msra.gmra.mrb[40].mxu1 %vm484_vm2, %v456_v50 }
  0x88   : > { %9193 = vmatpush3.bf16.msra.mxu0 %v10614_v56  ;;  %9199 = vmatpush3.bf16.msra.mxu1 %v10625_v59 }
  0x89   : > { %9194 = vmatprep.mubr.msk.bf16.mxu0 %vm10422_vm0, %v10421_v16  ;;  %9200 = vmatprep.mubr.msk.bf16.mxu1 %vm10422_vm0, %v10421_v16 }
  0x8a   : > { %9204 = vmatprep.subr.bf16.mxu0 %v10421_v16  ;;  %9210 = vmatprep.subr.bf16.mxu1 %v10421_v16 }
  0x8b   : > { %8145 = vperm.xlu0 %10225, %v8095_v54  }
  0x8f   : > { %9195 = vmatmul.mubr.msk.bf16.vlgmr.msra.gmra.mrb[44].mxu0 %vm484_vm2, %v457_v52  ;;  %9201 = vmatmul.mubr.msk.bf16.vlgmr.msra.gmra.mrb[44].mxu1 %vm484_vm2, %v458_v53 }
  0x90   : > { %9205 = vmatpush3.bf16.msra.mxu0 %v10628_v60  ;;  %9211 = vmatpush3.bf16.msra.mxu1 %v10647_v5 }
  0x91   : > { %9206 = vmatprep.mubr.msk.bf16.mxu0 %vm10422_vm0, %v10421_v16  ;;  %9212 = vmatprep.mubr.msk.bf16.mxu1 %vm10422_vm0, %v10421_v16 }
  0x92   : > { %9216 = vmatprep.subr.bf16.mxu0 %v10421_v16  ;;  %9222 = vmatprep.subr.bf16.mxu1 %v10421_v16 }
  0x93   : > { %8155 = vperm.xlu0 %10225, %v8097_v61  }
  0x97   : > { %9207 = vmatmul.mubr.msk.bf16.vlgmr.msra.gmra.mrb[48].mxu0 %vm484_vm2, %v459_v57  ;;  %9213 = vmatmul.mubr.msk.bf16.vlgmr.msra.gmra.mrb[48].mxu1 %vm484_vm2, %v460_v58 }
  0x98   : > { %9217 = vmatpush3.bf16.msra.mxu0 %v10650_v6  ;;  %9223 = vmatpush3.bf16.msra.mxu1 %v10669_v13 }
  0x99   : > { %9218 = vmatprep.mubr.msk.bf16.mxu0 %vm10422_vm0, %v10421_v16  ;;  %9224 = vmatprep.mubr.msk.bf16.mxu1 %vm10422_vm0, %v10421_v16 }
  0x9a   : > { %9228 = vmatprep.subr.bf16.mxu0 %v10421_v16  ;;  %9234 = vmatprep.subr.bf16.mxu1 %v10421_v16 }
  0x9b   : > { %8165 = vperm.xlu0 %10225, %v8099_v0  }
  0x9f   : > { %9219 = vmatmul.mubr.msk.bf16.vlgmr.msra.gmra.mrb[52].mxu0 %vm484_vm2, %v461_v62  ;;  %9225 = vmatmul.mubr.msk.bf16.vlgmr.msra.gmra.mrb[52].mxu1 %vm484_vm2, %v462_v63 }
  0xa0   : > { %9229 = vmatpush3.bf16.msra.mxu0 %v10672_v14  ;;  %9235 = vmatpush3.bf16.msra.mxu1 %v10683_v20 }
  0xa1   : > { %9230 = vmatprep.mubr.msk.bf16.mxu0 %vm10422_vm0, %v10421_v16  ;;  %9236 = vmatprep.mubr.msk.bf16.mxu1 %vm10422_vm0, %v10421_v16 }
  0xa2   : > { %9240 = vmatprep.subr.bf16.mxu0 %v10421_v16  ;;  %9246 = vmatprep.subr.bf16.mxu1 %v10421_v16  ;;  %v8101_v16 = vld [vmem:[%s12392_s6 + $0x70] sm:$0xff] }
  0xa3   : > { %8175 = vperm.xlu0 %10225, %v8101_v16  }
  0xa7   : > { %9231 = vmatmul.mubr.msk.bf16.vlgmr.msra.gmra.mrb[56].mxu0 %vm484_vm2, %v463_v1  ;;  %9237 = vmatmul.mubr.msk.bf16.vlgmr.msra.gmra.mrb[56].mxu1 %vm484_vm2, %v464_v2 }
  0xa8   : > { %9241 = vmatpush3.bf16.msra.mxu0 %v10686_v21  ;;  %9247 = vmatpush3.bf16.msra.mxu1 %v10713_v28 }
  0xa9   : > { %9242 = vmatprep.mubr.msk.bf16.mxu0 %vm10422_vm0, %v10885_v3  ;;  %9248 = vmatprep.mubr.msk.bf16.mxu1 %vm10422_vm0, %v10885_v3 }
  0xaa   : > { %9252 = vmatprep.subr.bf16.mxu0 %v10885_v3  ;;  %9258 = vmatprep.subr.bf16.mxu1 %v10885_v3 }
  0xaf   : > { %9243 = vmatmul.mubr.msk.bf16.vlgmr.msra.gmra.mrb[60].mxu0 %vm484_vm2, %v465_v4  ;;  %9249 = vmatmul.mubr.msk.bf16.vlgmr.msra.gmra.mrb[60].mxu1 %vm484_vm2, %v466_v7 }
  0xb0   : > { %9253 = vmatpush3.bf16.msra.mxu0 %v10576_v42  ;;  %9259 = vmatpush3.bf16.msra.mxu1 %v10589_v45  ;;  %v8353_v42 = vld [vmem:[%s12387_s1 + $0x84] sm:$0xf]  ;;  %v8354_v45 = vld [vmem:[%s12387_s1 + $0x88] sm:$0xf] }
  0xb1   : > { %9254 = vmatprep.mubr.msk.bf16.mxu0 %vm10422_vm0, %v10885_v3  ;;  %9260 = vmatprep.mubr.msk.bf16.mxu1 %vm10422_vm0, %v10885_v3 }
  0xb2   : > { %9264 = vmatprep.subr.bf16.mxu0 %v10885_v3  ;;  %9270 = vmatprep.subr.bf16.mxu1 %v10885_v3 }
  0xb7   : > { %9255 = vmatmul.mubr.msk.bf16.vlgmr.msra.gmra.mrb[64].mxu0 %vm484_vm2, %v8352_v8  ;;  %9261 = vmatmul.mubr.msk.bf16.vlgmr.msra.gmra.mrb[64].mxu1 %vm484_vm2, %v8353_v42 }
  0xb8   : > { %9265 = vmatpush3.bf16.msra.mxu0 %v10592_v46  ;;  %9271 = vmatpush3.bf16.msra.mxu1 %v10611_v55  ;;  %v8355_v46 = vld [vmem:[%s12387_s1 + $0x8c] sm:$0xf]  ;;  %v8356_v55 = vld [vmem:[%s12387_s1 + $0x90] sm:$0xf] }
  0xb9   : > { %9266 = vmatprep.mubr.msk.bf16.mxu0 %vm10422_vm0, %v10885_v3  ;;  %9272 = vmatprep.mubr.msk.bf16.mxu1 %vm10422_vm0, %v10885_v3 }
  0xba   : > { %9276 = vmatprep.subr.bf16.mxu0 %v10885_v3  ;;  %9282 = vmatprep.subr.bf16.mxu1 %v10885_v3 }
  0xbf   : > { %9267 = vmatmul.mubr.msk.bf16.vlgmr.msra.gmra.mrb[68].mxu0 %vm484_vm2, %v8354_v45  ;;  %9273 = vmatmul.mubr.msk.bf16.vlgmr.msra.gmra.mrb[68].mxu1 %vm484_vm2, %v8355_v46 }
  0xc0   : > { %9277 = vmatpush3.bf16.msra.mxu0 %v10614_v56  ;;  %9283 = vmatpush3.bf16.msra.mxu1 %v10625_v59  ;;  %v8357_v56 = vld [vmem:[%s12387_s1 + $0x94] sm:$0xf]  ;;  %v8358_v59 = vld [vmem:[%s12387_s1 + $0x98] sm:$0xf] }
  0xc1   : > { %9278 = vmatprep.mubr.msk.bf16.mxu0 %vm10422_vm0, %v10885_v3  ;;  %9284 = vmatprep.mubr.msk.bf16.mxu1 %vm10422_vm0, %v10885_v3 }
  0xc2   : > { %9288 = vmatprep.subr.bf16.mxu0 %v10885_v3  ;;  %9294 = vmatprep.subr.bf16.mxu1 %v10885_v3 }
  0xc7   : > { %9279 = vmatmul.mubr.msk.bf16.vlgmr.msra.gmra.mrb[72].mxu0 %vm484_vm2, %v8356_v55  ;;  %9285 = vmatmul.mubr.msk.bf16.vlgmr.msra.gmra.mrb[72].mxu1 %vm484_vm2, %v8357_v56 }
  0xc8   : > { %9289 = vmatpush3.bf16.msra.mxu0 %v10628_v60  ;;  %9295 = vmatpush3.bf16.msra.mxu1 %v10647_v5  ;;  %v8359_v60 = vld [vmem:[%s12387_s1 + $0x9c] sm:$0xf]  ;;  %v8360_v5 = vld [vmem:[%s12387_s1 + $0xa0] sm:$0xf] }
  0xc9   : > { %9290 = vmatprep.mubr.msk.bf16.mxu0 %vm10422_vm0, %v10885_v3  ;;  %9296 = vmatprep.mubr.msk.bf16.mxu1 %vm10422_vm0, %v10885_v3 }
  0xca   : > { %9300 = vmatprep.subr.bf16.mxu0 %v10885_v3  ;;  %9306 = vmatprep.subr.bf16.mxu1 %v10885_v3 }
  0xcf   : > { %9291 = vmatmul.mubr.msk.bf16.vlgmr.msra.gmra.mrb[76].mxu0 %vm484_vm2, %v8358_v59  ;;  %9297 = vmatmul.mubr.msk.bf16.vlgmr.msra.gmra.mrb[76].mxu1 %vm484_vm2, %v8359_v60 }
  0xd0   : > { %9301 = vmatpush3.bf16.msra.mxu0 %v10650_v6  ;;  %9307 = vmatpush3.bf16.msra.mxu1 %v10669_v13  ;;  %v8361_v6 = vld [vmem:[%s12387_s1 + $0xa4] sm:$0xf]  ;;  %v8364_v13 = vld [vmem:[%s12387_s1 + $0xb0] sm:$0xf] }
  0xd1   : > { %9302 = vmatprep.mubr.msk.bf16.mxu0 %vm10422_vm0, %v10885_v3  ;;  %9308 = vmatprep.mubr.msk.bf16.mxu1 %vm10422_vm0, %v10885_v3 }
  0xd2   : > { %9312 = vmatprep.subr.bf16.mxu0 %v10885_v3  ;;  %9318 = vmatprep.subr.bf16.mxu1 %v10885_v3 }
  0xd7   : > { %9303 = vmatmul.mubr.msk.bf16.vlgmr.msra.gmra.mrb[80].mxu0 %vm484_vm2, %v8360_v5  ;;  %9309 = vmatmul.mubr.msk.bf16.vlgmr.msra.gmra.mrb[80].mxu1 %vm484_vm2, %v8361_v6 }
  0xd8   : > { %9313 = vmatpush3.bf16.msra.mxu0 %v10672_v14  ;;  %9319 = vmatpush3.bf16.msra.mxu1 %v10683_v20  ;;  %v8365_v14 = vld [vmem:[%s12387_s1 + $0xb4] sm:$0xf] }
  0xd9   : > { %9314 = vmatprep.mubr.msk.bf16.mxu0 %vm10422_vm0, %v10885_v3  ;;  %9320 = vmatprep.mubr.msk.bf16.mxu1 %vm10422_vm0, %v10885_v3 }
  0xda   : > { %9324 = vmatprep.subr.bf16.mxu0 %v10885_v3  ;;  %9330 = vmatprep.subr.bf16.mxu1 %v10885_v3 }
  0xdf   : > { %9315 = vmatmul.mubr.msk.bf16.vlgmr.msra.gmra.mrb[84].mxu0 %vm484_vm2, %v8362_v9  ;;  %9321 = vmatmul.mubr.msk.bf16.vlgmr.msra.gmra.mrb[84].mxu1 %vm484_vm2, %v8363_v10 }
  0xe0   : > { %9325 = vmatpush3.bf16.msra.mxu0 %v10686_v21  ;;  %9331 = vmatpush3.bf16.msra.mxu1 %v10713_v28 }
  0xe1   : > { %9326 = vmatprep.mubr.msk.bf16.mxu0 %vm10422_vm0, %v10885_v3  ;;  %9332 = vmatprep.mubr.msk.bf16.mxu1 %vm10422_vm0, %v10885_v3 }
  0xe2   : > { %9336 = vmatprep.subr.bf16.mxu0 %v10885_v3  ;;  %9342 = vmatprep.subr.bf16.mxu1 %v10885_v3 }
  0xe7   : > { %9327 = vmatmul.mubr.msk.bf16.vlgmr.msra.gmra.mrb[88].mxu0 %vm484_vm2, %v8364_v13  ;;  %9333 = vmatmul.mubr.msk.bf16.vlgmr.msra.gmra.mrb[88].mxu1 %vm484_vm2, %v8365_v14 }
  0xe8   : > { %9337 = vmatpush3.bf16.msra.mxu0 %v10716_v29  ;;  %9343 = vmatpush3.bf16.msra.mxu1 %v2579_v15 }
  0xe9   : > { %9338 = vmatprep.mubr.msk.bf16.mxu0 %vm10422_vm0, %v10885_v3  ;;  %9344 = vmatprep.mubr.msk.bf16.mxu1 %vm10422_vm0, %v10885_v3 }
  0xea   : > { %9348 = vmatprep.subr.bf16.mxu0 %v10885_v3  ;;  %9354 = vmatprep.subr.bf16.mxu1 %v10885_v3 }
  0xef   : > { %9339 = vmatmul.mubr.msk.bf16.vlgmr.msra.gmra.mrb[92].mxu0 %vm484_vm2, %v8366_v17  ;;  %9345 = vmatmul.mubr.msk.bf16.vlgmr.msra.gmra.mrb[92].mxu1 %vm484_vm2, %v8367_v18 }
  0xf0   : > { %9350 = vmatprep.mubr.msk.bf16.mxu0 %vm10422_vm0, %v10885_v3  ;;  %9356 = vmatprep.mubr.msk.bf16.mxu1 %vm10422_vm0, %v10885_v3 }
 0x10a   : > { %v11033_v19 = vpop.f32.mrb[0].mxu0  ;;  %v11035_v20 = vpop.f32.mrb[0].mxu1 }
 0x10b   : > { %v9064_v21 = vpop.f32.mrb[1].mxu0  ;;  %v9070_v22 = vpop.f32.mrb[1].mxu1 }
 0x10c   : > { %v529_v23 = vpop.f32.mrb[2].mxu0  ;;  %v575_v24 = vpop.f32.mrb[2].mxu1 }
 0x10d   : > { %v9065_v25 = vpop.f32.mrb[3].mxu0  ;;  %v9071_v26 = vpop.f32.mrb[3].mxu1 }
 0x112   : > { %v11037_v27 = vpop.f32.mrb[4].mxu0  ;;  %v11039_v28 = vpop.f32.mrb[4].mxu1 }
 0x113   : > { %v9076_v29 = vpop.f32.mrb[5].mxu0  ;;  %v9082_v30 = vpop.f32.mrb[5].mxu1 }
 0x114   : > { %v621_v31 = vpop.f32.mrb[6].mxu0  ;;  %v667_v32 = vpop.f32.mrb[6].mxu1 }
 0x115   : > { %v9077_v33 = vpop.f32.mrb[7].mxu0  ;;  %v9083_v34 = vpop.f32.mrb[7].mxu1 }
 0x11a   : > { %v11041_v35 = vpop.f32.mrb[8].mxu0  ;;  %v11043_v36 = vpop.f32.mrb[8].mxu1 }
 0x11b   : > { %v9088_v37 = vpop.f32.mrb[9].mxu0  ;;  %v9094_v38 = vpop.f32.mrb[9].mxu1 }
 0x11c   : > { %v713_v39 = vpop.f32.mrb[10].mxu0  ;;  %v759_v40 = vpop.f32.mrb[10].mxu1 }
 0x11d   : > { %v9089_v43 = vpop.f32.mrb[11].mxu0  ;;  %v9095_v41 = vpop.f32.mrb[11].mxu1 }
 0x122   : > { %v11045_v44 = vpop.f32.mrb[12].mxu0  ;;  %v11047_v47 = vpop.f32.mrb[12].mxu1 }
 0x123   : > { %v9100_v48 = vpop.f32.mrb[13].mxu0  ;;  %v9106_v49 = vpop.f32.mrb[13].mxu1 }
 0x124   : > { %v805_v50 = vpop.f32.mrb[14].mxu0  ;;  %v851_v51 = vpop.f32.mrb[14].mxu1 }
 0x125   : > { %v9101_v52 = vpop.f32.mrb[15].mxu0  ;;  %v9107_v53 = vpop.f32.mrb[15].mxu1 }
 0x12a   : > { %v11049_v54 = vpop.f32.mrb[16].mxu0  ;;  %v11051_v57 = vpop.f32.mrb[16].mxu1 }
 0x12b   : > { %v9112_v58 = vpop.f32.mrb[17].mxu0  ;;  %v9118_v61 = vpop.f32.mrb[17].mxu1 }
 0x12c   : > { %v897_v62 = vpop.f32.mrb[18].mxu0  ;;  %v943_v63 = vpop.f32.mrb[18].mxu1 }
 0x12d   : > { %v9113_v0 = vpop.f32.mrb[19].mxu0  ;;  %v9119_v1 = vpop.f32.mrb[19].mxu1 }
 0x132   : > { %v11053_v2 = vpop.f32.mrb[20].mxu0  ;;  %v11055_v16 = vpop.f32.mrb[20].mxu1 }
 0x133   : > { %v9124_v4 = vpop.f32.mrb[21].mxu0  ;;  %v9130_v7 = vpop.f32.mrb[21].mxu1 }
 0x134   : > { %v989_v8 = vpop.f32.mrb[22].mxu0  ;;  %v1035_v42 = vpop.f32.mrb[22].mxu1 }
 0x135   : > { %v9125_v45 = vpop.f32.mrb[23].mxu0  ;;  %v9131_v46 = vpop.f32.mrb[23].mxu1 }
 0x13a   : > { %v11057_v55 = vpop.f32.mrb[24].mxu0  ;;  %v11059_v56 = vpop.f32.mrb[24].mxu1 }
 0x13b   : > { %v9136_v59 = vpop.f32.mrb[25].mxu0  ;;  %v9142_v60 = vpop.f32.mrb[25].mxu1 }
 0x13c   : > { %v1081_v5 = vpop.f32.mrb[26].mxu0  ;;  %v1127_v6 = vpop.f32.mrb[26].mxu1 }
 0x13d   : > { %v9137_v9 = vpop.f32.mrb[27].mxu0  ;;  %v9143_v10 = vpop.f32.mrb[27].mxu1 }
 0x142   : > { %v11061_v11 = vpop.f32.mrb[28].mxu0  ;;  %v11063_v12 = vpop.f32.mrb[28].mxu1 }
 0x143   : > { %v9148_v13 = vpop.f32.mrb[29].mxu0  ;;  %v9154_v14 = vpop.f32.mrb[29].mxu1 }
 0x144   : > { %v1173_v15 = vpop.f32.mrb[30].mxu0  ;;  %v1219_v17 = vpop.f32.mrb[30].mxu1 }
 0x145   : > { %v9149_v18 = vpop.f32.mrb[31].mxu0  ;;  %v9155_v21 = vpop.f32.mrb[31].mxu1 }
 0x14a   : > { %v1262_v22 = vpop.f32.mrb[32].mxu0  ;;  %v1305_v23 = vpop.f32.mrb[32].mxu1 }
 0x14b   : > { %v11066_v24 = vadd.f32 %v1262_v22, %v11033_v19  ;;  %v11069_v25 = vadd.f32 %v1305_v23, %v11035_v20  ;;  %v9160_v26 = vpop.f32.mrb[33].mxu0  ;;  %v9166_v29 = vpop.f32.mrb[33].mxu1 }
 0x14c   : > { %v1265_v30 = vpop.f32.mrb[34].mxu0  ;;  %v1308_v31 = vpop.f32.mrb[34].mxu1 }
 0x14d   : > { %v9161_v32 = vpop.f32.mrb[35].mxu0  ;;  %v9167_v33 = vpop.f32.mrb[35].mxu1 }
 0x152   : > { %v1348_v34 = vpop.f32.mrb[36].mxu0  ;;  %v1391_v37 = vpop.f32.mrb[36].mxu1 }
 0x153   : > { %v11072_v38 = vadd.f32 %v1348_v34, %v11037_v27  ;;  %v11075_v39 = vadd.f32 %v1391_v37, %v11039_v28  ;;  %v9172_v40 = vpop.f32.mrb[37].mxu0  ;;  %v9178_v19 = vpop.f32.mrb[37].mxu1 }
 0x154   : > { %v1351_v43 = vpop.f32.mrb[38].mxu0  ;;  %v1394_v41 = vpop.f32.mrb[38].mxu1 }
 0x155   : > { %v9173_v20 = vpop.f32.mrb[39].mxu0  ;;  %v9179_v48 = vpop.f32.mrb[39].mxu1 }
 0x15a   : > { %v1434_v49 = vpop.f32.mrb[40].mxu0  ;;  %v1477_v50 = vpop.f32.mrb[40].mxu1 }
 0x15b   : > { %v11078_v51 = vadd.f32 %v1434_v49, %v11041_v35  ;;  %v11081_v52 = vadd.f32 %v1477_v50, %v11043_v36  ;;  %v9184_v53 = vpop.f32.mrb[41].mxu0  ;;  %v9190_v27 = vpop.f32.mrb[41].mxu1 }
 0x15c   : > { %v1437_v58 = vpop.f32.mrb[42].mxu0  ;;  %v1480_v61 = vpop.f32.mrb[42].mxu1 }
 0x15d   : > { %v9185_v28 = vpop.f32.mrb[43].mxu0  ;;  %v9191_v62 = vpop.f32.mrb[43].mxu1 }
 0x15e   : > { %v11113_v27 = vpop.permute.xlu0 %2640 }
 0x162   : > { %v1520_v63 = vpop.f32.mrb[44].mxu0  ;;  %v1563_v0 = vpop.f32.mrb[44].mxu1 }
 0x163   : > { %v11084_v1 = vadd.f32 %v1520_v63, %v11045_v44  ;;  %v11087_v4 = vadd.f32 %v1563_v0, %v11047_v47  ;;  %v9196_v7 = vpop.f32.mrb[45].mxu0  ;;  %v9202_v35 = vpop.f32.mrb[45].mxu1 }
 0x164   : > { %v1523_v8 = vpop.f32.mrb[46].mxu0  ;;  %v1566_v42 = vpop.f32.mrb[46].mxu1 }
 0x165   : > { %v9197_v36 = vpop.f32.mrb[47].mxu0  ;;  %v9203_v45 = vpop.f32.mrb[47].mxu1 }
 0x16a   : > { %v1606_v46 = vpop.f32.mrb[48].mxu0  ;;  %v1649_v59 = vpop.f32.mrb[48].mxu1 }
 0x16b   : > { %v11090_v60 = vadd.f32 %v1606_v46, %v11049_v54  ;;  %v11093_v5 = vadd.f32 %v1649_v59, %v11051_v57  ;;  %v9208_v6 = vpop.f32.mrb[49].mxu0  ;;  %v9214_v44 = vpop.f32.mrb[49].mxu1 }
 0x16c   : > { %v1609_v9 = vpop.f32.mrb[50].mxu0  ;;  %v1652_v10 = vpop.f32.mrb[50].mxu1 }
 0x16d   : > { %v9209_v47 = vpop.f32.mrb[51].mxu0  ;;  %v9215_v13 = vpop.f32.mrb[51].mxu1 }
 0x172   : > { %v1692_v14 = vpop.f32.mrb[52].mxu0  ;;  %v1735_v15 = vpop.f32.mrb[52].mxu1 }
 0x173   : > { %v11096_v17 = vadd.f32 %v1692_v14, %v11053_v2  ;;  %v11099_v18 = vadd.f32 %v1735_v15, %v11055_v16  ;;  %v9220_v21 = vpop.f32.mrb[53].mxu0  ;;  %v9226_v54 = vpop.f32.mrb[53].mxu1  ;;  %v8384_v14 = vld [vmem:[%s12389_s3 + $0x40] sm:$0xf] }
 0x174   : > { %v1695_v22 = vpop.f32.mrb[54].mxu0  ;;  %v1738_v23 = vpop.f32.mrb[54].mxu1 }
 0x175   : > { %v9221_v57 = vpop.f32.mrb[55].mxu0  ;;  %v9227_v26 = vpop.f32.mrb[55].mxu1 }
 0x17a   : > { %v1778_v29 = vpop.f32.mrb[56].mxu0  ;;  %v1821_v30 = vpop.f32.mrb[56].mxu1 }
 0x17b   : > { %v11102_v31 = vadd.f32 %v1778_v29, %v11057_v55  ;;  %v11105_v32 = vadd.f32 %v1821_v30, %v11059_v56  ;;  %v9232_v33 = vpop.f32.mrb[57].mxu0  ;;  %v9238_v2 = vpop.f32.mrb[57].mxu1 }
 0x17c   : > { %v1781_v34 = vpop.f32.mrb[58].mxu0  ;;  %v1824_v37 = vpop.f32.mrb[58].mxu1 }
 0x17d   : > { %v9233_v16 = vpop.f32.mrb[59].mxu0  ;;  %v9239_v40 = vpop.f32.mrb[59].mxu1 }
 0x182   : > { %v1864_v19 = vpop.f32.mrb[60].mxu0  ;;  %v1907_v43 = vpop.f32.mrb[60].mxu1 }
 0x183   : > { %v11108_v41 = vadd.f32 %v1864_v19, %v11061_v11  ;;  %v11111_v20 = vadd.f32 %v1907_v43, %v11063_v12  ;;  %v9244_v48 = vpop.f32.mrb[61].mxu0  ;;  %v9250_v55 = vpop.f32.mrb[61].mxu1 }
 0x184   : > { %v1867_v49 = vpop.f32.mrb[62].mxu0  ;;  %v1910_v50 = vpop.f32.mrb[62].mxu1 }
 0x185   : > { %v9245_v56 = vpop.f32.mrb[63].mxu0  ;;  %v9251_v53 = vpop.f32.mrb[63].mxu1 }
 0x18a   : > { %v1967_v58 = vpop.f32.mrb[64].mxu0  ;;  %v2010_v61 = vpop.f32.mrb[64].mxu1 }
 0x18b   : > { %v2621_v28 = vadd.f32 %v1967_v58, %v11066_v24  ;;  %v2622_v62 = vadd.f32 %v2010_v61, %v11069_v25  ;;  %v9256_v63 = vpop.f32.mrb[65].mxu0  ;;  %v9262_v11 = vpop.f32.mrb[65].mxu1 }
 0x18c   : > { %v1970_v0 = vpop.f32.mrb[66].mxu0  ;;  %v2013_v7 = vpop.f32.mrb[66].mxu1 }
 0x18d   : > { %v2643_v12 = vadd.f32 %v11113_v27, %v2621_v28  ;;  %v2644_v35 = vadd.f32 %v11113_v27, %v2622_v62  ;;  %v9257_v8 = vpop.f32.mrb[67].mxu0  ;;  %v9263_v42 = vpop.f32.mrb[67].mxu1 }
 0x18f   : > { %v2659_v36 = vmax.f32 %v2643_v12, 0.0  ;;  %v2660_v45 = vmax.f32 %v2644_v35, 0.0 }
 0x191   : > { %2675 = vst [vmem:[#allocation2 + $0x8] sm:$0xff] %v2659_v36  ;;  %2676 = vst [vmem:[#allocation2 + $0x10] sm:$0xff] %v2660_v45  ;;  %v2710_v46 = vpack.c.bf16 %v2659_v36, %v2659_v36  ;;  %v2711_v59 = vpack.c.bf16 %v2660_v45, %v2660_v45 }
 0x192   : > { %v2053_v24 = vpop.f32.mrb[68].mxu0  ;;  %v2096_v6 = vpop.f32.mrb[68].mxu1 }
 0x193   : > { %v2623_v25 = vadd.f32 %v2053_v24, %v11072_v38  ;;  %v2624_v44 = vadd.f32 %v2096_v6, %v11075_v39  ;;  %v9268_v9 = vpop.f32.mrb[69].mxu0  ;;  %v9274_v10 = vpop.f32.mrb[69].mxu1  ;;  %v11122_v47 = vsel %vm2764_vm3, %v2710_v46, 0  ;;  %v11125_v13 = vsel %vm2764_vm3, %v2711_v59, 0  ;;  %v8385_v38 = vld [vmem:[%s12389_s3 + $0x44] sm:$0xf] }
 0x194   : > { %v2056_v15 = vpop.f32.mrb[70].mxu0  ;;  %v2099_v21 = vpop.f32.mrb[70].mxu1  ;;  %9349 = vmatpush3.bf16.msra.mxu0 %v11122_v47  ;;  %9355 = vmatpush3.bf16.msra.mxu1 %v11125_v13 }
 0x195   : > { %v2645_v39 = vadd.f32 %v11113_v27, %v2623_v25  ;;  %v2646_v54 = vadd.f32 %v11113_v27, %v2624_v44  ;;  %v9269_v22 = vpop.f32.mrb[71].mxu0  ;;  %v9275_v23 = vpop.f32.mrb[71].mxu1  ;;  %9360 = vmatprep.subr.bf16.mxu0 %v10885_v3  ;;  %9366 = vmatprep.subr.bf16.mxu1 %v10885_v3 }
 0x197   : > { %v2661_v57 = vmax.f32 %v2645_v39, 0.0  ;;  %v2662_v26 = vmax.f32 %v2646_v54, 0.0  ;;  %9351 = vmatmul.mubr.msk.bf16.vlgmr.msra.gmra.mrb[96].mxu0 %vm2760_vm4, %v8384_v14  ;;  %9357 = vmatmul.mubr.msk.bf16.vlgmr.msra.gmra.mrb[96].mxu1 %vm2760_vm4, %v8385_v38 }
 0x198   : > { %9362 = vmatprep.mubr.msk.bf16.mxu0 %vm10422_vm0, %v10885_v3  ;;  %9368 = vmatprep.mubr.msk.bf16.mxu1 %vm10422_vm0, %v10885_v3 }
 0x199   : > { %2677 = vst [vmem:[#allocation2 + $0x18] sm:$0xff] %v2661_v57  ;;  %2678 = vst [vmem:[#allocation2 + $0x20] sm:$0xff] %v2662_v26  ;;  %v2712_v29 = vpack.c.bf16 %v2661_v57, %v2661_v57  ;;  %v2713_v30 = vpack.c.bf16 %v2662_v26, %v2662_v26 }
 0x19a   : > { %v2139_v33 = vpop.f32.mrb[72].mxu0  ;;  %v2182_v2 = vpop.f32.mrb[72].mxu1 }
 0x19b   : > { %v2625_v34 = vadd.f32 %v2139_v33, %v11078_v51  ;;  %v2626_v37 = vadd.f32 %v2182_v2, %v11081_v52  ;;  %v9280_v16 = vpop.f32.mrb[73].mxu0  ;;  %v9286_v40 = vpop.f32.mrb[73].mxu1  ;;  %v11148_v19 = vsel %vm2764_vm3, %v2712_v29, 0  ;;  %v11151_v43 = vsel %vm2764_vm3, %v2713_v30, 0  ;;  %v8386_v51 = vld [vmem:[%s12389_s3 + $0x48] sm:$0xf] }
 0x19c   : > { %v2142_v48 = vpop.f32.mrb[74].mxu0  ;;  %v2185_v55 = vpop.f32.mrb[74].mxu1  ;;  %9361 = vmatpush3.bf16.msra.mxu0 %v11148_v19  ;;  %9367 = vmatpush3.bf16.msra.mxu1 %v11151_v43  ;;  %v8387_v52 = vld [vmem:[%s12389_s3 + $0x4c] sm:$0xf] }
 0x19d   : > { %v2647_v49 = vadd.f32 %v11113_v27, %v2625_v34  ;;  %v2648_v50 = vadd.f32 %v11113_v27, %v2626_v37  ;;  %v9281_v56 = vpop.f32.mrb[75].mxu0  ;;  %v9287_v53 = vpop.f32.mrb[75].mxu1  ;;  %9372 = vmatprep.subr.bf16.mxu0 %v10885_v3  ;;  %9378 = vmatprep.subr.bf16.mxu1 %v10885_v3 }
 0x19f   : > { %v2663_v58 = vmax.f32 %v2647_v49, 0.0  ;;  %v2664_v61 = vmax.f32 %v2648_v50, 0.0  ;;  %9363 = vmatmul.mubr.msk.bf16.vlgmr.msra.gmra.mrb[100].mxu0 %vm2760_vm4, %v8386_v51  ;;  %9369 = vmatmul.mubr.msk.bf16.vlgmr.msra.gmra.mrb[100].mxu1 %vm2760_vm4, %v8387_v52 }
 0x1a0   : > { %9374 = vmatprep.mubr.msk.bf16.mxu0 %vm10422_vm0, %v10885_v3  ;;  %9380 = vmatprep.mubr.msk.bf16.mxu1 %vm10422_vm0, %v10885_v3 }
 0x1a1   : > { %2679 = vst [vmem:[#allocation2 + $0x28] sm:$0xff] %v2663_v58  ;;  %2680 = vst [vmem:[#allocation2 + $0x30] sm:$0xff] %v2664_v61  ;;  %v2714_v28 = vpack.c.bf16 %v2663_v58, %v2663_v58  ;;  %v2715_v62 = vpack.c.bf16 %v2664_v61, %v2664_v61 }
 0x1a2   : > { %v2225_v63 = vpop.f32.mrb[76].mxu0  ;;  %v2268_v11 = vpop.f32.mrb[76].mxu1 }
 0x1a3   : > { %v2627_v0 = vadd.f32 %v2225_v63, %v11084_v1  ;;  %v2628_v7 = vadd.f32 %v2268_v11, %v11087_v4  ;;  %v9292_v12 = vpop.f32.mrb[77].mxu0  ;;  %v9298_v35 = vpop.f32.mrb[77].mxu1  ;;  %v11174_v8 = vsel %vm2764_vm3, %v2714_v28, 0  ;;  %v11177_v42 = vsel %vm2764_vm3, %v2715_v62, 0  ;;  %v8388_v1 = vld [vmem:[%s12389_s3 + $0x50] sm:$0xf] }
 0x1a4   : > { %v2228_v36 = vpop.f32.mrb[78].mxu0  ;;  %v2271_v45 = vpop.f32.mrb[78].mxu1  ;;  %9373 = vmatpush3.bf16.msra.mxu0 %v11174_v8  ;;  %9379 = vmatpush3.bf16.msra.mxu1 %v11177_v42  ;;  %v8389_v4 = vld [vmem:[%s12389_s3 + $0x54] sm:$0xf] }
 0x1a5   : > { %v2649_v46 = vadd.f32 %v11113_v27, %v2627_v0  ;;  %v2650_v59 = vadd.f32 %v11113_v27, %v2628_v7  ;;  %v9293_v24 = vpop.f32.mrb[79].mxu0  ;;  %v9299_v6 = vpop.f32.mrb[79].mxu1  ;;  %9384 = vmatprep.subr.bf16.mxu0 %v10885_v3  ;;  %9390 = vmatprep.subr.bf16.mxu1 %v10885_v3 }
 0x1a7   : > { %v2665_v25 = vmax.f32 %v2649_v46, 0.0  ;;  %v2666_v44 = vmax.f32 %v2650_v59, 0.0  ;;  %9375 = vmatmul.mubr.msk.bf16.vlgmr.msra.gmra.mrb[104].mxu0 %vm2760_vm4, %v8388_v1  ;;  %9381 = vmatmul.mubr.msk.bf16.vlgmr.msra.gmra.mrb[104].mxu1 %vm2760_vm4, %v8389_v4 }
 0x1a8   : > { %9386 = vmatprep.mubr.msk.bf16.mxu0 %vm10422_vm0, %v10885_v3  ;;  %9392 = vmatprep.mubr.msk.bf16.mxu1 %vm10422_vm0, %v10885_v3 }
 0x1a9   : > { %2681 = vst [vmem:[#allocation2 + $0x38] sm:$0xff] %v2665_v25  ;;  %2682 = vst [vmem:[#allocation2 + $0x40] sm:$0xff] %v2666_v44  ;;  %v2716_v9 = vpack.c.bf16 %v2665_v25, %v2665_v25  ;;  %v2717_v10 = vpack.c.bf16 %v2666_v44, %v2666_v44 }
 0x1aa   : > { %v2311_v14 = vpop.f32.mrb[80].mxu0  ;;  %v2354_v15 = vpop.f32.mrb[80].mxu1 }
 0x1ab   : > { %v2629_v21 = vadd.f32 %v2311_v14, %v11090_v60  ;;  %v2630_v38 = vadd.f32 %v2354_v15, %v11093_v5  ;;  %v9304_v39 = vpop.f32.mrb[81].mxu0  ;;  %v9310_v54 = vpop.f32.mrb[81].mxu1  ;;  %v11200_v22 = vsel %vm2764_vm3, %v2716_v9, 0  ;;  %v11203_v23 = vsel %vm2764_vm3, %v2717_v10, 0  ;;  %v8390_v60 = vld [vmem:[%s12389_s3 + $0x58] sm:$0xf] }
 0x1ac   : > { %v2314_v57 = vpop.f32.mrb[82].mxu0  ;;  %v2357_v26 = vpop.f32.mrb[82].mxu1  ;;  %9385 = vmatpush3.bf16.msra.mxu0 %v11200_v22  ;;  %9391 = vmatpush3.bf16.msra.mxu1 %v11203_v23  ;;  %v8391_v5 = vld [vmem:[%s12389_s3 + $0x5c] sm:$0xf] }
 0x1ad   : > { %v2651_v29 = vadd.f32 %v11113_v27, %v2629_v21  ;;  %v2652_v30 = vadd.f32 %v11113_v27, %v2630_v38  ;;  %v9305_v33 = vpop.f32.mrb[83].mxu0  ;;  %v9311_v2 = vpop.f32.mrb[83].mxu1  ;;  %9396 = vmatprep.subr.bf16.mxu0 %v10885_v3  ;;  %9402 = vmatprep.subr.bf16.mxu1 %v10885_v3 }
 0x1af   : > { %v2667_v34 = vmax.f32 %v2651_v29, 0.0  ;;  %v2668_v37 = vmax.f32 %v2652_v30, 0.0  ;;  %9387 = vmatmul.mubr.msk.bf16.vlgmr.msra.gmra.mrb[108].mxu0 %vm2760_vm4, %v8390_v60  ;;  %9393 = vmatmul.mubr.msk.bf16.vlgmr.msra.gmra.mrb[108].mxu1 %vm2760_vm4, %v8391_v5 }
 0x1b0   : > { %9398 = vmatprep.mubr.msk.bf16.mxu0 %vm10422_vm0, %v10885_v3  ;;  %9404 = vmatprep.mubr.msk.bf16.mxu1 %vm10422_vm0, %v10885_v3 }
 0x1b1   : > { %2683 = vst [vmem:[#allocation2 + $0x48] sm:$0xff] %v2667_v34  ;;  %2684 = vst [vmem:[#allocation2 + $0x50] sm:$0xff] %v2668_v37  ;;  %v2718_v16 = vpack.c.bf16 %v2667_v34, %v2667_v34  ;;  %v2719_v40 = vpack.c.bf16 %v2668_v37, %v2668_v37 }
 0x1b2   : > { %v2397_v48 = vpop.f32.mrb[84].mxu0  ;;  %v2440_v55 = vpop.f32.mrb[84].mxu1 }
 0x1b3   : > { %v2631_v51 = vadd.f32 %v2397_v48, %v11096_v17  ;;  %v2632_v52 = vadd.f32 %v2440_v55, %v11099_v18  ;;  %v9316_v49 = vpop.f32.mrb[85].mxu0  ;;  %v9322_v50 = vpop.f32.mrb[85].mxu1  ;;  %v11226_v56 = vsel %vm2764_vm3, %v2718_v16, 0  ;;  %v11229_v53 = vsel %vm2764_vm3, %v2719_v40, 0  ;;  %v8392_v17 = vld [vmem:[%s12389_s3 + $0x60] sm:$0xf] }
 0x1b4   : > { %v2400_v58 = vpop.f32.mrb[86].mxu0  ;;  %v2443_v61 = vpop.f32.mrb[86].mxu1  ;;  %9397 = vmatpush3.bf16.msra.mxu0 %v11226_v56  ;;  %9403 = vmatpush3.bf16.msra.mxu1 %v11229_v53  ;;  %v8393_v18 = vld [vmem:[%s12389_s3 + $0x64] sm:$0xf]  ;;  %v2709_v50 = vpack.c.bf16 %v10885_v3, %v10885_v3 }
 0x1b5   : > { %v2653_v28 = vadd.f32 %v11113_v27, %v2631_v51  ;;  %v2654_v62 = vadd.f32 %v11113_v27, %v2632_v52  ;;  %v9317_v63 = vpop.f32.mrb[87].mxu0  ;;  %v9323_v11 = vpop.f32.mrb[87].mxu1  ;;  %9408 = vmatprep.subr.bf16.mxu0 %v10885_v3  ;;  %9414 = vmatprep.subr.bf16.mxu1 %v10885_v3 }
 0x1b6   : > { %v2729_v63 = vld [vmem:[%s12389_s3 + $0x8] sm:$0xf]  ;;  %v2730_v11 = vld [vmem:[%s12389_s3 + $0xc] sm:$0xf] }
 0x1b7   : > { %v2669_v0 = vmax.f32 %v2653_v28, 0.0  ;;  %v2670_v7 = vmax.f32 %v2654_v62, 0.0  ;;  %9399 = vmatmul.mubr.msk.bf16.vlgmr.msra.gmra.mrb[112].mxu0 %vm2760_vm4, %v8392_v17  ;;  %9405 = vmatmul.mubr.msk.bf16.vlgmr.msra.gmra.mrb[112].mxu1 %vm2760_vm4, %v8393_v18  ;;  %v8398_v17 = vld [vmem:[%s12389_s3 + $0x78] sm:$0xf]  ;;  %v8399_v18 = vld [vmem:[%s12389_s3 + $0x7c] sm:$0xf] }
 0x1b8   : > { %9410 = vmatprep.mubr.msk.bf16.mxu0 %vm10422_vm0, %v10885_v3  ;;  %9416 = vmatprep.mubr.msk.bf16.mxu1 %vm10422_vm0, %v10885_v3  ;;  %v11320_v28 = vsel %vm2764_vm3, %v2709_v50, 0  ;;  %v2727_v62 = vld [vmem:[%s12389_s3] sm:$0xf] }
 0x1b9   : > { %2685 = vst [vmem:[#allocation2 + $0x58] sm:$0xff] %v2669_v0  ;;  %2686 = vst [vmem:[#allocation2 + $0x60] sm:$0xff] %v2670_v7  ;;  %v2720_v12 = vpack.c.bf16 %v2669_v0, %v2669_v0  ;;  %v2721_v35 = vpack.c.bf16 %v2670_v7, %v2670_v7  ;;  %v2731_v0 = vld [vmem:[%s12389_s3 + $0x10] sm:$0xf]  ;;  %v2732_v7 = vld [vmem:[%s12389_s3 + $0x14] sm:$0xf] }
 0x1ba   : > { %v2483_v36 = vpop.f32.mrb[88].mxu0  ;;  %v2526_v45 = vpop.f32.mrb[88].mxu1 }
 0x1bb   : > { %v2633_v1 = vadd.f32 %v2483_v36, %v11102_v31  ;;  %v2634_v4 = vadd.f32 %v2526_v45, %v11105_v32  ;;  %v9328_v46 = vpop.f32.mrb[89].mxu0  ;;  %v9334_v59 = vpop.f32.mrb[89].mxu1  ;;  %v11252_v24 = vsel %vm2764_vm3, %v2720_v12, 0  ;;  %v11255_v6 = vsel %vm2764_vm3, %v2721_v35, 0  ;;  %v8394_v31 = vld [vmem:[%s12389_s3 + $0x68] sm:$0xf] }
 0x1bc   : > { %v2486_v25 = vpop.f32.mrb[90].mxu0  ;;  %v2529_v44 = vpop.f32.mrb[90].mxu1  ;;  %9409 = vmatpush3.bf16.msra.mxu0 %v11252_v24  ;;  %9415 = vmatpush3.bf16.msra.mxu1 %v11255_v6  ;;  %v8395_v32 = vld [vmem:[%s12389_s3 + $0x6c] sm:$0xf]  ;;  %v11374_v12 = vld [vmem:[#allocation2] sm:$0xff] }
 0x1bd   : > { %v2655_v9 = vadd.f32 %v11113_v27, %v2633_v1  ;;  %v2656_v10 = vadd.f32 %v11113_v27, %v2634_v4  ;;  %v9329_v14 = vpop.f32.mrb[91].mxu0  ;;  %v9335_v15 = vpop.f32.mrb[91].mxu1  ;;  %9420 = vmatprep.subr.bf16.mxu0 %v10885_v3  ;;  %9426 = vmatprep.subr.bf16.mxu1 %v10885_v3  ;;  %v2734_v35 = vld [vmem:[%s12389_s3 + $0x1c] sm:$0xf]  ;;  %v2735_v36 = vld [vmem:[%s12389_s3 + $0x20] sm:$0xf] }
 0x1be   : > { %v2736_v45 = vld [vmem:[%s12389_s3 + $0x24] sm:$0xf]  ;;  %v2737_v1 = vld [vmem:[%s12389_s3 + $0x28] sm:$0xf]  ;;  %v2738_v4 = vld [vmem:[%s12389_s3 + $0x2c] sm:$0xf] }
 0x1bf   : > { %v2671_v21 = vmax.f32 %v2655_v9, 0.0  ;;  %v2672_v38 = vmax.f32 %v2656_v10, 0.0  ;;  %9411 = vmatmul.mubr.msk.bf16.vlgmr.msra.gmra.mrb[116].mxu0 %vm2760_vm4, %v8394_v31  ;;  %9417 = vmatmul.mubr.msk.bf16.vlgmr.msra.gmra.mrb[116].mxu1 %vm2760_vm4, %v8395_v32  ;;  %v2739_v46 = vld [vmem:[%s12389_s3 + $0x30] sm:$0xf]  ;;  %v2740_v59 = vld [vmem:[%s12389_s3 + $0x34] sm:$0xf] }
 0x1c0   : > { %9422 = vmatprep.mubr.msk.bf16.mxu0 %vm10422_vm0, %v10885_v3  ;;  %9428 = vmatprep.mubr.msk.bf16.mxu1 %vm10422_vm0, %v10885_v3  ;;  %v2741_v25 = vld [vmem:[%s12389_s3 + $0x38] sm:$0xf]  ;;  %v2742_v44 = vld [vmem:[%s12389_s3 + $0x3c] sm:$0xf]  ;;  %v8432_v31 = vld [vmem:[%s12389_s3 + $0x80] sm:$0xf] }
 0x1c1   : > { %2687 = vst [vmem:[#allocation2 + $0x68] sm:$0xff] %v2671_v21  ;;  %2688 = vst [vmem:[#allocation2 + $0x70] sm:$0xff] %v2672_v38  ;;  %v2722_v39 = vpack.c.bf16 %v2671_v21, %v2671_v21  ;;  %v2723_v54 = vpack.c.bf16 %v2672_v38, %v2672_v38  ;;  %v8444_v32 = vld [vmem:[%s12389_s3 + $0xb0] sm:$0xf]  ;;  %v8445_v9 = vld [vmem:[%s12389_s3 + $0xb4] sm:$0xf] }
 0x1c2   : > { %v2569_v57 = vpop.f32.mrb[92].mxu0  ;;  %v2615_v26 = vpop.f32.mrb[92].mxu1  ;;  %v8446_v10 = vld [vmem:[%s12389_s3 + $0xb8] sm:$0xf]  ;;  %v8447_v14 = vld [vmem:[%s12389_s3 + $0xbc] sm:$0xf] }
 0x1c3   : > { %v2635_v60 = vadd.f32 %v2569_v57, %v11108_v41  ;;  %v2636_v5 = vadd.f32 %v2615_v26, %v11111_v20  ;;  %v9340_v29 = vpop.f32.mrb[93].mxu0  ;;  %v9346_v30 = vpop.f32.mrb[93].mxu1  ;;  %v11278_v33 = vsel %vm2764_vm3, %v2722_v39, 0  ;;  %v11281_v2 = vsel %vm2764_vm3, %v2723_v54, 0  ;;  %v8396_v41 = vld [vmem:[%s12389_s3 + $0x70] sm:$0xf] }
 0x1c4   : > { %v2572_v34 = vpop.f32.mrb[94].mxu0  ;;  %v2618_v37 = vpop.f32.mrb[94].mxu1  ;;  %9421 = vmatpush3.bf16.msra.mxu0 %v11278_v33  ;;  %9427 = vmatpush3.bf16.msra.mxu1 %v11281_v2  ;;  %v8397_v20 = vld [vmem:[%s12389_s3 + $0x74] sm:$0xf] }
 0x1c5   : > { %v2657_v16 = vadd.f32 %v11113_v27, %v2635_v60  ;;  %v2658_v40 = vadd.f32 %v11113_v27, %v2636_v5  ;;  %v9341_v48 = vpop.f32.mrb[95].mxu0  ;;  %v9347_v55 = vpop.f32.mrb[95].mxu1  ;;  %9432 = vmatprep.subr.bf16.mxu0 %v10885_v3  ;;  %9438 = vmatprep.subr.bf16.mxu1 %v10885_v3 }
 0x1c7   : > { %v2673_v51 = vmax.f32 %v2657_v16, 0.0  ;;  %v2674_v52 = vmax.f32 %v2658_v40, 0.0  ;;  %9423 = vmatmul.mubr.msk.bf16.vlgmr.msra.gmra.mrb[120].mxu0 %vm2760_vm4, %v8396_v41  ;;  %9429 = vmatmul.mubr.msk.bf16.vlgmr.msra.gmra.mrb[120].mxu1 %vm2760_vm4, %v8397_v20  ;;  %v10227_v20 = vld [vmem:[%s12391_s5] sm:$0xff]  }
 0x1c8   : > { %9434 = vmatprep.mubr.msk.bf16.mxu0 %vm10422_vm0, %v10885_v3  ;;  %9440 = vmatprep.mubr.msk.bf16.mxu1 %vm10422_vm0, %v10885_v3 }
 0x1c9   : > { %2689 = vst [vmem:[#allocation2 + $0x78] sm:$0xff] %v2673_v51  ;;  %2690 = vst [vmem:[#allocation2 + $0x80] sm:$0xff] %v2674_v52  ;;  %v2724_v27 = vpack.c.bf16 %v2673_v51, %v2673_v51  ;;  %v2725_v49 = vpack.c.bf16 %v2674_v52, %v2674_v52 }
 0x1cb   : > { %v11304_v58 = vsel %vm2764_vm3, %v2724_v27, 0  ;;  %v11307_v61 = vsel %vm2764_vm3, %v2725_v49, 0 }
 0x1cc   : > { %9433 = vmatpush3.bf16.msra.mxu0 %v11304_v58  ;;  %9439 = vmatpush3.bf16.msra.mxu1 %v11307_v61 }
 0x1cd   : > { %9450 = vmatprep.subr.bf16.mxu1 %v10885_v3  ;;  %9444 = vmatprep.subr.bf16.mxu0 %v10885_v3 }
 0x1cf   : > { %9435 = vmatmul.mubr.msk.bf16.vlgmr.msra.gmra.mrb[124].mxu0 %vm2760_vm4, %v8398_v17  ;;  %9441 = vmatmul.mubr.msk.bf16.vlgmr.msra.gmra.mrb[124].mxu1 %vm2760_vm4, %v8399_v18 }
 0x1d0   : > { %9451 = vmatpush3.bf16.msra.mxu1 %v11122_v47  ;;  %9445 = vmatpush3.bf16.msra.mxu0 %v11320_v28  ;;  %v2728_v47 = vld [vmem:[%s12389_s3 + $0x4] sm:$0xf] }
 0x1d1   : > { %9446 = vmatprep.mubr.msk.bf16.mxu0 %vm10422_vm0, %v10885_v3  ;;  %9452 = vmatprep.mubr.msk.bf16.mxu1 %vm10422_vm0, %v10885_v3 }
 0x1d2   : > { %9456 = vmatprep.subr.bf16.mxu0 %v10885_v3  ;;  %9462 = vmatprep.subr.bf16.mxu1 %v10885_v3 }
 0x1d7   : > { %9447 = vmatmul.mubr.msk.bf16.vlgmr.msra.gmra.mrb[128].mxu0 %vm2760_vm4, %v2727_v62  ;;  %9453 = vmatmul.mubr.msk.bf16.vlgmr.msra.gmra.mrb[128].mxu1 %vm2760_vm4, %v2728_v47 }
 0x1d8   : > { %9457 = vmatpush3.bf16.msra.mxu0 %v11125_v13  ;;  %9463 = vmatpush3.bf16.msra.mxu1 %v11148_v19 }
 0x1d9   : > { %9458 = vmatprep.mubr.msk.bf16.mxu0 %vm10422_vm0, %v10885_v3  ;;  %9464 = vmatprep.mubr.msk.bf16.mxu1 %vm10422_vm0, %v10885_v3 }
 0x1da   : > { %9468 = vmatprep.subr.bf16.mxu0 %v10885_v3  ;;  %9474 = vmatprep.subr.bf16.mxu1 %v10885_v3 }
 0x1df   : > { %9459 = vmatmul.mubr.msk.bf16.vlgmr.msra.gmra.mrb[132].mxu0 %vm2760_vm4, %v2729_v63  ;;  %9465 = vmatmul.mubr.msk.bf16.vlgmr.msra.gmra.mrb[132].mxu1 %vm2760_vm4, %v2730_v11 }
 0x1e0   : > { %9469 = vmatpush3.bf16.msra.mxu0 %v11151_v43  ;;  %9475 = vmatpush3.bf16.msra.mxu1 %v11174_v8 }
 0x1e1   : > { %9470 = vmatprep.mubr.msk.bf16.mxu0 %vm10422_vm0, %v10885_v3  ;;  %9476 = vmatprep.mubr.msk.bf16.mxu1 %vm10422_vm0, %v10885_v3 }
 0x1e2   : > { %9480 = vmatprep.subr.bf16.mxu0 %v10885_v3  ;;  %9486 = vmatprep.subr.bf16.mxu1 %v10885_v3  ;;  %v2733_v3 = vld [vmem:[%s12389_s3 + $0x18] sm:$0xf] }
 0x1e7   : > { %9471 = vmatmul.mubr.msk.bf16.vlgmr.msra.gmra.mrb[136].mxu0 %vm2760_vm4, %v2731_v0  ;;  %9477 = vmatmul.mubr.msk.bf16.vlgmr.msra.gmra.mrb[136].mxu1 %vm2760_vm4, %v2732_v7 }
 0x1e8   : > { %9481 = vmatpush3.bf16.msra.mxu0 %v11177_v42  ;;  %9487 = vmatpush3.bf16.msra.mxu1 %v11200_v22 }
 0x1e9   : > { %9482 = vmatprep.mubr.msk.bf16.mxu0 %vm10422_vm0, %v11374_v12  ;;  %9488 = vmatprep.mubr.msk.bf16.mxu1 %vm10422_vm0, %v11374_v12 }
 0x1ea   : > { %9492 = vmatprep.subr.bf16.mxu0 %v11374_v12  ;;  %9498 = vmatprep.subr.bf16.mxu1 %v11374_v12 }
 0x1ef   : > { %9483 = vmatmul.mubr.msk.bf16.vlgmr.msra.gmra.mrb[140].mxu0 %vm2760_vm4, %v2733_v3  ;;  %9489 = vmatmul.mubr.msk.bf16.vlgmr.msra.gmra.mrb[140].mxu1 %vm2760_vm4, %v2734_v35 }
 0x1f0   : > { %9493 = vmatpush3.bf16.msra.mxu0 %v11203_v23  ;;  %9499 = vmatpush3.bf16.msra.mxu1 %v11226_v56 }
 0x1f1   : > { %9494 = vmatprep.mubr.msk.bf16.mxu0 %vm10422_vm0, %v11374_v12  ;;  %9500 = vmatprep.mubr.msk.bf16.mxu1 %vm10422_vm0, %v11374_v12 }
 0x1f2   : > { %9504 = vmatprep.subr.bf16.mxu0 %v11374_v12  ;;  %9510 = vmatprep.subr.bf16.mxu1 %v11374_v12 }
 0x1f7   : > { %9495 = vmatmul.mubr.msk.bf16.vlgmr.msra.gmra.mrb[144].mxu0 %vm2760_vm4, %v2735_v36  ;;  %9501 = vmatmul.mubr.msk.bf16.vlgmr.msra.gmra.mrb[144].mxu1 %vm2760_vm4, %v2736_v45 }
 0x1f8   : > { %9505 = vmatpush3.bf16.msra.mxu0 %v11229_v53  ;;  %9511 = vmatpush3.bf16.msra.mxu1 %v11252_v24 }
 0x1f9   : > { %9506 = vmatprep.mubr.msk.bf16.mxu0 %vm10422_vm0, %v11374_v12  ;;  %9512 = vmatprep.mubr.msk.bf16.mxu1 %vm10422_vm0, %v11374_v12 }
 0x1fa   : > { %9516 = vmatprep.subr.bf16.mxu0 %v11374_v12  ;;  %9522 = vmatprep.subr.bf16.mxu1 %v11374_v12 }
 0x1ff   : > { %9507 = vmatmul.mubr.msk.bf16.vlgmr.msra.gmra.mrb[148].mxu0 %vm2760_vm4, %v2737_v1  ;;  %9513 = vmatmul.mubr.msk.bf16.vlgmr.msra.gmra.mrb[148].mxu1 %vm2760_vm4, %v2738_v4 }
 0x200   : > { %9517 = vmatpush3.bf16.msra.mxu0 %v11255_v6  ;;  %9523 = vmatpush3.bf16.msra.mxu1 %v11278_v33 }
 0x201   : > { %9518 = vmatprep.mubr.msk.bf16.mxu0 %vm10422_vm0, %v11374_v12  ;;  %9524 = vmatprep.mubr.msk.bf16.mxu1 %vm10422_vm0, %v11374_v12 }
 0x202   : > { %9528 = vmatprep.subr.bf16.mxu0 %v11374_v12  ;;  %9534 = vmatprep.subr.bf16.mxu1 %v11374_v12 }
 0x207   : > { %9519 = vmatmul.mubr.msk.bf16.vlgmr.msra.gmra.mrb[152].mxu0 %vm2760_vm4, %v2739_v46  ;;  %9525 = vmatmul.mubr.msk.bf16.vlgmr.msra.gmra.mrb[152].mxu1 %vm2760_vm4, %v2740_v59 }
 0x208   : > { %9529 = vmatpush3.bf16.msra.mxu0 %v11281_v2  ;;  %9535 = vmatpush3.bf16.msra.mxu1 %v11304_v58 }
 0x209   : > { %9530 = vmatprep.mubr.msk.bf16.mxu0 %vm10422_vm0, %v11374_v12  ;;  %9536 = vmatprep.mubr.msk.bf16.mxu1 %vm10422_vm0, %v11374_v12 }
 0x20a   : > { %9540 = vmatprep.subr.bf16.mxu0 %v11374_v12  ;;  %9546 = vmatprep.subr.bf16.mxu1 %v11374_v12 }
 0x20f   : > { %9531 = vmatmul.mubr.msk.bf16.vlgmr.msra.gmra.mrb[156].mxu0 %vm2760_vm4, %v2741_v25  ;;  %9537 = vmatmul.mubr.msk.bf16.vlgmr.msra.gmra.mrb[156].mxu1 %vm2760_vm4, %v2742_v44 }
 0x210   : > { %9541 = vmatpush3.bf16.msra.mxu0 %v11125_v13  ;;  %9547 = vmatpush3.bf16.msra.mxu1 %v11148_v19  ;;  %v8433_v13 = vld [vmem:[%s12389_s3 + $0x84] sm:$0xf]  ;;  %v8434_v19 = vld [vmem:[%s12389_s3 + $0x88] sm:$0xf] }
 0x211   : > { %9542 = vmatprep.mubr.msk.bf16.mxu0 %vm10422_vm0, %v11374_v12  ;;  %9548 = vmatprep.mubr.msk.bf16.mxu1 %vm10422_vm0, %v11374_v12 }
 0x212   : > { %9552 = vmatprep.subr.bf16.mxu0 %v11374_v12  ;;  %9558 = vmatprep.subr.bf16.mxu1 %v11374_v12 }
 0x217   : > { %9543 = vmatmul.mubr.msk.bf16.vlgmr.msra.gmra.mrb[160].mxu0 %vm2760_vm4, %v8432_v31  ;;  %9549 = vmatmul.mubr.msk.bf16.vlgmr.msra.gmra.mrb[160].mxu1 %vm2760_vm4, %v8433_v13  ;;  %v10236_v13 = vld [vmem:[%s12391_s5 + $0x200] sm:$0xff]  }
 0x218   : > { %9553 = vmatpush3.bf16.msra.mxu0 %v11151_v43  ;;  %9559 = vmatpush3.bf16.msra.mxu1 %v11174_v8  ;;  %v8435_v43 = vld [vmem:[%s12389_s3 + $0x8c] sm:$0xf]  ;;  %v8436_v8 = vld [vmem:[%s12389_s3 + $0x90] sm:$0xf] }
 0x219   : > { %9554 = vmatprep.mubr.msk.bf16.mxu0 %vm10422_vm0, %v11374_v12  ;;  %9560 = vmatprep.mubr.msk.bf16.mxu1 %vm10422_vm0, %v11374_v12 }
 0x21a   : > { %9564 = vmatprep.subr.bf16.mxu0 %v11374_v12  ;;  %9570 = vmatprep.subr.bf16.mxu1 %v11374_v12 }
 0x21f   : > { %9555 = vmatmul.mubr.msk.bf16.vlgmr.msra.gmra.mrb[164].mxu0 %vm2760_vm4, %v8434_v19  ;;  %9561 = vmatmul.mubr.msk.bf16.vlgmr.msra.gmra.mrb[164].mxu1 %vm2760_vm4, %v8435_v43 }
 0x220   : > { %9565 = vmatpush3.bf16.msra.mxu0 %v11177_v42  ;;  %9571 = vmatpush3.bf16.msra.mxu1 %v11200_v22  ;;  %v8437_v42 = vld [vmem:[%s12389_s3 + $0x94] sm:$0xf]  ;;  %v8438_v22 = vld [vmem:[%s12389_s3 + $0x98] sm:$0xf] }
 0x221   : > { %9566 = vmatprep.mubr.msk.bf16.mxu0 %vm10422_vm0, %v11374_v12  ;;  %9572 = vmatprep.mubr.msk.bf16.mxu1 %vm10422_vm0, %v11374_v12 }
 0x222   : > { %9576 = vmatprep.subr.bf16.mxu0 %v11374_v12  ;;  %9582 = vmatprep.subr.bf16.mxu1 %v11374_v12 }
 0x227   : > { %9567 = vmatmul.mubr.msk.bf16.vlgmr.msra.gmra.mrb[168].mxu0 %vm2760_vm4, %v8436_v8  ;;  %9573 = vmatmul.mubr.msk.bf16.vlgmr.msra.gmra.mrb[168].mxu1 %vm2760_vm4, %v8437_v42 }
 0x228   : > { %9577 = vmatpush3.bf16.msra.mxu0 %v11203_v23  ;;  %9583 = vmatpush3.bf16.msra.mxu1 %v11226_v56  ;;  %v8439_v23 = vld [vmem:[%s12389_s3 + $0x9c] sm:$0xf]  ;;  %v8440_v56 = vld [vmem:[%s12389_s3 + $0xa0] sm:$0xf] }
 0x229   : > { %9578 = vmatprep.mubr.msk.bf16.mxu0 %vm10422_vm0, %v11374_v12  ;;  %9584 = vmatprep.mubr.msk.bf16.mxu1 %vm10422_vm0, %v11374_v12 }
 0x22a   : > { %9588 = vmatprep.subr.bf16.mxu0 %v11374_v12  ;;  %9594 = vmatprep.subr.bf16.mxu1 %v11374_v12 }
 0x22f   : > { %9579 = vmatmul.mubr.msk.bf16.vlgmr.msra.gmra.mrb[172].mxu0 %vm2760_vm4, %v8438_v22  ;;  %9585 = vmatmul.mubr.msk.bf16.vlgmr.msra.gmra.mrb[172].mxu1 %vm2760_vm4, %v8439_v23 }
 0x230   : > { %9589 = vmatpush3.bf16.msra.mxu0 %v11229_v53  ;;  %9595 = vmatpush3.bf16.msra.mxu1 %v11252_v24  ;;  %v8441_v53 = vld [vmem:[%s12389_s3 + $0xa4] sm:$0xf]  ;;  %v8442_v24 = vld [vmem:[%s12389_s3 + $0xa8] sm:$0xf] }
 0x231   : > { %9590 = vmatprep.mubr.msk.bf16.mxu0 %vm10422_vm0, %v11374_v12  ;;  %9596 = vmatprep.mubr.msk.bf16.mxu1 %vm10422_vm0, %v11374_v12 }
 0x232   : > { %9600 = vmatprep.subr.bf16.mxu0 %v11374_v12  ;;  %9606 = vmatprep.subr.bf16.mxu1 %v11374_v12 }
 0x237   : > { %9591 = vmatmul.mubr.msk.bf16.vlgmr.msra.gmra.mrb[176].mxu0 %vm2760_vm4, %v8440_v56  ;;  %9597 = vmatmul.mubr.msk.bf16.vlgmr.msra.gmra.mrb[176].mxu1 %vm2760_vm4, %v8441_v53 }
 0x238   : > { %9601 = vmatpush3.bf16.msra.mxu0 %v11255_v6  ;;  %9607 = vmatpush3.bf16.msra.mxu1 %v11278_v33  ;;  %v8443_v6 = vld [vmem:[%s12389_s3 + $0xac] sm:$0xf] }
 0x239   : > { %9602 = vmatprep.mubr.msk.bf16.mxu0 %vm10422_vm0, %v11374_v12  ;;  %9608 = vmatprep.mubr.msk.bf16.mxu1 %vm10422_vm0, %v11374_v12 }
 0x23a   : > { %9612 = vmatprep.subr.bf16.mxu0 %v11374_v12  ;;  %9618 = vmatprep.subr.bf16.mxu1 %v11374_v12 }
 0x23f   : > { %9603 = vmatmul.mubr.msk.bf16.vlgmr.msra.gmra.mrb[180].mxu0 %vm2760_vm4, %v8442_v24  ;;  %9609 = vmatmul.mubr.msk.bf16.vlgmr.msra.gmra.mrb[180].mxu1 %vm2760_vm4, %v8443_v6 }
 0x240   : > { %9613 = vmatpush3.bf16.msra.mxu0 %v11281_v2  ;;  %9619 = vmatpush3.bf16.msra.mxu1 %v11304_v58 }
 0x241   : > { %9614 = vmatprep.mubr.msk.bf16.mxu0 %vm10422_vm0, %v11374_v12  ;;  %9620 = vmatprep.mubr.msk.bf16.mxu1 %vm10422_vm0, %v11374_v12 }
 0x242   : > { %9624 = vmatprep.subr.bf16.mxu0 %v11374_v12  ;;  %9630 = vmatprep.subr.bf16.mxu1 %v11374_v12 }
 0x247   : > { %9615 = vmatmul.mubr.msk.bf16.vlgmr.msra.gmra.mrb[184].mxu0 %vm2760_vm4, %v8444_v32  ;;  %9621 = vmatmul.mubr.msk.bf16.vlgmr.msra.gmra.mrb[184].mxu1 %vm2760_vm4, %v8445_v9 }
 0x248   : > { %9625 = vmatpush3.bf16.msra.mxu0 %v11307_v61  ;;  %9631 = vmatpush3.bf16.msra.mxu1 %v11320_v28 }
 0x249   : > { %9626 = vmatprep.mubr.msk.bf16.mxu0 %vm10422_vm0, %v11374_v12  ;;  %9632 = vmatprep.mubr.msk.bf16.mxu1 %vm10422_vm0, %v11374_v12 }
 0x24f   : > { %9627 = vmatmul.mubr.msk.bf16.vlgmr.msra.gmra.mrb[188].mxu0 %vm2760_vm4, %v8446_v10  ;;  %9633 = vmatmul.mubr.msk.bf16.vlgmr.msra.gmra.mrb[188].mxu1 %vm2760_vm4, %v8447_v14 }
 0x250   : > { %9638 = vmatprep.mubr.msk.bf16.mxu1 %vm2760_vm4, %v10227_v20  ;;  %9782 = vmatprep.mubr.msk.bf16.mxu0 %vm2760_vm4, %v10236_v13 }
 0x26a   : > { %v11580_v15 = vpop.f32.mrb[96].mxu0  ;;  %v11582_v21 = vpop.f32.mrb[96].mxu1 }
 0x26b   : > { %v9352_v38 = vpop.f32.mrb[97].mxu0  ;;  %v9358_v39 = vpop.f32.mrb[97].mxu1 }
 0x26c   : > { %v2805_v54 = vpop.f32.mrb[98].mxu0  ;;  %v2851_v57 = vpop.f32.mrb[98].mxu1 }
 0x26d   : > { %v9353_v26 = vpop.f32.mrb[99].mxu0  ;;  %v9359_v60 = vpop.f32.mrb[99].mxu1 }
 0x272   : > { %v11584_v5 = vpop.f32.mrb[100].mxu0  ;;  %v11586_v29 = vpop.f32.mrb[100].mxu1 }
 0x273   : > { %v9364_v30 = vpop.f32.mrb[101].mxu0  ;;  %v9370_v33 = vpop.f32.mrb[101].mxu1 }
 0x274   : > { %v2897_v2 = vpop.f32.mrb[102].mxu0  ;;  %v2943_v34 = vpop.f32.mrb[102].mxu1 }
 0x275   : > { %v9365_v37 = vpop.f32.mrb[103].mxu0  ;;  %v9371_v41 = vpop.f32.mrb[103].mxu1 }
 0x27a   : > { %v11592_v16 = vpop.f32.mrb[104].mxu0  ;;  %v11594_v40 = vpop.f32.mrb[104].mxu1 }
 0x27b   : > { %v9376_v48 = vpop.f32.mrb[105].mxu0  ;;  %v9382_v55 = vpop.f32.mrb[105].mxu1 }
 0x27c   : > { %v2989_v51 = vpop.f32.mrb[106].mxu0  ;;  %v3035_v52 = vpop.f32.mrb[106].mxu1 }
 0x27d   : > { %v9377_v27 = vpop.f32.mrb[107].mxu0  ;;  %v9383_v49 = vpop.f32.mrb[107].mxu1 }
 0x282   : > { %v11596_v50 = vpop.f32.mrb[108].mxu0  ;;  %v11598_v58 = vpop.f32.mrb[108].mxu1 }
 0x283   : > { %v9388_v61 = vpop.f32.mrb[109].mxu0  ;;  %v9394_v17 = vpop.f32.mrb[109].mxu1 }
 0x284   : > { %v3081_v18 = vpop.f32.mrb[110].mxu0  ;;  %v3127_v28 = vpop.f32.mrb[110].mxu1 }
 0x285   : > { %v9389_v62 = vpop.f32.mrb[111].mxu0  ;;  %v9395_v47 = vpop.f32.mrb[111].mxu1 }
 0x28a   : > { %v11600_v63 = vpop.f32.mrb[112].mxu0  ;;  %v11602_v11 = vpop.f32.mrb[112].mxu1 }
 0x28b   : > { %v9400_v0 = vpop.f32.mrb[113].mxu0  ;;  %v9406_v7 = vpop.f32.mrb[113].mxu1 }
 0x28c   : > { %v3173_v12 = vpop.f32.mrb[114].mxu0  ;;  %v3219_v3 = vpop.f32.mrb[114].mxu1 }
 0x28d   : > { %v9401_v35 = vpop.f32.mrb[115].mxu0  ;;  %v9407_v36 = vpop.f32.mrb[115].mxu1 }
 0x292   : > { %v11604_v45 = vpop.f32.mrb[116].mxu0  ;;  %v11606_v1 = vpop.f32.mrb[116].mxu1 }
 0x293   : > { %v9412_v4 = vpop.f32.mrb[117].mxu0  ;;  %v9418_v46 = vpop.f32.mrb[117].mxu1 }
 0x294   : > { %v3265_v59 = vpop.f32.mrb[118].mxu0  ;;  %v3311_v25 = vpop.f32.mrb[118].mxu1 }
 0x295   : > { %v9413_v44 = vpop.f32.mrb[119].mxu0  ;;  %v9419_v31 = vpop.f32.mrb[119].mxu1 }
 0x29a   : > { %v11612_v19 = vpop.f32.mrb[120].mxu0  ;;  %v11614_v43 = vpop.f32.mrb[120].mxu1 }
 0x29b   : > { %v9424_v8 = vpop.f32.mrb[121].mxu0  ;;  %v9430_v42 = vpop.f32.mrb[121].mxu1 }
 0x29c   : > { %v3357_v22 = vpop.f32.mrb[122].mxu0  ;;  %v3403_v23 = vpop.f32.mrb[122].mxu1 }
 0x29d   : > { %v9425_v56 = vpop.f32.mrb[123].mxu0  ;;  %v9431_v53 = vpop.f32.mrb[123].mxu1 }
 0x2a2   : > { %v11616_v24 = vpop.f32.mrb[124].mxu0  ;;  %v11618_v6 = vpop.f32.mrb[124].mxu1 }
 0x2a3   : > { %v9436_v32 = vpop.f32.mrb[125].mxu0  ;;  %v9442_v9 = vpop.f32.mrb[125].mxu1 }
 0x2a4   : > { %v3449_v10 = vpop.f32.mrb[126].mxu0  ;;  %v3495_v14 = vpop.f32.mrb[126].mxu1 }
 0x2a5   : > { %v9437_v38 = vpop.f32.mrb[127].mxu0  ;;  %v9443_v39 = vpop.f32.mrb[127].mxu1 }
 0x2aa   : > { %v3538_v54 = vpop.f32.mrb[128].mxu0  ;;  %v3581_v57 = vpop.f32.mrb[128].mxu1 }
 0x2ab   : > { %v11621_v26 = vadd.f32 %v3538_v54, %v11580_v15  ;;  %v11624_v60 = vadd.f32 %v3581_v57, %v11582_v21  ;;  %v9448_v30 = vpop.f32.mrb[129].mxu0  ;;  %v9454_v33 = vpop.f32.mrb[129].mxu1 }
 0x2ac   : > { %v3541_v2 = vpop.f32.mrb[130].mxu0  ;;  %v3584_v34 = vpop.f32.mrb[130].mxu1 }
 0x2ad   : > { %v9449_v37 = vpop.f32.mrb[131].mxu0  ;;  %v9455_v41 = vpop.f32.mrb[131].mxu1 }
 0x2b2   : > { %v3624_v20 = vpop.f32.mrb[132].mxu0  ;;  %v3667_v48 = vpop.f32.mrb[132].mxu1 }
 0x2b3   : > { %v11627_v55 = vadd.f32 %v3624_v20, %v11584_v5  ;;  %v11630_v51 = vadd.f32 %v3667_v48, %v11586_v29  ;;  %v9460_v52 = vpop.f32.mrb[133].mxu0  ;;  %v9466_v15 = vpop.f32.mrb[133].mxu1 }
 0x2b4   : > { %v3627_v27 = vpop.f32.mrb[134].mxu0  ;;  %v3670_v49 = vpop.f32.mrb[134].mxu1 }
 0x2b5   : > { %v9461_v21 = vpop.f32.mrb[135].mxu0  ;;  %v9467_v61 = vpop.f32.mrb[135].mxu1 }
 0x2ba   : > { %v3710_v17 = vpop.f32.mrb[136].mxu0  ;;  %v3753_v18 = vpop.f32.mrb[136].mxu1 }
 0x2bb   : > { %v11633_v28 = vadd.f32 %v3710_v17, %v11592_v16  ;;  %v11636_v62 = vadd.f32 %v3753_v18, %v11594_v40  ;;  %v9472_v47 = vpop.f32.mrb[137].mxu0  ;;  %v9478_v5 = vpop.f32.mrb[137].mxu1 }
 0x2bc   : > { %v3713_v0 = vpop.f32.mrb[138].mxu0  ;;  %v3756_v7 = vpop.f32.mrb[138].mxu1 }
 0x2bd   : > { %v9473_v29 = vpop.f32.mrb[139].mxu0  ;;  %v9479_v12 = vpop.f32.mrb[139].mxu1 }
 0x2be   : > { %v11668_v47 = vpop.permute.xlu0 %4916 }
 0x2c2   : > { %v3796_v3 = vpop.f32.mrb[140].mxu0  ;;  %v3839_v35 = vpop.f32.mrb[140].mxu1 }
 0x2c3   : > { %v11639_v36 = vadd.f32 %v3796_v3, %v11596_v50  ;;  %v11642_v4 = vadd.f32 %v3839_v35, %v11598_v58  ;;  %v9484_v46 = vpop.f32.mrb[141].mxu0  ;;  %v9490_v16 = vpop.f32.mrb[141].mxu1 }
 0x2c4   : > { %v3799_v59 = vpop.f32.mrb[142].mxu0  ;;  %v3842_v25 = vpop.f32.mrb[142].mxu1 }
 0x2c5   : > { %v9485_v40 = vpop.f32.mrb[143].mxu0  ;;  %v9491_v44 = vpop.f32.mrb[143].mxu1 }
 0x2ca   : > { %v3882_v31 = vpop.f32.mrb[144].mxu0  ;;  %v3925_v13 = vpop.f32.mrb[144].mxu1 }
 0x2cb   : > { %v11645_v8 = vadd.f32 %v3882_v31, %v11600_v63  ;;  %v11648_v42 = vadd.f32 %v3925_v13, %v11602_v11  ;;  %v9496_v22 = vpop.f32.mrb[145].mxu0  ;;  %v9502_v50 = vpop.f32.mrb[145].mxu1 }
 0x2cc   : > { %v3885_v23 = vpop.f32.mrb[146].mxu0  ;;  %v3928_v56 = vpop.f32.mrb[146].mxu1 }
 0x2cd   : > { %v9497_v58 = vpop.f32.mrb[147].mxu0  ;;  %v9503_v53 = vpop.f32.mrb[147].mxu1 }
 0x2ce   : > { %v10228_v58 = vld [vmem:[%s12391_s5 + $0x8] sm:$0xff]  }
 0x2d2   : > { %v3968_v32 = vpop.f32.mrb[148].mxu0  ;;  %v4011_v9 = vpop.f32.mrb[148].mxu1 }
 0x2d3   : > { %v11651_v10 = vadd.f32 %v3968_v32, %v11604_v45  ;;  %v11654_v14 = vadd.f32 %v4011_v9, %v11606_v1  ;;  %v9508_v38 = vpop.f32.mrb[149].mxu0  ;;  %v9514_v63 = vpop.f32.mrb[149].mxu1 }
 0x2d4   : > { %v3971_v39 = vpop.f32.mrb[150].mxu0  ;;  %v4014_v54 = vpop.f32.mrb[150].mxu1 }
 0x2d5   : > { %v9509_v11 = vpop.f32.mrb[151].mxu0  ;;  %v9515_v57 = vpop.f32.mrb[151].mxu1 }
 0x2da   : > { %v4054_v30 = vpop.f32.mrb[152].mxu0  ;;  %v4097_v33 = vpop.f32.mrb[152].mxu1 }
 0x2db   : > { %v11657_v2 = vadd.f32 %v4054_v30, %v11612_v19  ;;  %v11660_v34 = vadd.f32 %v4097_v33, %v11614_v43  ;;  %v9520_v37 = vpop.f32.mrb[153].mxu0  ;;  %v9526_v45 = vpop.f32.mrb[153].mxu1 }
 0x2dc   : > { %v4057_v41 = vpop.f32.mrb[154].mxu0  ;;  %v4100_v20 = vpop.f32.mrb[154].mxu1 }
 0x2dd   : > { %v9521_v1 = vpop.f32.mrb[155].mxu0  ;;  %v9527_v48 = vpop.f32.mrb[155].mxu1  ;;  %v10230_v41 = vld [vmem:[%s12391_s5 + $0x18] sm:$0xff]  }
 0x2de   : > { %v10231_v48 = vld [vmem:[%s12391_s5 + $0x20] sm:$0xff]  }
 0x2e2   : > { %v4140_v52 = vpop.f32.mrb[156].mxu0  ;;  %v4183_v15 = vpop.f32.mrb[156].mxu1 }
 0x2e3   : > { %v11663_v27 = vadd.f32 %v4140_v52, %v11616_v24  ;;  %v11666_v49 = vadd.f32 %v4183_v15, %v11618_v6  ;;  %v9532_v21 = vpop.f32.mrb[157].mxu0  ;;  %v9538_v19 = vpop.f32.mrb[157].mxu1 }
 0x2e4   : > { %v4143_v61 = vpop.f32.mrb[158].mxu0  ;;  %v4186_v17 = vpop.f32.mrb[158].mxu1 }
 0x2e5   : > { %v9533_v43 = vpop.f32.mrb[159].mxu0  ;;  %v9539_v18 = vpop.f32.mrb[159].mxu1 }
 0x2e6   : > { %v10232_v43 = vld [vmem:[%s12391_s5 + $0x28] sm:$0xff]  }
 0x2ea   : > { %v4243_v5 = vpop.f32.mrb[160].mxu0  ;;  %v4286_v0 = vpop.f32.mrb[160].mxu1 }
 0x2eb   : > { %v4897_v7 = vadd.f32 %v4243_v5, %v11621_v26  ;;  %v4898_v29 = vadd.f32 %v4286_v0, %v11624_v60  ;;  %v9544_v12 = vpop.f32.mrb[161].mxu0  ;;  %v9550_v24 = vpop.f32.mrb[161].mxu1  ;;  %v10233_v0 = vld [vmem:[%s12391_s5 + $0x30] sm:$0xff]  }
 0x2ec   : > { %v4246_v3 = vpop.f32.mrb[162].mxu0  ;;  %v4289_v35 = vpop.f32.mrb[162].mxu1 }
 0x2ed   : > { %v4919_v6 = vadd.f32 %v11668_v47, %v4897_v7  ;;  %v4920_v46 = vadd.f32 %v11668_v47, %v4898_v29  ;;  %v9545_v16 = vpop.f32.mrb[163].mxu0  ;;  %v9551_v59 = vpop.f32.mrb[163].mxu1 }
 0x2ee   : > { %v10235_v59 = vld [vmem:[%s12391_s5 + $0x40] sm:$0xff]  }
 0x2ef   : > { %v4935_v25 = vmax.f32 %v4919_v6, 0.0  ;;  %v4936_v40 = vmax.f32 %v4920_v46, 0.0  ;;  %v10234_v6 = vld [vmem:[%s12391_s5 + $0x38] sm:$0xff]  }
 0x2f1   : > { %v5207_v44 = vpack.c.bf16 %v4935_v25, %v4935_v25  ;;  %v5208_v22 = vpack.c.bf16 %v4936_v40, %v4936_v40 }
 0x2f2   : > { %v4329_v31 = vpop.f32.mrb[164].mxu0  ;;  %v4372_v13 = vpop.f32.mrb[164].mxu1 }
 0x2f3   : > { %v4899_v26 = vadd.f32 %v4329_v31, %v11627_v55  ;;  %v11676_v60 = vadd.f32 %v4372_v13, %v11630_v51  ;;  %v9556_v50 = vpop.f32.mrb[165].mxu0  ;;  %10164 = vmatprep.subr.msk.bf16.mxu1 %vm2764_vm3, %v5207_v44  ;;  %v5288_v23 = vsel %vm2764_vm3, %v5207_v44, 0  ;;  %v9562_v56 = vpop.f32.mrb[165].mxu1  ;;  %v10229_v55 = vld [vmem:[%s12391_s5 + $0x10] sm:$0xff]   ;;  %v5452_v39 = vsel %vm2764_vm3, %v5208_v22, 0 }
 0x2f4   : > { %v4332_v53 = vpop.f32.mrb[166].mxu0  ;;  %9637 = vmatpush3.bf16.msra.mxu1 %v5288_v23  ;;  %v4375_v32 = vpop.f32.mrb[166].mxu1 }
 0x2f5   : > { %v4921_v51 = vadd.f32 %v11668_v47, %v4899_v26  ;;  %v9557_v9 = vpop.f32.mrb[167].mxu0  ;;  %10165 = vmatprep.subr.msk.bf16.mxu1 %vm2764_vm3, %v5208_v22  ;;  %v9563_v38 = vpop.f32.mrb[167].mxu1 }
 0x2f6   : > { %v10238_v9 = vld [vmem:[%s12391_s5 + $0x208] sm:$0xff]  }
 0x2f7   : > { %v4937_v63 = vmax.f32 %v4921_v51, 0.0  ;;  %9639 = vmatmul.mubr.msk.bf16.vlgmr.msra.gmra.mrb[192].mxu1 %vm2760_vm4, %v10228_v58  ;;  %v10237_v51 = vld [vmem:[%s12391_s5 + $0x48] sm:$0xff]  }
 0x2f8   : > { %9655 = vmatpush3.bf16.msra.mxu1 %v5452_v39  ;;  %9642 = vmatprep.mubr.msk.bf16.mxu1 %vm2760_vm4, %v10229_v55 }
 0x2f9   : > { %v11691_v54 = vpack.c.bf16 %v4937_v63, %v4937_v63 }
 0x2fa   : > { %v4415_v11 = vpop.f32.mrb[168].mxu0  ;;  %v4458_v57 = vpop.f32.mrb[168].mxu1 }
 0x2fb   : > { %v11694_v30 = vadd.f32 %v4415_v11, %v11633_v28  ;;  %v11697_v33 = vadd.f32 %v4458_v57, %v11636_v62  ;;  %v9568_v37 = vpop.f32.mrb[169].mxu0  ;;  %10166 = vmatprep.subr.msk.bf16.mxu1 %vm2764_vm3, %v11691_v54  ;;  %v9574_v45 = vpop.f32.mrb[169].mxu1  ;;  %v10239_v11 = vld [vmem:[%s12391_s5 + $0x50] sm:$0xff]  }
 0x2fc   : > { %v4418_v20 = vpop.f32.mrb[170].mxu0  ;;  %v4461_v1 = vpop.f32.mrb[170].mxu1  ;;  %v10240_v57 = vld [vmem:[%s12391_s5 + $0x210] sm:$0xff]  }
 0x2fd   : > { %v9569_v28 = vpop.f32.mrb[171].mxu0  ;;  %v9575_v52 = vpop.f32.mrb[171].mxu1 }
 0x2ff   : > { %9643 = vmatmul.mubr.msk.bf16.gmra.mrb[196].mxu1 %vm2760_vm4, %v10230_v41  ;;  %v5616_v41 = vsel %vm2764_vm3, %v11691_v54, 0 }
 0x300   : > { %9646 = vmatprep.mubr.msk.bf16.mxu1 %vm2760_vm4, %v10231_v48 }
 0x302   : > { %v4501_v62 = vpop.f32.mrb[172].mxu0  ;;  %v4544_v15 = vpop.f32.mrb[172].mxu1 }
 0x303   : > { %v11710_v21 = vadd.f32 %v4501_v62, %v11639_v36  ;;  %v11713_v19 = vadd.f32 %v4544_v15, %v11642_v4  ;;  %v9580_v61 = vpop.f32.mrb[173].mxu0  ;;  %v9586_v17 = vpop.f32.mrb[173].mxu1 }
 0x304   : > { %v4504_v18 = vpop.f32.mrb[174].mxu0  ;;  %v4547_v5 = vpop.f32.mrb[174].mxu1  ;;  %v10241_v61 = vld [vmem:[%s12391_s5 + $0x58] sm:$0xff]  }
 0x305   : > { %v9581_v7 = vpop.f32.mrb[175].mxu0  ;;  %v9587_v29 = vpop.f32.mrb[175].mxu1  ;;  %v10242_v17 = vld [vmem:[%s12391_s5 + $0x218] sm:$0xff]  }
 0x307   : > { %9647 = vmatmul.mubr.msk.bf16.gmra.mrb[200].mxu1 %vm2760_vm4, %v10232_v43 }
 0x308   : > { %9650 = vmatprep.mubr.msk.bf16.mxu1 %vm2760_vm4, %v10233_v0 }
 0x30a   : > { %v4587_v36 = vpop.f32.mrb[176].mxu0  ;;  %v4630_v4 = vpop.f32.mrb[176].mxu1 }
 0x30b   : > { %v4905_v12 = vadd.f32 %v4587_v36, %v11645_v8  ;;  %v4906_v24 = vadd.f32 %v4630_v4, %v11648_v42  ;;  %v9592_v3 = vpop.f32.mrb[177].mxu0  ;;  %v9598_v35 = vpop.f32.mrb[177].mxu1  ;;  %v4922_v42 = vadd.f32 %v11668_v47, %v11676_v60 }
 0x30c   : > { %v4590_v46 = vpop.f32.mrb[178].mxu0  ;;  %v4633_v16 = vpop.f32.mrb[178].mxu1 }
 0x30d   : > { %v4927_v25 = vadd.f32 %v11668_v47, %v4905_v12  ;;  %v4928_v40 = vadd.f32 %v11668_v47, %v4906_v24  ;;  %v9593_v44 = vpop.f32.mrb[179].mxu0  ;;  %v9599_v8 = vpop.f32.mrb[179].mxu1  ;;  %v4938_v26 = vmax.f32 %v4922_v42, 0.0  ;;  %v10245_v12 = vld [vmem:[%s12391_s5 + $0x68] sm:$0xff]   ;;  %v4923_v42 = vadd.f32 %v11668_v47, %v11694_v30 }
 0x30e   : > { %v10246_v24 = vld [vmem:[%s12391_s5 + $0x228] sm:$0xff]   ;;  %v10251_v44 = vld [vmem:[%s12391_s5 + $0x80] sm:$0xff]  }
 0x30f   : > { %v4943_v31 = vmax.f32 %v4927_v25, 0.0  ;;  %v4944_v13 = vmax.f32 %v4928_v40, 0.0  ;;  %9651 = vmatmul.mubr.msk.bf16.gmra.mrb[204].mxu1 %vm2760_vm4, %v10234_v6  ;;  %v11757_v37 = vpack.c.bf16 %v4938_v26, %v4938_v26  ;;  %v10247_v6 = vld [vmem:[%s12391_s5 + $0x70] sm:$0xff]   ;;  %v10249_v25 = vld [vmem:[%s12391_s5 + $0x78] sm:$0xff]   ;;  %v10252_v8 = vld [vmem:[%s12391_s5 + $0x240] sm:$0xff]  }
 0x310   : > { %9656 = vmatprep.mubr.msk.bf16.mxu1 %vm2760_vm4, %v10235_v59  ;;  %v10250_v40 = vld [vmem:[%s12391_s5 + $0x238] sm:$0xff]   ;;  %v10253_v26 = vld [vmem:[%s12391_s5 + $0x88] sm:$0xff]  }
 0x311   : > { %v5215_v22 = vpack.c.bf16 %v4943_v31, %v4943_v31  ;;  %v5216_v56 = vpack.c.bf16 %v4944_v13, %v4944_v13  ;;  %v4939_v13 = vmax.f32 %v4923_v42, 0.0  ;;  %v10254_v30 = vld [vmem:[%s12391_s5 + $0x248] sm:$0xff]   ;;  %v10289_v42 = vld [vmem:[%s12391_s5 + $0x118] sm:$0xff]  }
 0x312   : > { %v4673_v50 = vpop.f32.mrb[180].mxu0  ;;  %v4716_v23 = vpop.f32.mrb[180].mxu1 }
 0x313   : > { %v4907_v58 = vadd.f32 %v4673_v50, %v11651_v10  ;;  %v11739_v53 = vadd.f32 %v4716_v23, %v11654_v14  ;;  %10172 = vmatprep.subr.msk.bf16.mxu0 %vm2764_vm3, %v5215_v22  ;;  %v6600_v60 = vsel %vm2764_vm3, %v5215_v22, 0  ;;  %v9604_v32 = vpop.f32.mrb[181].mxu0  ;;  %v9610_v55 = vpop.f32.mrb[181].mxu1  ;;  %v6764_v20 = vsel %vm2764_vm3, %v5216_v56, 0  ;;  %v10255_v50 = vld [vmem:[%s12391_s5 + $0x90] sm:$0xff]  }
 0x314   : > { %9781 = vmatpush3.bf16.msra.mxu0 %v6600_v60  ;;  %v4676_v38 = vpop.f32.mrb[182].mxu0  ;;  %v4719_v10 = vpop.f32.mrb[182].mxu1  ;;  %v10256_v23 = vld [vmem:[%s12391_s5 + $0x250] sm:$0xff]   ;;  %v10257_v32 = vld [vmem:[%s12391_s5 + $0x98] sm:$0xff]  }
 0x315   : > { %v4929_v14 = vadd.f32 %v11668_v47, %v4907_v58  ;;  %10173 = vmatprep.subr.msk.bf16.mxu0 %vm2764_vm3, %v5216_v56  ;;  %v9605_v63 = vpop.f32.mrb[183].mxu0  ;;  %v9611_v39 = vpop.f32.mrb[183].mxu1  ;;  %v4930_v31 = vadd.f32 %v11668_v47, %v11739_v53  ;;  %v5211_v56 = vpack.c.bf16 %v4939_v13, %v4939_v13  ;;  %v5780_v53 = vsel %vm2764_vm3, %v11757_v37, 0  ;;  %v10258_v55 = vld [vmem:[%s12391_s5 + $0x258] sm:$0xff]   ;;  %v10261_v38 = vld [vmem:[%s12391_s5 + $0xa8] sm:$0xff]   ;;  %v10291_v13 = vld [vmem:[%s12391_s5 + $0x120] sm:$0xff]  }
 0x316   : > { %v10262_v10 = vld [vmem:[%s12391_s5 + $0x268] sm:$0xff]   ;;  %v10264_v63 = vld [vmem:[%s12391_s5 + $0x270] sm:$0xff]   ;;  %v10265_v39 = vld [vmem:[%s12391_s5 + $0xb8] sm:$0xff]  }
 0x317   : > { %v4945_v45 = vmax.f32 %v4929_v14, 0.0  ;;  %9657 = vmatmul.mubr.msk.bf16.vlgmr.msra.gmra.mrb[192].mxu1 %vm2760_vm4, %v10237_v51  ;;  %9783 = vmatmul.mubr.msk.bf16.vlgmr.msra.gmra.mrb[192].mxu0 %vm2760_vm4, %v10238_v9  ;;  %v4946_v22 = vmax.f32 %v4930_v31, 0.0  ;;  %v10259_v51 = vld [vmem:[%s12391_s5 + $0xa0] sm:$0xff]   ;;  %v10263_v14 = vld [vmem:[%s12391_s5 + $0xb0] sm:$0xff]   ;;  %v10290_v31 = vld [vmem:[%s12391_s5 + $0x2d8] sm:$0xff]  }
 0x318   : > { %9673 = vmatpush3.bf16.msra.mxu1 %v5616_v41  ;;  %9799 = vmatpush3.bf16.msra.mxu0 %v6764_v20  ;;  %v10260_v9 = vld [vmem:[%s12391_s5 + $0x260] sm:$0xff]  }
 0x319   : > { %v5217_v1 = vpack.c.bf16 %v4945_v45, %v4945_v45  ;;  %10167 = vmatprep.subr.msk.bf16.mxu1 %vm2764_vm3, %v11757_v37  ;;  %9660 = vmatprep.mubr.msk.bf16.mxu1 %vm2760_vm4, %v10239_v11  ;;  %v5218_v58 = vpack.c.bf16 %v4946_v22, %v4946_v22  ;;  %v10266_v11 = vld [vmem:[%s12391_s5 + $0x278] sm:$0xff]   ;;  %v10268_v37 = vld [vmem:[%s12391_s5 + $0x280] sm:$0xff]   ;;  %v4924_v45 = vadd.f32 %v11668_v47, %v11697_v33  ;;  %v10270_v33 = vld [vmem:[%s12391_s5 + $0x288] sm:$0xff]  }
 0x31a   : > { %v4759_v48 = vpop.f32.mrb[184].mxu0  ;;  %v4802_v28 = vpop.f32.mrb[184].mxu1  ;;  %9786 = vmatprep.mubr.msk.bf16.mxu0 %vm2760_vm4, %v10240_v57  ;;  %v10267_v57 = vld [vmem:[%s12391_s5 + $0xc0] sm:$0xff]  }
 0x31b   : > { %v11769_v52 = vadd.f32 %v4759_v48, %v11657_v2  ;;  %v11772_v54 = vadd.f32 %v4802_v28, %v11660_v34  ;;  %10174 = vmatprep.subr.msk.bf16.mxu0 %vm2764_vm3, %v5217_v1  ;;  %v9616_v62 = vpop.f32.mrb[185].mxu0  ;;  %v9622_v15 = vpop.f32.mrb[185].mxu1  ;;  %v10243_v2 = vld [vmem:[%s12391_s5 + $0x60] sm:$0xff]   ;;  %v6928_v60 = vsel %vm2764_vm3, %v5217_v1, 0  ;;  %v4940_v20 = vmax.f32 %v4924_v45, 0.0  ;;  %v10269_v48 = vld [vmem:[%s12391_s5 + $0xc8] sm:$0xff]  }
 0x31c   : > { %v4762_v43 = vpop.f32.mrb[186].mxu0  ;;  %v4805_v18 = vpop.f32.mrb[186].mxu1  ;;  %v10244_v34 = vld [vmem:[%s12391_s5 + $0x220] sm:$0xff]   ;;  %v10271_v28 = vld [vmem:[%s12391_s5 + $0xd0] sm:$0xff]   ;;  %v8090_v45 = vld [vmem:[%s12392_s6 + $0x18] sm:$0xff] }
 0x31d   : > { %v9617_v5 = vpop.f32.mrb[187].mxu0  ;;  %v9623_v0 = vpop.f32.mrb[187].mxu1  ;;  %v4931_v41 = vadd.f32 %v11668_v47, %v11769_v52  ;;  %v10272_v52 = vld [vmem:[%s12391_s5 + $0x290] sm:$0xff]   ;;  %v5212_v62 = vpack.c.bf16 %v4940_v20, %v4940_v20  ;;  %v10273_v43 = vld [vmem:[%s12391_s5 + $0xd8] sm:$0xff]   ;;  %v10292_v22 = vld [vmem:[%s12391_s5 + $0x2e0] sm:$0xff]  }
 0x31e   : > { %v10274_v18 = vld [vmem:[%s12391_s5 + $0x298] sm:$0xff]   ;;  %v10277_v5 = vld [vmem:[%s12391_s5 + $0xe8] sm:$0xff]  }
 0x31f   : > { %9661 = vmatmul.mubr.msk.bf16.gmra.mrb[196].mxu1 %vm2760_vm4, %v10241_v61  ;;  %9787 = vmatmul.mubr.msk.bf16.gmra.mrb[196].mxu0 %vm2760_vm4, %v10242_v17  ;;  %v4947_v1 = vmax.f32 %v4931_v41, 0.0  ;;  %v5944_v61 = vsel %vm2764_vm3, %v5211_v56, 0  ;;  %v7092_v17 = vsel %vm2764_vm3, %v5218_v58, 0  ;;  %v10278_v0 = vld [vmem:[%s12391_s5 + $0x2a8] sm:$0xff]   ;;  %v10305_v41 = vld [vmem:[%s12391_s5 + $0x158] sm:$0xff]  }
 0x320   : > { %9664 = vmatprep.mubr.msk.bf16.mxu1 %vm2760_vm4, %v10243_v2  ;;  %9790 = vmatprep.mubr.msk.bf16.mxu0 %vm2760_vm4, %v10244_v34  ;;  %v10275_v2 = vld [vmem:[%s12391_s5 + $0xe0] sm:$0xff]   ;;  %v10306_v20 = vld [vmem:[%s12391_s5 + $0x318] sm:$0xff]  }
 0x321   : > { %v5219_v15 = vpack.c.bf16 %v4947_v1, %v4947_v1  ;;  %v10276_v34 = vld [vmem:[%s12391_s5 + $0x2a0] sm:$0xff]  }
 0x322   : > { %v4845_v7 = vpop.f32.mrb[188].mxu0  ;;  %v4891_v29 = vpop.f32.mrb[188].mxu1  ;;  %v10307_v1 = vld [vmem:[%s12391_s5 + $0x160] sm:$0xff]  }
 0x323   : > { %v11792_v36 = vadd.f32 %v4845_v7, %v11663_v27  ;;  %v11795_v4 = vadd.f32 %v4891_v29, %v11666_v49  ;;  %v9628_v3 = vpop.f32.mrb[189].mxu0  ;;  %v9634_v35 = vpop.f32.mrb[189].mxu1  ;;  %v10248_v27 = vld [vmem:[%s12391_s5 + $0x230] sm:$0xff]  }
 0x324   : > { %v4848_v49 = vpop.f32.mrb[190].mxu0  ;;  %v4894_v46 = vpop.f32.mrb[190].mxu1  ;;  %v10279_v7 = vld [vmem:[%s12391_s5 + $0xf0] sm:$0xff]   ;;  %v10283_v3 = vld [vmem:[%s12391_s5 + $0x100] sm:$0xff]  }
 0x325   : > { %v9629_v16 = vpop.f32.mrb[191].mxu0  ;;  %v9635_v59 = vpop.f32.mrb[191].mxu1  ;;  %v10280_v29 = vld [vmem:[%s12391_s5 + $0x2b0] sm:$0xff]   ;;  %v10284_v35 = vld [vmem:[%s12391_s5 + $0x2c0] sm:$0xff]  }
 0x326   : > { %v10285_v16 = vld [vmem:[%s12391_s5 + $0x108] sm:$0xff]   ;;  %v10288_v59 = vld [vmem:[%s12391_s5 + $0x2d0] sm:$0xff]  }
 0x327   : > { %9665 = vmatmul.mubr.msk.bf16.gmra.mrb[200].mxu1 %vm2760_vm4, %v10245_v12  ;;  %9791 = vmatmul.mubr.msk.bf16.gmra.mrb[200].mxu0 %vm2760_vm4, %v10246_v24  ;;  %v10281_v12 = vld [vmem:[%s12391_s5 + $0xf8] sm:$0xff]  }
 0x328   : > { %9668 = vmatprep.mubr.msk.bf16.mxu1 %vm2760_vm4, %v10247_v6  ;;  %9794 = vmatprep.mubr.msk.bf16.mxu0 %vm2760_vm4, %v10248_v27  ;;  %v10282_v24 = vld [vmem:[%s12391_s5 + $0x2b8] sm:$0xff]   ;;  %v4925_v6 = vadd.f32 %v11668_v47, %v11710_v21  ;;  %v4932_v27 = vadd.f32 %v11668_v47, %v11772_v54  ;;  %v10286_v21 = vld [vmem:[%s12391_s5 + $0x2c8] sm:$0xff]   ;;  %v10287_v54 = vld [vmem:[%s12391_s5 + $0x110] sm:$0xff]  }
 0x32a   : > { %v4941_v49 = vmax.f32 %v4925_v6, 0.0  ;;  %v4948_v46 = vmax.f32 %v4932_v27, 0.0 }
 0x32f   : > { %9669 = vmatmul.mubr.msk.bf16.gmra.mrb[204].mxu1 %vm2760_vm4, %v10249_v25  ;;  %9795 = vmatmul.mubr.msk.bf16.gmra.mrb[204].mxu0 %vm2760_vm4, %v10250_v40  ;;  %v5213_v25 = vpack.c.bf16 %v4941_v49, %v4941_v49  ;;  %v5220_v40 = vpack.c.bf16 %v4948_v46, %v4948_v46  ;;  %v10321_v49 = vld [vmem:[%s12391_s5 + $0x198] sm:$0xff]  }
 0x330   : > { %9674 = vmatprep.mubr.msk.bf16.mxu1 %vm2760_vm4, %v10251_v44  ;;  %9800 = vmatprep.mubr.msk.bf16.mxu0 %vm2760_vm4, %v10252_v8  ;;  %v6108_v44 = vsel %vm2764_vm3, %v5212_v62, 0  ;;  %v7256_v8 = vsel %vm2764_vm3, %v5219_v15, 0  ;;  %v10322_v46 = vld [vmem:[%s12391_s5 + $0x358] sm:$0xff]  }
 0x337   : > { %9675 = vmatmul.mubr.msk.bf16.vlgmr.msra.gmra.mrb[192].mxu1 %vm2760_vm4, %v10253_v26  ;;  %9801 = vmatmul.mubr.msk.bf16.vlgmr.msra.gmra.mrb[192].mxu0 %vm2760_vm4, %v10254_v30  ;;  %v10293_v26 = vld [vmem:[%s12391_s5 + $0x128] sm:$0xff]  }
 0x338   : > { %9691 = vmatpush3.bf16.msra.mxu1 %v5780_v53  ;;  %9817 = vmatpush3.bf16.msra.mxu0 %v6928_v60  ;;  %v10294_v30 = vld [vmem:[%s12391_s5 + $0x2e8] sm:$0xff]   ;;  %v10299_v53 = vld [vmem:[%s12391_s5 + $0x140] sm:$0xff]  }
 0x339   : > { %10168 = vmatprep.subr.msk.bf16.mxu1 %vm2764_vm3, %v5211_v56  ;;  %10175 = vmatprep.subr.msk.bf16.mxu0 %vm2764_vm3, %v5218_v58  ;;  %v10297_v56 = vld [vmem:[%s12391_s5 + $0x138] sm:$0xff]   ;;  %v10300_v60 = vld [vmem:[%s12391_s5 + $0x300] sm:$0xff]  }
 0x33a   : > { %9678 = vmatprep.mubr.msk.bf16.mxu1 %vm2760_vm4, %v10255_v50  ;;  %9804 = vmatprep.mubr.msk.bf16.mxu0 %vm2760_vm4, %v10256_v23  ;;  %v10295_v50 = vld [vmem:[%s12391_s5 + $0x130] sm:$0xff]   ;;  %v10298_v58 = vld [vmem:[%s12391_s5 + $0x2f8] sm:$0xff]  }
 0x33b   : > { %v10296_v23 = vld [vmem:[%s12391_s5 + $0x2f0] sm:$0xff]  }
 0x33f   : > { %9679 = vmatmul.mubr.msk.bf16.gmra.mrb[196].mxu1 %vm2760_vm4, %v10257_v32  ;;  %9805 = vmatmul.mubr.msk.bf16.gmra.mrb[196].mxu0 %vm2760_vm4, %v10258_v55  ;;  %v4926_v32 = vadd.f32 %v11668_v47, %v11713_v19  ;;  %v4933_v55 = vadd.f32 %v11668_v47, %v11792_v36  ;;  %v8088_v19 = vld [vmem:[%s12392_s6 + $0x8] sm:$0xff] }
 0x340   : > { %9682 = vmatprep.mubr.msk.bf16.mxu1 %vm2760_vm4, %v10259_v51  ;;  %9808 = vmatprep.mubr.msk.bf16.mxu0 %vm2760_vm4, %v10260_v9  ;;  %v8087_v51 = vld [vmem:[%s12392_s6] sm:$0xff]  ;;  %v10301_v36 = vld [vmem:[%s12391_s5 + $0x148] sm:$0xff]  }
 0x341   : > { %8105 = vperm.xlu1 %10226, %v8087_v51   ;;  %v4942_v9 = vmax.f32 %v4926_v32, 0.0  ;;  %v10342_v32 = vld [vmem:[%s12391_s5 + $0x3a8] sm:$0xff]   ;;  %v10344_v51 = vld [vmem:[%s12391_s5 + $0x3b0] sm:$0xff]  }
 0x345   : > { %8110 = vperm.xlu1 %10226, %v8088_v19   ;;  %v10345_v19 = vld [vmem:[%s12391_s5 + $0x1f8] sm:$0xff]  }
 0x347   : > { %9683 = vmatmul.mubr.msk.bf16.gmra.mrb[200].mxu1 %vm2760_vm4, %v10261_v38  ;;  %9809 = vmatmul.mubr.msk.bf16.gmra.mrb[200].mxu0 %vm2760_vm4, %v10262_v10  ;;  %v4949_v38 = vmax.f32 %v4933_v55, 0.0  ;;  %v10302_v10 = vld [vmem:[%s12391_s5 + $0x308] sm:$0xff]   ;;  %v10343_v55 = vld [vmem:[%s12391_s5 + $0x1f0] sm:$0xff]  }
 0x348   : > { %9686 = vmatprep.mubr.msk.bf16.mxu1 %vm2760_vm4, %v10263_v14  ;;  %9812 = vmatprep.mubr.msk.bf16.mxu0 %vm2760_vm4, %v10264_v63  ;;  %v10303_v14 = vld [vmem:[%s12391_s5 + $0x150] sm:$0xff]  }
 0x349   : > { %v10304_v63 = vld [vmem:[%s12391_s5 + $0x310] sm:$0xff]   ;;  %8120 = vperm.xlu1 %10226, %v8090_v45  }
 0x34f   : > { %9687 = vmatmul.mubr.msk.bf16.gmra.mrb[204].mxu1 %vm2760_vm4, %v10265_v39  ;;  %9813 = vmatmul.mubr.msk.bf16.gmra.mrb[204].mxu0 %vm2760_vm4, %v10266_v11  ;;  %v5214_v39 = vpack.c.bf16 %v4942_v9, %v4942_v9  ;;  %v5221_v11 = vpack.c.bf16 %v4949_v38, %v4949_v38  ;;  %v10346_v9 = vld [vmem:[%s12391_s5 + $0x3b8] sm:$0xff]   ;;  %v10347_v38 = vld [vmem:[%s12391_s5 + $0x3c0] sm:$0xff]  }
 0x350   : > { %9692 = vmatprep.mubr.msk.bf16.mxu1 %vm2760_vm4, %v10267_v57  ;;  %9818 = vmatprep.mubr.msk.bf16.mxu0 %vm2760_vm4, %v10268_v37  ;;  %v6272_v57 = vsel %vm2764_vm3, %v5213_v25, 0  ;;  %v7420_v37 = vsel %vm2764_vm3, %v5220_v40, 0 }
 0x351   : > { %v6436_v6 = vsel %vm2764_vm3, %v5214_v39, 0  ;;  %v7584_v27 = vsel %vm2764_vm3, %v5221_v11, 0 }
 0x357   : > { %9693 = vmatmul.mubr.msk.bf16.vlgmr.msra.gmra.mrb[192].mxu1 %vm2760_vm4, %v10269_v48  ;;  %9819 = vmatmul.mubr.msk.bf16.vlgmr.msra.gmra.mrb[192].mxu0 %vm2760_vm4, %v10270_v33  ;;  %v10308_v48 = vld [vmem:[%s12391_s5 + $0x320] sm:$0xff]   ;;  %v8092_v33 = vld [vmem:[%s12392_s6 + $0x28] sm:$0xff] }
 0x358   : > { %9709 = vmatpush3.bf16.msra.mxu1 %v5944_v61  ;;  %9835 = vmatpush3.bf16.msra.mxu0 %v7092_v17  ;;  %v10312_v61 = vld [vmem:[%s12391_s5 + $0x330] sm:$0xff]   ;;  %v8096_v17 = vld [vmem:[%s12392_s6 + $0x48] sm:$0xff] }
 0x359   : > { %10169 = vmatprep.subr.msk.bf16.mxu1 %vm2764_vm3, %v5212_v62  ;;  %10176 = vmatprep.subr.msk.bf16.mxu0 %vm2764_vm3, %v5219_v15  ;;  %v10310_v62 = vld [vmem:[%s12391_s5 + $0x328] sm:$0xff]   ;;  %v10311_v15 = vld [vmem:[%s12391_s5 + $0x170] sm:$0xff]  }
 0x35a   : > { %9696 = vmatprep.mubr.msk.bf16.mxu1 %vm2760_vm4, %v10271_v28  ;;  %9822 = vmatprep.mubr.msk.bf16.mxu0 %vm2760_vm4, %v10272_v52  ;;  %v8094_v28 = vld [vmem:[%s12392_s6 + $0x38] sm:$0xff]  ;;  %v10309_v52 = vld [vmem:[%s12391_s5 + $0x168] sm:$0xff]  }
 0x35b   : > { %8130 = vperm.xlu1 %10226, %v8092_v33  }
 0x35f   : > { %9697 = vmatmul.mubr.msk.bf16.gmra.mrb[196].mxu1 %vm2760_vm4, %v10273_v43  ;;  %9823 = vmatmul.mubr.msk.bf16.gmra.mrb[196].mxu0 %vm2760_vm4, %v10274_v18  ;;  %v8098_v43 = vld [vmem:[%s12392_s6 + $0x58] sm:$0xff] }
 0x360   : > { %9700 = vmatprep.mubr.msk.bf16.mxu1 %vm2760_vm4, %v10275_v2  ;;  %9826 = vmatprep.mubr.msk.bf16.mxu0 %vm2760_vm4, %v10276_v34  ;;  %v10313_v18 = vld [vmem:[%s12391_s5 + $0x178] sm:$0xff]   ;;  %v10315_v34 = vld [vmem:[%s12391_s5 + $0x180] sm:$0xff]  }
 0x361   : > { %8140 = vperm.xlu1 %10226, %v8094_v28   ;;  %v10314_v2 = vld [vmem:[%s12391_s5 + $0x338] sm:$0xff]  }
 0x365   : > { %8150 = vperm.xlu1 %10226, %v8096_v17  }
 0x367   : > { %9701 = vmatmul.mubr.msk.bf16.gmra.mrb[200].mxu1 %vm2760_vm4, %v10277_v5  ;;  %9827 = vmatmul.mubr.msk.bf16.gmra.mrb[200].mxu0 %vm2760_vm4, %v10278_v0  ;;  %v10316_v5 = vld [vmem:[%s12391_s5 + $0x340] sm:$0xff]   ;;  %v8100_v0 = vld [vmem:[%s12392_s6 + $0x68] sm:$0xff] }
 0x368   : > { %9704 = vmatprep.mubr.msk.bf16.mxu1 %vm2760_vm4, %v10279_v7  ;;  %9830 = vmatprep.mubr.msk.bf16.mxu0 %vm2760_vm4, %v10280_v29  ;;  %v4934_v7 = vadd.f32 %v11668_v47, %v11795_v4  ;;  %v8102_v29 = vld [vmem:[%s12392_s6 + $0x78] sm:$0xff]  ;;  %v10318_v47 = vld [vmem:[%s12391_s5 + $0x348] sm:$0xff]   ;;  %v10319_v4 = vld [vmem:[%s12391_s5 + $0x190] sm:$0xff]  }
 0x369   : > { %8160 = vperm.xlu1 %10226, %v8098_v43  }
 0x36d   : > { %8170 = vperm.xlu1 %10226, %v8100_v0  }
 0x36f   : > { %9705 = vmatmul.mubr.msk.bf16.gmra.mrb[204].mxu1 %vm2760_vm4, %v10281_v12  ;;  %9831 = vmatmul.mubr.msk.bf16.gmra.mrb[204].mxu0 %vm2760_vm4, %v10282_v24  ;;  %v4950_v12 = vmax.f32 %v4934_v7, 0.0  ;;  %v10317_v24 = vld [vmem:[%s12391_s5 + $0x188] sm:$0xff]  }
 0x370   : > { %9710 = vmatprep.mubr.msk.bf16.mxu1 %vm2760_vm4, %v10283_v3  ;;  %9836 = vmatprep.mubr.msk.bf16.mxu0 %vm2760_vm4, %v10284_v35  ;;  %v10320_v3 = vld [vmem:[%s12391_s5 + $0x350] sm:$0xff]  }
 0x371   : > { %8180 = vperm.xlu1 %10226, %v8102_v29   ;;  %v5222_v35 = vpack.c.bf16 %v4950_v12, %v4950_v12 }
 0x377   : > { %9711 = vmatmul.mubr.msk.bf16.vlgmr.msra.gmra.mrb[192].mxu1 %vm2760_vm4, %v10285_v16  ;;  %9837 = vmatmul.mubr.msk.bf16.vlgmr.msra.gmra.mrb[192].mxu0 %vm2760_vm4, %v10286_v21  ;;  %v10323_v16 = vld [vmem:[%s12391_s5 + $0x1a0] sm:$0xff]  }
 0x378   : > { %9727 = vmatpush3.bf16.msra.mxu1 %v6108_v44  ;;  %9853 = vmatpush3.bf16.msra.mxu0 %v7256_v8  ;;  %v10324_v21 = vld [vmem:[%s12391_s5 + $0x360] sm:$0xff]   ;;  %v10329_v44 = vld [vmem:[%s12391_s5 + $0x1b8] sm:$0xff]  }
 0x379   : > { %10170 = vmatprep.subr.msk.bf16.mxu1 %vm2764_vm3, %v5213_v25  ;;  %10177 = vmatprep.subr.msk.bf16.mxu0 %vm2764_vm3, %v5220_v40  ;;  %v10327_v25 = vld [vmem:[%s12391_s5 + $0x1b0] sm:$0xff]   ;;  %v10330_v8 = vld [vmem:[%s12391_s5 + $0x378] sm:$0xff]  }
 0x37a   : > { %9714 = vmatprep.mubr.msk.bf16.mxu1 %vm2760_vm4, %v10287_v54  ;;  %9840 = vmatprep.mubr.msk.bf16.mxu0 %vm2760_vm4, %v10288_v59  ;;  %v10325_v54 = vld [vmem:[%s12391_s5 + $0x1a8] sm:$0xff]   ;;  %v10328_v40 = vld [vmem:[%s12391_s5 + $0x370] sm:$0xff]  }
 0x37b   : > { %v10326_v59 = vld [vmem:[%s12391_s5 + $0x368] sm:$0xff]  }
 0x37f   : > { %9715 = vmatmul.mubr.msk.bf16.gmra.mrb[196].mxu1 %vm2760_vm4, %v10289_v42  ;;  %9841 = vmatmul.mubr.msk.bf16.gmra.mrb[196].mxu0 %vm2760_vm4, %v10290_v31  ;;  %v10331_v42 = vld [vmem:[%s12391_s5 + $0x1c0] sm:$0xff]  }
 0x380   : > { %9718 = vmatprep.mubr.msk.bf16.mxu1 %vm2760_vm4, %v10291_v13  ;;  %9844 = vmatprep.mubr.msk.bf16.mxu0 %vm2760_vm4, %v10292_v22  ;;  %v10332_v31 = vld [vmem:[%s12391_s5 + $0x380] sm:$0xff]   ;;  %v10333_v13 = vld [vmem:[%s12391_s5 + $0x1c8] sm:$0xff]  }
 0x381   : > { %v10334_v22 = vld [vmem:[%s12391_s5 + $0x388] sm:$0xff]  }
 0x387   : > { %9719 = vmatmul.mubr.msk.bf16.gmra.mrb[200].mxu1 %vm2760_vm4, %v10293_v26  ;;  %9845 = vmatmul.mubr.msk.bf16.gmra.mrb[200].mxu0 %vm2760_vm4, %v10294_v30  ;;  %v10335_v26 = vld [vmem:[%s12391_s5 + $0x1d0] sm:$0xff]  }
 0x388   : > { %9722 = vmatprep.mubr.msk.bf16.mxu1 %vm2760_vm4, %v10295_v50  ;;  %9848 = vmatprep.mubr.msk.bf16.mxu0 %vm2760_vm4, %v10296_v23  ;;  %v10336_v30 = vld [vmem:[%s12391_s5 + $0x390] sm:$0xff]   ;;  %v7748_v50 = vsel %vm2764_vm3, %v5222_v35, 0  ;;  %v10337_v23 = vld [vmem:[%s12391_s5 + $0x1d8] sm:$0xff]  }
 0x38f   : > { %9723 = vmatmul.mubr.msk.bf16.gmra.mrb[204].mxu1 %vm2760_vm4, %v10297_v56  ;;  %9849 = vmatmul.mubr.msk.bf16.gmra.mrb[204].mxu0 %vm2760_vm4, %v10298_v58  ;;  %v10338_v56 = vld [vmem:[%s12391_s5 + $0x398] sm:$0xff]   ;;  %v10339_v58 = vld [vmem:[%s12391_s5 + $0x1e0] sm:$0xff]  }
 0x390   : > { %9728 = vmatprep.mubr.msk.bf16.mxu1 %vm2760_vm4, %v10299_v53  ;;  %9854 = vmatprep.mubr.msk.bf16.mxu0 %vm2760_vm4, %v10300_v60  ;;  %v10340_v53 = vld [vmem:[%s12391_s5 + $0x3a0] sm:$0xff]   ;;  %v10341_v60 = vld [vmem:[%s12391_s5 + $0x1e8] sm:$0xff]  }
 0x397   : > { %9729 = vmatmul.mubr.msk.bf16.vlgmr.msra.gmra.mrb[192].mxu1 %vm2760_vm4, %v10301_v36  ;;  %9855 = vmatmul.mubr.msk.bf16.vlgmr.msra.gmra.mrb[192].mxu0 %vm2760_vm4, %v10302_v10  ;;  %v10348_v36 = vld [vmem:[%s12391_s5 + $0x3c8] sm:$0xff]   ;;  %v10349_v10 = vld [vmem:[%s12391_s5 + $0x3d0] sm:$0xff]  }
 0x398   : > { %9745 = vmatpush3.bf16.msra.mxu1 %v6272_v57  ;;  %9871 = vmatpush3.bf16.msra.mxu0 %v7420_v37  ;;  %v10354_v57 = vld [vmem:[%s12391_s5 + $0x3f8] sm:$0xff]  }
 0x399   : > { %10171 = vmatprep.subr.msk.bf16.mxu1 %vm2764_vm3, %v5214_v39  ;;  %10178 = vmatprep.subr.msk.bf16.mxu0 %vm2764_vm3, %v5221_v11  ;;  %v10352_v39 = vld [vmem:[%s12391_s5 + $0x3e8] sm:$0xff]   ;;  %v10353_v11 = vld [vmem:[%s12391_s5 + $0x3f0] sm:$0xff]  }
 0x39a   : > { %9732 = vmatprep.mubr.msk.bf16.mxu1 %vm2760_vm4, %v10303_v14  ;;  %9858 = vmatprep.mubr.msk.bf16.mxu0 %vm2760_vm4, %v10304_v63  ;;  %v10350_v14 = vld [vmem:[%s12391_s5 + $0x3d8] sm:$0xff]   ;;  %v10351_v63 = vld [vmem:[%s12391_s5 + $0x3e0] sm:$0xff]  }
 0x39f   : > { %9733 = vmatmul.mubr.msk.bf16.gmra.mrb[196].mxu1 %vm2760_vm4, %v10305_v41  ;;  %9859 = vmatmul.mubr.msk.bf16.gmra.mrb[196].mxu0 %vm2760_vm4, %v10306_v20 }
 0x3a0   : > { %9736 = vmatprep.mubr.msk.bf16.mxu1 %vm2760_vm4, %v10307_v1  ;;  %9862 = vmatprep.mubr.msk.bf16.mxu0 %vm2760_vm4, %v10308_v48 }
 0x3a7   : > { %9737 = vmatmul.mubr.msk.bf16.gmra.mrb[200].mxu1 %vm2760_vm4, %v10309_v52  ;;  %9863 = vmatmul.mubr.msk.bf16.gmra.mrb[200].mxu0 %vm2760_vm4, %v10310_v62 }
 0x3a8   : > { %9740 = vmatprep.mubr.msk.bf16.mxu1 %vm2760_vm4, %v10311_v15  ;;  %9866 = vmatprep.mubr.msk.bf16.mxu0 %vm2760_vm4, %v10312_v61 }
 0x3af   : > { %9741 = vmatmul.mubr.msk.bf16.gmra.mrb[204].mxu1 %vm2760_vm4, %v10313_v18  ;;  %9867 = vmatmul.mubr.msk.bf16.gmra.mrb[204].mxu0 %vm2760_vm4, %v10314_v2  ;;  %v8116_v18 = vpop.permute.xlu0 %8115 }
 0x3b0   : > { %9746 = vmatprep.mubr.msk.bf16.mxu1 %vm2760_vm4, %v10315_v34  ;;  %9872 = vmatprep.mubr.msk.bf16.mxu0 %vm2760_vm4, %v10316_v5 }
 0x3b3   : > { %v8126_v29 = vpop.permute.xlu0 %8125 }
 0x3b7   : > { %9747 = vmatmul.mubr.msk.bf16.vlgmr.msra.gmra.mrb[192].mxu1 %vm2760_vm4, %v10317_v24  ;;  %9873 = vmatmul.mubr.msk.bf16.vlgmr.msra.gmra.mrb[192].mxu0 %vm2760_vm4, %v10318_v47 }
 0x3b8   : > { %9763 = vmatpush3.bf16.msra.mxu1 %v6436_v6  ;;  %9889 = vmatpush3.bf16.msra.mxu0 %v7584_v27 }
 0x3b9   : > { %10179 = vmatprep.subr.msk.bf16.mxu0 %vm2764_vm3, %v5222_v35  ;;  %9750 = vmatprep.mubr.msk.bf16.mxu1 %vm2760_vm4, %v10319_v4 }
 0x3ba   : > { %9876 = vmatprep.mubr.msk.bf16.mxu0 %vm2760_vm4, %v10320_v3  ;;  %v8136_v3 = vpop.permute.xlu0 %8135 }
 0x3bf   : > { %9751 = vmatmul.mubr.msk.bf16.gmra.mrb[196].mxu1 %vm2760_vm4, %v10321_v49  ;;  %9877 = vmatmul.mubr.msk.bf16.gmra.mrb[196].mxu0 %vm2760_vm4, %v10322_v46 }
 0x3c0   : > { %9754 = vmatprep.mubr.msk.bf16.mxu1 %vm2760_vm4, %v10323_v16  ;;  %9880 = vmatprep.mubr.msk.bf16.mxu0 %vm2760_vm4, %v10324_v21  ;;  %v8106_v52 = vpop.permute.xlu1 %8105 }
 0x3c4   : > { %v8111_v61 = vpop.permute.xlu1 %8110 }
 0x3c7   : > { %9755 = vmatmul.mubr.msk.bf16.gmra.mrb[200].mxu1 %vm2760_vm4, %v10325_v54  ;;  %9881 = vmatmul.mubr.msk.bf16.gmra.mrb[200].mxu0 %vm2760_vm4, %v10326_v59 }
 0x3c8   : > { %9758 = vmatprep.mubr.msk.bf16.mxu1 %vm2760_vm4, %v10327_v25  ;;  %9884 = vmatprep.mubr.msk.bf16.mxu0 %vm2760_vm4, %v10328_v40  ;;  %v8121_v2 = vpop.permute.xlu1 %8120  ;;  %v8146_v40 = vpop.permute.xlu0 %8145 }
 0x3cf   : > { %9759 = vmatmul.mubr.msk.bf16.gmra.mrb[204].mxu1 %vm2760_vm4, %v10329_v44  ;;  %9885 = vmatmul.mubr.msk.bf16.gmra.mrb[204].mxu0 %vm2760_vm4, %v10330_v8 }
 0x3d0   : > { %9764 = vmatprep.mubr.msk.bf16.mxu1 %vm2760_vm4, %v10331_v42  ;;  %9890 = vmatprep.mubr.msk.bf16.mxu0 %vm2760_vm4, %v10332_v31 }
 0x3d7   : > { %9765 = vmatmul.mubr.msk.bf16.vlgmr.msra.gmra.mrb[192].mxu1 %vm2760_vm4, %v10333_v13  ;;  %9891 = vmatmul.mubr.msk.bf16.vlgmr.msra.gmra.mrb[192].mxu0 %vm2760_vm4, %v10334_v22 }
 0x3d8   : > { %9907 = vmatpush3.bf16.msra.mxu0 %v7748_v50  ;;  %9768 = vmatprep.mubr.msk.bf16.mxu1 %vm2760_vm4, %v10335_v26 }
 0x3d9   : > { %9894 = vmatprep.mubr.msk.bf16.mxu0 %vm2760_vm4, %v10336_v30 }
 0x3da   : > { %v8131_v12 = vpop.permute.xlu1 %8130 }
 0x3df   : > { %9769 = vmatmul.mubr.msk.bf16.gmra.mrb[196].mxu1 %vm2760_vm4, %v10337_v23  ;;  %9895 = vmatmul.mubr.msk.bf16.gmra.mrb[196].mxu0 %vm2760_vm4, %v10338_v56 }
 0x3e0   : > { %9772 = vmatprep.mubr.msk.bf16.mxu1 %vm2760_vm4, %v10339_v58  ;;  %9898 = vmatprep.mubr.msk.bf16.mxu0 %vm2760_vm4, %v10340_v53  ;;  %v8141_v16 = vpop.permute.xlu1 %8140  ;;  %v8156_v53 = vpop.permute.xlu0 %8155 }
 0x3e4   : > { %v8151_v31 = vpop.permute.xlu1 %8150 }
 0x3e7   : > { %9773 = vmatmul.mubr.msk.bf16.gmra.mrb[200].mxu1 %vm2760_vm4, %v10341_v60  ;;  %9899 = vmatmul.mubr.msk.bf16.gmra.mrb[200].mxu0 %vm2760_vm4, %v10342_v32 }
 0x3e8   : > { %9776 = vmatprep.mubr.msk.bf16.mxu1 %vm2760_vm4, %v10343_v55  ;;  %9902 = vmatprep.mubr.msk.bf16.mxu0 %vm2760_vm4, %v10344_v51  ;;  %v8161_v32 = vpop.permute.xlu1 %8160 }
 0x3ef   : > { %9777 = vmatmul.mubr.msk.bf16.gmra.mrb[204].mxu1 %vm2760_vm4, %v10345_v19  ;;  %9903 = vmatmul.mubr.msk.bf16.gmra.mrb[204].mxu0 %vm2760_vm4, %v10346_v9 }
 0x3f0   : > { %9908 = vmatprep.mubr.msk.bf16.mxu0 %vm2760_vm4, %v10347_v38 }
 0x3f7   : > { %9909 = vmatmul.mubr.msk.bf16.vlgmr.msra.gmra.mrb[192].mxu0 %vm2760_vm4, %v10348_v36 }
 0x3f8   : > { %9912 = vmatprep.mubr.msk.bf16.mxu0 %vm2760_vm4, %v10349_v10 }
 0x3ff   : > { %9913 = vmatmul.mubr.msk.bf16.gmra.mrb[196].mxu0 %vm2760_vm4, %v10350_v14 }
 0x400   : > { %9916 = vmatprep.mubr.msk.bf16.mxu0 %vm2760_vm4, %v10351_v63  ;;  %v8166_v63 = vpop.permute.xlu0 %8165 }
 0x407   : > { %9917 = vmatmul.mubr.msk.bf16.gmra.mrb[200].mxu0 %vm2760_vm4, %v10352_v39 }
 0x408   : > { %9920 = vmatprep.mubr.msk.bf16.mxu0 %vm2760_vm4, %v10353_v11 }
 0x40f   : > { %9921 = vmatmul.mubr.msk.bf16.gmra.mrb[204].mxu0 %vm2760_vm4, %v10354_v57 }
 0x4aa   : > { %v9766_v37 = vpop.f32.mrb[192].mxu1 }
 0x4ab   : > { %v6472_v45 = vpop.f32.mrb[193].mxu1 }
 0x4ac   : > { %v9767_v41 = vpop.f32.mrb[194].mxu1 }
 0x4ad   : > { %v6475_v20 = vpop.f32.mrb[195].mxu1 }
 0x4b2   : > { %v9770_v1 = vpop.f32.mrb[196].mxu1 }
 0x4b3   : > { %v6488_v48 = vpop.f32.mrb[197].mxu1 }
 0x4b4   : > { %v9771_v33 = vpop.f32.mrb[198].mxu1 }
 0x4b5   : > { %v6491_v28 = vpop.f32.mrb[199].mxu1 }
 0x4ba   : > { %v9774_v62 = vpop.f32.mrb[200].mxu1 }
 0x4bb   : > { %v6504_v15 = vpop.f32.mrb[201].mxu1 }
 0x4bc   : > { %v9775_v17 = vpop.f32.mrb[202].mxu1 }
 0x4bd   : > { %v6507_v43 = vpop.f32.mrb[203].mxu1 }
 0x4c2   : > { %v12303_v34 = vpop.f32.mrb[204].mxu1 }
 0x4c3   : > { %v12305_v5 = vpop.f32.mrb[205].mxu1 }
 0x4c4   : > { %v12307_v0 = vpop.f32.mrb[206].mxu1 }
 0x4c5   : > { %v12309_v7 = vpop.f32.mrb[207].mxu1 }
 0x4ca   : > { %v9910_v24 = vpop.f32.mrb[192].mxu0 }
 0x4cb   : > { %v9924_v47 = vadd.f32 %v9910_v24, %v9766_v37  ;;  %v7784_v4 = vpop.f32.mrb[193].mxu0  ;;  %v8171_v37 = vpop.permute.xlu1 %8170 }
 0x4cc   : > { %v9925_v35 = vadd.f32 %v7784_v4, %v6472_v45  ;;  %v9911_v6 = vpop.f32.mrb[194].mxu0 }
 0x4cd   : > { %v8185_v27 = vadd.f32 %v9924_v47, %v8116_v18  ;;  %v9926_v49 = vadd.f32 %v9911_v6, %v9767_v41  ;;  %v7787_v46 = vpop.f32.mrb[195].mxu0 }
 0x4ce   : > { %v8183_v21 = vadd.f32 %v9925_v35, %v8106_v52  ;;  %v9927_v54 = vadd.f32 %v7787_v46, %v6475_v20 }
 0x4cf   : > { %8201 = vst [vmem:[%s12312_s13 + $0x10] sm:$0xff] %v8185_v27  ;;  %v8186_v59 = vadd.f32 %v9926_v49, %v8121_v2 }
 0x4d0   : > { %8199 = vst [vmem:[%s12312_s13] sm:$0xff] %v8183_v21  ;;  %v8184_v25 = vadd.f32 %v9927_v54, %v8111_v61  ;;  %v8181_v61 = vpop.permute.xlu1 %8180 }
 0x4d1   : > { %8202 = vst [vmem:[%s12312_s13 + $0x18] sm:$0xff] %v8186_v59 }
 0x4d2   : > { %8200 = vst [vmem:[%s12312_s13 + $0x8] sm:$0xff] %v8184_v25  ;;  %v9914_v44 = vpop.f32.mrb[196].mxu0 }
 0x4d3   : > { %v9928_v8 = vadd.f32 %v9914_v44, %v9770_v1  ;;  %v7800_v42 = vpop.f32.mrb[197].mxu0 }
 0x4d4   : > { %v9929_v13 = vadd.f32 %v7800_v42, %v6488_v48  ;;  %v9915_v22 = vpop.f32.mrb[198].mxu0  ;;  %v8176_v48 = vpop.permute.xlu0 %8175 }
 0x4d5   : > { %v8189_v26 = vadd.f32 %v9928_v8, %v8136_v3  ;;  %v9930_v30 = vadd.f32 %v9915_v22, %v9771_v33  ;;  %v7803_v50 = vpop.f32.mrb[199].mxu0 }
 0x4d6   : > { %v8187_v23 = vadd.f32 %v9929_v13, %v8126_v29  ;;  %v9931_v56 = vadd.f32 %v7803_v50, %v6491_v28 }
 0x4d7   : > { %8205 = vst [vmem:[%s12312_s13 + $0x30] sm:$0xff] %v8189_v26  ;;  %v8190_v58 = vadd.f32 %v9930_v30, %v8141_v16 }
 0x4d8   : > { %8203 = vst [vmem:[%s12312_s13 + $0x20] sm:$0xff] %v8187_v23  ;;  %v8188_v60 = vadd.f32 %v9931_v56, %v8131_v12 }
 0x4d9   : > { %8206 = vst [vmem:[%s12312_s13 + $0x38] sm:$0xff] %v8190_v58 }
 0x4da   : > { %8204 = vst [vmem:[%s12312_s13 + $0x28] sm:$0xff] %v8188_v60  ;;  %v9918_v55 = vpop.f32.mrb[200].mxu0 }
 0x4db   : > { %v9932_v51 = vadd.f32 %v9918_v55, %v9774_v62  ;;  %v7816_v19 = vpop.f32.mrb[201].mxu0 }
 0x4dc   : > { %v9933_v9 = vadd.f32 %v7816_v19, %v6504_v15  ;;  %v9919_v38 = vpop.f32.mrb[202].mxu0 }
 0x4dd   : > { %v8193_v36 = vadd.f32 %v9932_v51, %v8156_v53  ;;  %v9934_v10 = vadd.f32 %v9919_v38, %v9775_v17  ;;  %v7819_v14 = vpop.f32.mrb[203].mxu0 }
 0x4de   : > { %v8191_v39 = vadd.f32 %v9933_v9, %v8146_v40  ;;  %v9935_v11 = vadd.f32 %v7819_v14, %v6507_v43 }
 0x4df   : > { %8209 = vst [vmem:[%s12312_s13 + $0x50] sm:$0xff] %v8193_v36  ;;  %v8194_v57 = vadd.f32 %v9934_v10, %v8161_v32 }
 0x4e0   : > { %8207 = vst [vmem:[%s12312_s13 + $0x40] sm:$0xff] %v8191_v39  ;;  %v8192_v45 = vadd.f32 %v9935_v11, %v8151_v31 }
 0x4e1   : > { %8210 = vst [vmem:[%s12312_s13 + $0x58] sm:$0xff] %v8194_v57 }
 0x4e2   : > { %8208 = vst [vmem:[%s12312_s13 + $0x48] sm:$0xff] %v8192_v45  ;;  %v9922_v41 = vpop.f32.mrb[204].mxu0 }
 0x4e3   : > { %v9936_v20 = vadd.f32 %v9922_v41, %v12303_v34  ;;  %v7832_v1 = vpop.f32.mrb[205].mxu0 }
 0x4e4   : > { %v9937_v33 = vadd.f32 %v7832_v1, %v12305_v5  ;;  %v9923_v28 = vpop.f32.mrb[206].mxu0 }
 0x4e5   : > { %v8197_v52 = vadd.f32 %v9936_v20, %v8176_v48  ;;  %v9938_v62 = vadd.f32 %v9923_v28, %v12307_v0  ;;  %v7835_v15 = vpop.f32.mrb[207].mxu0 }
 0x4e6   : > { %v8195_v17 = vadd.f32 %v9937_v33, %v8166_v63  ;;  %v9939_v43 = vadd.f32 %v7835_v15, %v12309_v7 }
 0x4e7   : > { %8213 = vst [vmem:[%s12312_s13 + $0x70] sm:$0xff] %v8197_v52  ;;  %v8198_v18 = vadd.f32 %v9938_v62, %v8181_v61 }
 0x4e8   : > { %8211 = vst [vmem:[%s12312_s13 + $0x60] sm:$0xff] %v8195_v17  ;;  %v8196_v2 = vadd.f32 %v9939_v43, %v8171_v37 }
 0x4e9   : > { %8214 = vst [vmem:[%s12312_s13 + $0x78] sm:$0xff] %v8198_v18 }
 0x4ea   : > { %8212 = vst [vmem:[%s12312_s13 + $0x68] sm:$0xff] %v8196_v2 }
 0x4eb   : > { %10370 = shalt.err (!%p10367_p5)
}
 0x4ec   : > { %s10371_s29 = scalar_lea.hbm %s12336_s28, 2048  ;;  %s10375_s13 = scalar_lea.hbm %s12393_s7, 4096 }
 0x4ed   : > { %p10372_p7 = scmp.ne.s32.totalorder %s12336_s28, %s10371_s29  ;;  %p10376_p12 = scmp.lt.u32.totalorder %s12336_s28, %s12393_s7 }
 0x4ee   : > { %p10377_p13 = scmp.lt.u32.totalorder %s10375_s13, %s10371_s29  ;;  %p10379_p1 = scmp.lt.u32.totalorder %s10371_s29, %s12336_s28 }
 0x4ef   : > { %p10373_p10 = pnand %p10372_p7, %p10506_p6 }
 0x4f0   : > { %p10378_p0 = por %p10377_p13, %p10376_p12 }
 0x4f1   : > { %p10374_p11 = pneg %p10373_p10 }
 0x4f2   : > { %p10380_p2 = por %p10379_p1, %p10378_p0 }
 0x4f4   : > { %p10381_p3 = pnand %p10380_p2, %p10374_p11 }
 0x4f6   : > { %10384 = shalt.err (!%p10381_p3)
}
 0x4f7   : > { %s10425_s17 = smov 128   ;;  %s10426_s19 = smov 256  }
 0x4f8   : > { %s10427_s21 = smov 8  }
 0x4f9   : > { %10180 = dma.vmem_to_hbm [thread:$0]  (%p10506_p6), %s12339_s15, 2048, %s12336_s28, %s8216_s18, %s10425_s17, %s10426_s19, %s10427_s21  }
 0x4fa PF: > { %s8243_s22 = sand.u32 1, %s10407_s24   ;;  %p10183_p4 = pnand %p8298_p9, %p10510_p8 }
 0x4fb   : > { %s8244_s23 = scalar_lea.sflag [#allocation5], %s8243_s22 }
 0x4fc   : > { %10402 = dma.done.wait (!%p10183_p4), %s8244_s23, 2048  }
 0x4fd   : > { %10404 = vsyncadd (!%p10183_p4), %s8244_s23, 4294965248  ;;  %p17_p5 = scmp.ge.s32.totalorder %s10491_s30, 4   ;;  %s12396_s24 = smov %s10411_s25 }
 0x4fe   : > { %s12397_s25 = smov %s10415_s26  ;;  %s12398_s26 = smov %s10504_s10 }
 0x4ff   : > { %s12399_s27 = smov %s10491_s30  ;;  %19 = sbr.rel (!%p17_p5) target bundleno = 3 (0x3), region = 135 }
 0x506   :  { %8249 = vsyncpa [#allocation5], 1 }
 0x507   :  { %8251 = vsyncpa [#allocation5 + $0x1], 1 }

</bundles_post_ra>
